<compile_context>
chip_gen: v5e
topology: v5e:2x2
jax: 0.10.0
libtpu: 0.0.40
codegen_flags: <defaults>
</compile_context>

<pallas_src>
import jax
import jax.numpy as jnp
from jax.experimental import pallas as pl
from jax.experimental.pallas import tpu as pltpu

OBS_LEN = 8
PRED_LEN = 8
BATCH = 8
HID = 16          # traj_lstm_hidden_size == rela_embed_size
LATENT = 16       # config.latent_dim
# config.cond_dropout = 0.0 (dropout is identity), config.softmax_dec = False

# bf16 slab row offsets
MASK_ROW0 = 272                      # per-step neighbor masks (inv_cnt folded), 64 rows
# f32 slab row offsets
SEL_ROW = 16                         # sel_j (8,128)
OBS_ROW = 24                         # obs traj_rel flattened (64,2): row = t*8 + b
PM_ROW = 88                          # lanes 0:2 = obs_traj_pos[-1], lanes 2:4 = traj_rel[obs_len]
H0_ROW = 96
C0_ROW = 104
EZ_ROW = 112                         # reparameterize eps
EPS_ROW = 120                        # output-sampling eps flattened (64,2): row = i*8 + b


def traj_gen_kernel(w_ref, f_ref, out_ref):
    f32 = jnp.float32
    bf16 = jnp.bfloat16

    # ---------------- hoisted bf16 MXU weights ----------------
    w_ih_t = w_ref[0:16, 0:64]        # obs LSTM x->gates (i,f,o,g)
    w_hh_t = w_ref[16:32, 0:64]       # obs LSTM h->gates
    w_ih_p = w_ref[32:48, 0:64]       # pred LSTM emb->gates
    w_hh_p = w_ref[48:64, 0:64]       # pred LSTM h->gates
    w_t12 = w_ref[64:80, 0:32]        # fused latent heads (test1 | test2)
    w_ld = w_ref[80:96, 0:16]         # latent_dec
    w_pos = w_ref[96:112, 0:4]        # pred_hidden2pos
    repl = w_ref[240:256, :]          # (16,128): lane l picks dim l%16 (hid replication)

    # ---------------- hoisted f32 rows ----------------
    b_lstm_t = f_ref[0:1, 0:64]
    b_lstm_p = f_ref[1:2, 0:64]
    b_t12 = f_ref[2:3, 0:32]
    b_ld = f_ref[3:4, 0:16]
    b_dec = f_ref[4:5, 0:16]
    b_pos = f_ref[5:6, 0:4]
    b_enc = f_ref[6:7, 0:16]
    w_enc_x = f_ref[7:8, 0:16]        # inputLayer_encoder rows (VPU broadcast)
    w_enc_y = f_ref[8:9, 0:16]
    w_dmu_x = f_ref[9:10, 0:16]       # inputLayer_decoder mu/scale rows
    w_dmu_y = f_ref[10:11, 0:16]
    w_dsc_x = f_ref[11:12, 0:16]
    w_dsc_y = f_ref[12:13, 0:16]
    wsp_x_t = f_ref[13:14, :]         # pooling spatial rows tiled to 128 lanes
    wsp_y_t = f_ref[14:15, :]
    bsp_t = f_ref[15:16, :]
    sel_f = f_ref[SEL_ROW:SEL_ROW + 8, :]          # (8,128): [row == lane//HID]
    ones8 = jnp.ones((BATCH, BATCH), f32)          # MXU "sum over sublanes + broadcast"

    def gates_act(g, c):
        act = jax.nn.sigmoid(g[:, 0:3 * HID])      # i|f|o in one sigmoid (gate order i,f,o,g)
        i_g = act[:, 0:HID]
        f_g = act[:, HID:2 * HID]
        o_g = act[:, 2 * HID:3 * HID]
        c_new = f_g * c + i_g * jnp.tanh(g[:, 3 * HID:4 * HID])
        h_new = o_g * jnp.tanh(c_new)
        return h_new, c_new

    # -------- observation encoder: hoisted non-recurrent x-path (one big dot) --------
    xs = f_ref[OBS_ROW:OBS_ROW + OBS_LEN * BATCH, 0:1]          # (64,1)
    ys = f_ref[OBS_ROW:OBS_ROW + OBS_LEN * BATCH, 1:2]
    # F.dropout(p=cond_dropout) with cond_dropout=0.0 -> identity
    emb_all = jax.nn.relu(xs * w_enc_x + ys * w_enc_y + b_enc)  # (64,16)
    x_gates = jnp.dot(emb_all.astype(bf16), w_ih_t,
                      preferred_element_type=f32) + b_lstm_t    # (64,64)

    h = f_ref[H0_ROW:H0_ROW + BATCH, 0:HID]
    c = f_ref[C0_ROW:C0_ROW + BATCH, 0:HID]
    for t in range(OBS_LEN):
        g = x_gates[8 * t:8 * (t + 1), :] + jnp.dot(
            h.astype(bf16), w_hh_t, preferred_element_type=f32)
        h, c = gates_act(g, c)
    past_h = h

    # -------- latent encoder (test branch) / reparameterize / latent decoder --------
    zt = jnp.dot(past_h.astype(bf16), w_t12, preferred_element_type=f32) + b_t12
    z_mu = 4.0 * jnp.tanh(zt[:, 0:LATENT])
    z_lv = 0.5 * jax.nn.sigmoid(zt[:, LATENT:2 * LATENT])
    z = z_mu + jnp.exp(0.5 * z_lv) * f_ref[EZ_ROW:EZ_ROW + BATCH, 0:LATENT]
    dec_z = jax.nn.relu(jnp.dot(z.astype(bf16), w_ld, preferred_element_type=f32) + b_ld)
    # config.softmax_dec = False -> no softmax on dec_z

    # ---------------- prediction rollout (pred_lstm_model + pooling) ----------------
    pred_h = past_h + dec_z
    ph_b = pred_h.astype(bf16)
    pred_c = jnp.zeros_like(pred_h)
    curr_pos = f_ref[PM_ROW:PM_ROW + BATCH, 0:2]                # obs_traj_pos[-1]
    mu = f_ref[PM_ROW:PM_ROW + BATCH, 2:4]                      # traj_rel[obs_len]
    scale = jnp.zeros_like(mu)
    ctx_dctx = jnp.zeros((BATCH, HID), f32)                     # context @ w_dctx (context = 0)

    outs = []
    for i in range(PRED_LEN):
        # inputLayer_decoder(cat([context, mu, scale])): context term arrives pre-multiplied
        emb = jax.nn.relu(ctx_dctx
                          + mu[:, 0:1] * w_dmu_x + mu[:, 1:2] * w_dmu_y
                          + scale[:, 0:1] * w_dsc_x + scale[:, 1:2] * w_dsc_y
                          + b_dec)
        g = (jnp.dot(emb.astype(bf16), w_ih_p, preferred_element_type=f32)
             + jnp.dot(ph_b, w_hh_p, preferred_element_type=f32)
             + b_lstm_p)
        pred_h, pred_c = gates_act(g, pred_c)
        ph_b = pred_h.astype(bf16)

        # lane-dense social pooling stand-in (TODO(synk): real Pooling_net unavailable)
        # lane l = j*HID + d ; q path depends only on curr_pos and overlaps the LSTM.
        px = curr_pos[:, 0:1]
        py = curr_pos[:, 1:2]
        q_tile = px * wsp_x_t + py * wsp_y_t                    # (8,128): pos[i]·w at lane (j,d)
        q_nei = jnp.dot(ones8, q_tile * sel_f,
                        preferred_element_type=f32)             # rows all = pos[j(l)]·w
        r = jax.nn.relu(q_tile - q_nei + bsp_t)                 # relu(spatial emb of pos_i-pos_j)
        h_rep = jnp.dot(ph_b, repl, preferred_element_type=f32) # (8,128): pred_h[k, d(l)]
        h_nei = jnp.dot(ones8, h_rep * sel_f,
                        preferred_element_type=f32)             # rows all = pred_h[j(l), d(l)]
        msg = jax.nn.relu(r + h_nei)
        mask_i = w_ref[MASK_ROW0 + 8 * i:MASK_ROW0 + 8 * (i + 1), :]   # bf16, inv_cnt folded
        masked = msg.astype(bf16) * mask_i                      # bf16 (8,128)

        # one dot gives context@w_dctx (next-step decoder term) and context@w_pos
        R = w_ref[112:240, 0:20]                                # (128,20) bf16, loaded per step
        tmp = jnp.dot(masked, R, preferred_element_type=f32)    # (8,20)
        ctx_dctx = tmp[:, 0:HID]
        pos_out = (tmp[:, HID:HID + 4]
                   + jnp.dot(ph_b, w_pos, preferred_element_type=f32)
                   + b_pos)                                     # == (context+pred_h)@w_pos + b
        mu = pos_out[:, 0:2]
        scale = jnp.clip(pos_out[:, 2:4], -9.0, 4.0)
        out_pred = mu + jnp.exp(scale) * f_ref[EPS_ROW + 8 * i:EPS_ROW + 8 * (i + 1), 0:2]
        curr_pos = curr_pos + out_pred
        outs.append(out_pred)

    # single lane-packed store: lanes [2*i : 2*i+2] hold prediction step i
    out_ref[...] = jnp.concatenate(outs, axis=1)                # (B, 2*PRED_LEN)


@jax.jit
def trajectory_generator_forward(traj_rel, obs_traj_pos, nei_index, nei_num_index,
                                 h0, c0, eps_z, eps_out, wslab, fparams):
    # nei_num_index kept for interface parity; per-step counts come from nei_index.
    del nei_num_index

    # neighbor mask with the EXACT 1/count folded in (computed once), shipped as bf16
    cnt = jnp.maximum(jnp.sum(nei_index, axis=2, keepdims=True), 1.0)   # (PRED_LEN,B,1)
    maskx = jnp.repeat(nei_index / cnt, HID, axis=2)                    # (PRED_LEN,B,B*HID)
    maskx = maskx.reshape(PRED_LEN * BATCH, BATCH * HID).astype(jnp.bfloat16)
    w_in = jnp.concatenate([wslab, maskx], axis=0)                      # (336,128) bf16

    def pad128(x):
        return jnp.pad(x, ((0, 0), (0, 128 - x.shape[1])))

    obs_xy = traj_rel[:OBS_LEN].reshape(OBS_LEN * BATCH, 2)             # row = t*8 + b
    pos_mu = jnp.concatenate([obs_traj_pos[-1], traj_rel[OBS_LEN]], axis=1)  # (8,4)
    eps_flat = eps_out.reshape(PRED_LEN * BATCH, 2)                     # row = i*8 + b
    f_in = jnp.concatenate(
        [fparams, pad128(obs_xy), pad128(pos_mu), pad128(h0), pad128(c0),
         pad128(eps_z), pad128(eps_flat)], axis=0)                      # (184,128) f32

    vmem = pl.BlockSpec(memory_space=pltpu.MemorySpace.VMEM)
    out2d = pl.pallas_call(
        traj_gen_kernel,
        out_shape=jax.ShapeDtypeStruct((BATCH, 2 * PRED_LEN), jnp.float32),
        in_specs=[vmem, vmem],
        out_specs=vmem,
    )(w_in, f_in)
    return out2d.reshape(BATCH, PRED_LEN, 2).transpose(1, 0, 2)          # (PRED_LEN, B, 2)


# ------------- deterministic parameter construction (mirrors init_parameters) -------------
def _linear_wT(key, in_dim, out_dim, std):
    w = std * jax.random.normal(key, (out_dim, in_dim), jnp.float32)    # torch (out,in)
    return w.T                                                          # (in,out); bias = 0


def _gate_perm(m):
    # reorder LSTM gate blocks (i,f,g,o) -> (i,f,o,g) along the last axis
    return jnp.concatenate([m[..., 0:HID], m[..., HID:2 * HID],
                            m[..., 3 * HID:4 * HID], m[..., 2 * HID:3 * HID]], axis=-1)


def _lstm_split(key, in_dim, hid):
    k1, k2 = jax.random.split(key)
    limit = (6.0 / (in_dim + 4 * hid)) ** 0.5                           # xavier_uniform_
    w_ih = jax.random.uniform(k1, (4 * hid, in_dim), jnp.float32, -limit, limit)
    a = jax.random.normal(k2, (4 * hid, hid), jnp.float32)              # orthogonal_, gain=0.001
    q, r = jnp.linalg.qr(a)
    q = q * jnp.sign(jnp.diagonal(r))[None, :]
    w_hh = 0.001 * q
    b = jnp.zeros((4 * hid,), jnp.float32).at[hid:2 * hid].set(1.0)     # forget-gate bias = 1
    return _gate_perm(w_ih.T), _gate_perm(w_hh.T), _gate_perm(b.reshape(1, 4 * hid))


def make_params(key):
    ks = jax.random.split(key, 9)
    w_enc = _linear_wT(ks[0], 2, HID, 0.02)                 # inputLayer_encoder
    wih_t, whh_t, b_t = _lstm_split(ks[1], HID, HID)        # traj_lstm_model
    w_t1 = _linear_wT(ks[2], HID, LATENT, 0.02)             # inputLayer_encoder_test1
    w_t2 = _linear_wT(ks[3], HID, LATENT, 0.02)             # inputLayer_encoder_test2
    w_ld = _linear_wT(ks[4], LATENT, HID, 0.02)             # latent_dec
    w_dec = _linear_wT(ks[5], HID + 4, HID, 0.02)           # inputLayer_decoder (20 -> 16)
    wih_p, whh_p, b_p = _lstm_split(ks[6], HID, HID)        # pred_lstm_model
    w_pos = _linear_wT(ks[7], HID, 4, 0.01)                 # pred_hidden2pos
    w_sp = _linear_wT(ks[8], 2, HID, 0.02)                  # pooling spatial embedding (stand-in)
    w_t12 = jnp.concatenate([w_t1, w_t2], axis=1)           # fused latent heads (16,32)

    # folded reducer: R[l,:16] = w_dctx[l%16,:], R[l,16:20] = w_pos[l%16,:]
    R = jnp.tile(jnp.concatenate([w_dec[0:HID], w_pos], axis=1), (BATCH, 1))   # (128,20)
    repl = jnp.tile(jnp.eye(HID, dtype=jnp.float32), (1, BATCH))               # (16,128)
    sel = jnp.repeat(jnp.eye(BATCH, dtype=jnp.float32), HID, axis=1)           # (8,128)

    # bf16 MXU weight slab (272,128); the wrapper appends 64 mask rows -> (336,128)
    ws = jnp.zeros((272, 128), jnp.float32)
    ws = ws.at[0:16, 0:64].set(wih_t)
    ws = ws.at[16:32, 0:64].set(whh_t)
    ws = ws.at[32:48, 0:64].set(wih_p)
    ws = ws.at[48:64, 0:64].set(whh_p)
    ws = ws.at[64:80, 0:32].set(w_t12)
    ws = ws.at[80:96, 0:16].set(w_ld)
    ws = ws.at[96:112, 0:4].set(w_pos)
    ws = ws.at[112:240, 0:20].set(R)
    ws = ws.at[240:256, :].set(repl)
    wslab = ws.astype(jnp.bfloat16)

    # f32 param slab (24,128): biases + VPU broadcast rows + tiled pooling rows + sel
    fs = jnp.zeros((24, 128), jnp.float32)
    fs = fs.at[0, 0:64].set(b_t[0])
    fs = fs.at[1, 0:64].set(b_p[0])
    # rows 2..6: b_t12, b_ld, b_dec, b_pos, b_enc are zero (torch constant_ 0.0)
    fs = fs.at[7, 0:16].set(w_enc[0])
    fs = fs.at[8, 0:16].set(w_enc[1])
    fs = fs.at[9, 0:16].set(w_dec[HID + 0])                 # mu_x row
    fs = fs.at[10, 0:16].set(w_dec[HID + 1])                # mu_y row
    fs = fs.at[11, 0:16].set(w_dec[HID + 2])                # scale_x row
    fs = fs.at[12, 0:16].set(w_dec[HID + 3])                # scale_y row
    fs = fs.at[13, :].set(jnp.tile(w_sp[0], BATCH))         # w_sp x-row tiled over neighbors
    fs = fs.at[14, :].set(jnp.tile(w_sp[1], BATCH))         # w_sp y-row tiled
    # row 15: b_sp tiled -> zero
    fs = fs.at[16:24, :].set(sel)
    return wslab, fs


if __name__ == "__main__":
    key = jax.random.PRNGKey(0)
    k = jax.random.split(key, 10)

    traj_rel = 0.1 * jax.random.normal(k[0], (OBS_LEN + PRED_LEN, BATCH, 2), jnp.float32)
    obs_traj_pos = jnp.cumsum(
        0.5 * jax.random.normal(k[1], (OBS_LEN, BATCH, 2), jnp.float32), axis=0)
    nei_raw = (jax.random.uniform(k[2], (PRED_LEN, BATCH, BATCH)) > 0.5).astype(jnp.float32)
    nei_index = nei_raw * (1.0 - jnp.eye(BATCH, dtype=jnp.float32))[None]   # no self-edges
    nei_num_index = jnp.maximum(jnp.sum(nei_index[0], axis=-1, keepdims=True), 1.0)

    # torch.randn calls in the forward pass, precomputed host-side:
    h0 = jax.random.normal(k[3], (BATCH, HID), jnp.float32)        # init_hidden_traj_lstm
    c0 = jax.random.normal(k[4], (BATCH, HID), jnp.float32)
    eps_z = jax.random.normal(k[5], (BATCH, LATENT), jnp.float32)          # reparameterize eps
    eps_out = jax.random.normal(k[6], (PRED_LEN, BATCH, 2), jnp.float32)   # output sampling eps

    wslab, fparams = make_params(k[7])

    out = trajectory_generator_forward(traj_rel, obs_traj_pos, nei_index, nei_num_index,
                                       h0, c0, eps_z, eps_out, wslab, fparams)
    out = jax.block_until_ready(out)

    assert out.shape == (PRED_LEN, BATCH, 2)
    assert bool(jnp.all(jnp.isfinite(out)))
    print("KERNEL_OK")
</pallas_src>

<mosaic_0001>
module attributes {stable_mosaic.version = 11 : i64} {
  func.func @traj_gen_kernel(%arg0: memref<336x128xbf16, #tpu.memory_space<vmem>>, %arg1: memref<184x128xf32, #tpu.memory_space<vmem>>, %arg2: memref<8x16xf32, #tpu.memory_space<vmem>>) attributes {dimension_semantics = [], scalar_prefetch = 0 : i64, scratch_operands = 0 : i64, tpu.core_type = #tpu.core_type<tc>} {
    %c0 = arith.constant 0 : index
    %c0_0 = arith.constant 0 : index
    %0 = vector.load %arg0[%c0, %c0_0] : memref<336x128xbf16, #tpu.memory_space<vmem>>, vector<16x64xbf16>
    %c16 = arith.constant 16 : index
    %c0_1 = arith.constant 0 : index
    %1 = vector.load %arg0[%c16, %c0_1] : memref<336x128xbf16, #tpu.memory_space<vmem>>, vector<16x64xbf16>
    %c32 = arith.constant 32 : index
    %c0_2 = arith.constant 0 : index
    %2 = vector.load %arg0[%c32, %c0_2] : memref<336x128xbf16, #tpu.memory_space<vmem>>, vector<16x64xbf16>
    %c48 = arith.constant 48 : index
    %c0_3 = arith.constant 0 : index
    %3 = vector.load %arg0[%c48, %c0_3] : memref<336x128xbf16, #tpu.memory_space<vmem>>, vector<16x64xbf16>
    %c64 = arith.constant 64 : index
    %c0_4 = arith.constant 0 : index
    %4 = vector.load %arg0[%c64, %c0_4] : memref<336x128xbf16, #tpu.memory_space<vmem>>, vector<16x32xbf16>
    %c80 = arith.constant 80 : index
    %c0_5 = arith.constant 0 : index
    %5 = vector.load %arg0[%c80, %c0_5] : memref<336x128xbf16, #tpu.memory_space<vmem>>, vector<16x16xbf16>
    %c96 = arith.constant 96 : index
    %c0_6 = arith.constant 0 : index
    %6 = vector.load %arg0[%c96, %c0_6] : memref<336x128xbf16, #tpu.memory_space<vmem>>, vector<16x4xbf16>
    %c240 = arith.constant 240 : index
    %c0_7 = arith.constant 0 : index
    %7 = vector.load %arg0[%c240, %c0_7] : memref<336x128xbf16, #tpu.memory_space<vmem>>, vector<16x128xbf16>
    %c0_8 = arith.constant 0 : index
    %c0_9 = arith.constant 0 : index
    %8 = vector.load %arg1[%c0_8, %c0_9] : memref<184x128xf32, #tpu.memory_space<vmem>>, vector<1x64xf32>
    %c1 = arith.constant 1 : index
    %c0_10 = arith.constant 0 : index
    %9 = vector.load %arg1[%c1, %c0_10] : memref<184x128xf32, #tpu.memory_space<vmem>>, vector<1x64xf32>
    %c2 = arith.constant 2 : index
    %c0_11 = arith.constant 0 : index
    %10 = vector.load %arg1[%c2, %c0_11] : memref<184x128xf32, #tpu.memory_space<vmem>>, vector<1x32xf32>
    %c3 = arith.constant 3 : index
    %c0_12 = arith.constant 0 : index
    %11 = vector.load %arg1[%c3, %c0_12] : memref<184x128xf32, #tpu.memory_space<vmem>>, vector<1x16xf32>
    %c4 = arith.constant 4 : index
    %c0_13 = arith.constant 0 : index
    %12 = vector.load %arg1[%c4, %c0_13] : memref<184x128xf32, #tpu.memory_space<vmem>>, vector<1x16xf32>
    %c5 = arith.constant 5 : index
    %c0_14 = arith.constant 0 : index
    %13 = vector.load %arg1[%c5, %c0_14] : memref<184x128xf32, #tpu.memory_space<vmem>>, vector<1x4xf32>
    %c6 = arith.constant 6 : index
    %c0_15 = arith.constant 0 : index
    %14 = vector.load %arg1[%c6, %c0_15] : memref<184x128xf32, #tpu.memory_space<vmem>>, vector<1x16xf32>
    %c7 = arith.constant 7 : index
    %c0_16 = arith.constant 0 : index
    %15 = vector.load %arg1[%c7, %c0_16] : memref<184x128xf32, #tpu.memory_space<vmem>>, vector<1x16xf32>
    %c8 = arith.constant 8 : index
    %c0_17 = arith.constant 0 : index
    %16 = vector.load %arg1[%c8, %c0_17] : memref<184x128xf32, #tpu.memory_space<vmem>>, vector<1x16xf32>
    %c9 = arith.constant 9 : index
    %c0_18 = arith.constant 0 : index
    %17 = vector.load %arg1[%c9, %c0_18] : memref<184x128xf32, #tpu.memory_space<vmem>>, vector<1x16xf32>
    %c10 = arith.constant 10 : index
    %c0_19 = arith.constant 0 : index
    %18 = vector.load %arg1[%c10, %c0_19] : memref<184x128xf32, #tpu.memory_space<vmem>>, vector<1x16xf32>
    %c11 = arith.constant 11 : index
    %c0_20 = arith.constant 0 : index
    %19 = vector.load %arg1[%c11, %c0_20] : memref<184x128xf32, #tpu.memory_space<vmem>>, vector<1x16xf32>
    %c12 = arith.constant 12 : index
    %c0_21 = arith.constant 0 : index
    %20 = vector.load %arg1[%c12, %c0_21] : memref<184x128xf32, #tpu.memory_space<vmem>>, vector<1x16xf32>
    %c13 = arith.constant 13 : index
    %c0_22 = arith.constant 0 : index
    %21 = vector.load %arg1[%c13, %c0_22] : memref<184x128xf32, #tpu.memory_space<vmem>>, vector<1x128xf32>
    %c14 = arith.constant 14 : index
    %c0_23 = arith.constant 0 : index
    %22 = vector.load %arg1[%c14, %c0_23] : memref<184x128xf32, #tpu.memory_space<vmem>>, vector<1x128xf32>
    %c15 = arith.constant 15 : index
    %c0_24 = arith.constant 0 : index
    %23 = vector.load %arg1[%c15, %c0_24] : memref<184x128xf32, #tpu.memory_space<vmem>>, vector<1x128xf32>
    %c16_25 = arith.constant 16 : index
    %c0_26 = arith.constant 0 : index
    %24 = vector.load %arg1[%c16_25, %c0_26] : memref<184x128xf32, #tpu.memory_space<vmem>>, vector<8x128xf32>
    %cst = arith.constant 1.000000e+00 : f32
    %25 = vector.broadcast %cst : f32 to vector<8x8xf32>
    %c24 = arith.constant 24 : index
    %c0_27 = arith.constant 0 : index
    %26 = vector.load %arg1[%c24, %c0_27] : memref<184x128xf32, #tpu.memory_space<vmem>>, vector<64x1xf32>
    %c24_28 = arith.constant 24 : index
    %c1_29 = arith.constant 1 : index
    %27 = vector.load %arg1[%c24_28, %c1_29] : memref<184x128xf32, #tpu.memory_space<vmem>>, vector<64x1xf32>
    %28 = vector.broadcast %26 : vector<64x1xf32> to vector<64x16xf32>
    %29 = vector.broadcast %15 : vector<1x16xf32> to vector<64x16xf32>
    %30 = arith.mulf %28, %29 : vector<64x16xf32>
    %31 = vector.broadcast %27 : vector<64x1xf32> to vector<64x16xf32>
    %32 = vector.broadcast %16 : vector<1x16xf32> to vector<64x16xf32>
    %33 = arith.mulf %31, %32 : vector<64x16xf32>
    %34 = arith.addf %30, %33 : vector<64x16xf32>
    %35 = vector.broadcast %14 : vector<1x16xf32> to vector<64x16xf32>
    %36 = arith.addf %34, %35 : vector<64x16xf32>
    %cst_30 = arith.constant 0.000000e+00 : f32
    %37 = vector.broadcast %cst_30 : f32 to vector<64x16xf32>
    %38 = arith.maximumf %36, %37 : vector<64x16xf32>
    %39 = arith.truncf %38 : vector<64x16xf32> to vector<64x16xbf16>
    %cst_31 = arith.constant dense<0.000000e+00> : vector<64x64xf32>
    %40 = tpu.matmul %39, %0, %cst_31 {dimension_numbers = #tpu.dot_dimension_numbers<[1], [0], [0], [1], [0, 0, 1, 1], [], []>} : vector<64x16xbf16>, vector<16x64xbf16>, vector<64x64xf32> -> vector<64x64xf32>
    %41 = vector.broadcast %8 : vector<1x64xf32> to vector<64x64xf32>
    %42 = arith.addf %40, %41 : vector<64x64xf32>
    %c96_32 = arith.constant 96 : index
    %c0_33 = arith.constant 0 : index
    %43 = vector.load %arg1[%c96_32, %c0_33] : memref<184x128xf32, #tpu.memory_space<vmem>>, vector<8x16xf32>
    %c104 = arith.constant 104 : index
    %c0_34 = arith.constant 0 : index
    %44 = vector.load %arg1[%c104, %c0_34] : memref<184x128xf32, #tpu.memory_space<vmem>>, vector<8x16xf32>
    %45 = vector.extract_strided_slice %42 {offsets = [0, 0], sizes = [8, 64], strides = [1, 1]} : vector<64x64xf32> to vector<8x64xf32>
    %46 = arith.truncf %43 : vector<8x16xf32> to vector<8x16xbf16>
    %cst_35 = arith.constant dense<0.000000e+00> : vector<8x64xf32>
    %47 = tpu.matmul %46, %1, %cst_35 {dimension_numbers = #tpu.dot_dimension_numbers<[1], [0], [0], [1], [0, 0, 1, 1], [], []>} : vector<8x16xbf16>, vector<16x64xbf16>, vector<8x64xf32> -> vector<8x64xf32>
    %48 = arith.addf %45, %47 : vector<8x64xf32>
    %49 = vector.extract_strided_slice %48 {offsets = [0, 0], sizes = [8, 48], strides = [1, 1]} : vector<8x64xf32> to vector<8x48xf32>
    %50 = arith.negf %49 : vector<8x48xf32>
    %51 = math.exp %50 : vector<8x48xf32>
    %cst_36 = arith.constant 1.000000e+00 : f32
    %52 = vector.broadcast %cst_36 : f32 to vector<8x48xf32>
    %53 = arith.addf %52, %51 : vector<8x48xf32>
    %54 = arith.divf %52, %53 : vector<8x48xf32>
    %55 = vector.extract_strided_slice %54 {offsets = [0, 0], sizes = [8, 16], strides = [1, 1]} : vector<8x48xf32> to vector<8x16xf32>
    %56 = vector.extract_strided_slice %54 {offsets = [0, 16], sizes = [8, 16], strides = [1, 1]} : vector<8x48xf32> to vector<8x16xf32>
    %57 = vector.extract_strided_slice %54 {offsets = [0, 32], sizes = [8, 16], strides = [1, 1]} : vector<8x48xf32> to vector<8x16xf32>
    %58 = arith.mulf %56, %44 : vector<8x16xf32>
    %59 = vector.extract_strided_slice %48 {offsets = [0, 48], sizes = [8, 16], strides = [1, 1]} : vector<8x64xf32> to vector<8x16xf32>
    %60 = math.tanh %59 : vector<8x16xf32>
    %61 = arith.mulf %55, %60 : vector<8x16xf32>
    %62 = arith.addf %58, %61 : vector<8x16xf32>
    %63 = math.tanh %62 : vector<8x16xf32>
    %64 = arith.mulf %57, %63 : vector<8x16xf32>
    %65 = vector.extract_strided_slice %42 {offsets = [8, 0], sizes = [8, 64], strides = [1, 1]} : vector<64x64xf32> to vector<8x64xf32>
    %66 = arith.truncf %64 : vector<8x16xf32> to vector<8x16xbf16>
    %cst_37 = arith.constant dense<0.000000e+00> : vector<8x64xf32>
    %67 = tpu.matmul %66, %1, %cst_37 {dimension_numbers = #tpu.dot_dimension_numbers<[1], [0], [0], [1], [0, 0, 1, 1], [], []>} : vector<8x16xbf16>, vector<16x64xbf16>, vector<8x64xf32> -> vector<8x64xf32>
    %68 = arith.addf %65, %67 : vector<8x64xf32>
    %69 = vector.extract_strided_slice %68 {offsets = [0, 0], sizes = [8, 48], strides = [1, 1]} : vector<8x64xf32> to vector<8x48xf32>
    %70 = arith.negf %69 : vector<8x48xf32>
    %71 = math.exp %70 : vector<8x48xf32>
    %cst_38 = arith.constant 1.000000e+00 : f32
    %72 = vector.broadcast %cst_38 : f32 to vector<8x48xf32>
    %73 = arith.addf %72, %71 : vector<8x48xf32>
    %74 = arith.divf %72, %73 : vector<8x48xf32>
    %75 = vector.extract_strided_slice %74 {offsets = [0, 0], sizes = [8, 16], strides = [1, 1]} : vector<8x48xf32> to vector<8x16xf32>
    %76 = vector.extract_strided_slice %74 {offsets = [0, 16], sizes = [8, 16], strides = [1, 1]} : vector<8x48xf32> to vector<8x16xf32>
    %77 = vector.extract_strided_slice %74 {offsets = [0, 32], sizes = [8, 16], strides = [1, 1]} : vector<8x48xf32> to vector<8x16xf32>
    %78 = arith.mulf %76, %62 : vector<8x16xf32>
    %79 = vector.extract_strided_slice %68 {offsets = [0, 48], sizes = [8, 16], strides = [1, 1]} : vector<8x64xf32> to vector<8x16xf32>
    %80 = math.tanh %79 : vector<8x16xf32>
    %81 = arith.mulf %75, %80 : vector<8x16xf32>
    %82 = arith.addf %78, %81 : vector<8x16xf32>
    %83 = math.tanh %82 : vector<8x16xf32>
    %84 = arith.mulf %77, %83 : vector<8x16xf32>
    %85 = vector.extract_strided_slice %42 {offsets = [16, 0], sizes = [8, 64], strides = [1, 1]} : vector<64x64xf32> to vector<8x64xf32>
    %86 = arith.truncf %84 : vector<8x16xf32> to vector<8x16xbf16>
    %cst_39 = arith.constant dense<0.000000e+00> : vector<8x64xf32>
    %87 = tpu.matmul %86, %1, %cst_39 {dimension_numbers = #tpu.dot_dimension_numbers<[1], [0], [0], [1], [0, 0, 1, 1], [], []>} : vector<8x16xbf16>, vector<16x64xbf16>, vector<8x64xf32> -> vector<8x64xf32>
    %88 = arith.addf %85, %87 : vector<8x64xf32>
    %89 = vector.extract_strided_slice %88 {offsets = [0, 0], sizes = [8, 48], strides = [1, 1]} : vector<8x64xf32> to vector<8x48xf32>
    %90 = arith.negf %89 : vector<8x48xf32>
    %91 = math.exp %90 : vector<8x48xf32>
    %cst_40 = arith.constant 1.000000e+00 : f32
    %92 = vector.broadcast %cst_40 : f32 to vector<8x48xf32>
    %93 = arith.addf %92, %91 : vector<8x48xf32>
    %94 = arith.divf %92, %93 : vector<8x48xf32>
    %95 = vector.extract_strided_slice %94 {offsets = [0, 0], sizes = [8, 16], strides = [1, 1]} : vector<8x48xf32> to vector<8x16xf32>
    %96 = vector.extract_strided_slice %94 {offsets = [0, 16], sizes = [8, 16], strides = [1, 1]} : vector<8x48xf32> to vector<8x16xf32>
    %97 = vector.extract_strided_slice %94 {offsets = [0, 32], sizes = [8, 16], strides = [1, 1]} : vector<8x48xf32> to vector<8x16xf32>
    %98 = arith.mulf %96, %82 : vector<8x16xf32>
    %99 = vector.extract_strided_slice %88 {offsets = [0, 48], sizes = [8, 16], strides = [1, 1]} : vector<8x64xf32> to vector<8x16xf32>
    %100 = math.tanh %99 : vector<8x16xf32>
    %101 = arith.mulf %95, %100 : vector<8x16xf32>
    %102 = arith.addf %98, %101 : vector<8x16xf32>
    %103 = math.tanh %102 : vector<8x16xf32>
    %104 = arith.mulf %97, %103 : vector<8x16xf32>
    %105 = vector.extract_strided_slice %42 {offsets = [24, 0], sizes = [8, 64], strides = [1, 1]} : vector<64x64xf32> to vector<8x64xf32>
    %106 = arith.truncf %104 : vector<8x16xf32> to vector<8x16xbf16>
    %cst_41 = arith.constant dense<0.000000e+00> : vector<8x64xf32>
    %107 = tpu.matmul %106, %1, %cst_41 {dimension_numbers = #tpu.dot_dimension_numbers<[1], [0], [0], [1], [0, 0, 1, 1], [], []>} : vector<8x16xbf16>, vector<16x64xbf16>, vector<8x64xf32> -> vector<8x64xf32>
    %108 = arith.addf %105, %107 : vector<8x64xf32>
    %109 = vector.extract_strided_slice %108 {offsets = [0, 0], sizes = [8, 48], strides = [1, 1]} : vector<8x64xf32> to vector<8x48xf32>
    %110 = arith.negf %109 : vector<8x48xf32>
    %111 = math.exp %110 : vector<8x48xf32>
    %cst_42 = arith.constant 1.000000e+00 : f32
    %112 = vector.broadcast %cst_42 : f32 to vector<8x48xf32>
    %113 = arith.addf %112, %111 : vector<8x48xf32>
    %114 = arith.divf %112, %113 : vector<8x48xf32>
    %115 = vector.extract_strided_slice %114 {offsets = [0, 0], sizes = [8, 16], strides = [1, 1]} : vector<8x48xf32> to vector<8x16xf32>
    %116 = vector.extract_strided_slice %114 {offsets = [0, 16], sizes = [8, 16], strides = [1, 1]} : vector<8x48xf32> to vector<8x16xf32>
    %117 = vector.extract_strided_slice %114 {offsets = [0, 32], sizes = [8, 16], strides = [1, 1]} : vector<8x48xf32> to vector<8x16xf32>
    %118 = arith.mulf %116, %102 : vector<8x16xf32>
    %119 = vector.extract_strided_slice %108 {offsets = [0, 48], sizes = [8, 16], strides = [1, 1]} : vector<8x64xf32> to vector<8x16xf32>
    %120 = math.tanh %119 : vector<8x16xf32>
    %121 = arith.mulf %115, %120 : vector<8x16xf32>
    %122 = arith.addf %118, %121 : vector<8x16xf32>
    %123 = math.tanh %122 : vector<8x16xf32>
    %124 = arith.mulf %117, %123 : vector<8x16xf32>
    %125 = vector.extract_strided_slice %42 {offsets = [32, 0], sizes = [8, 64], strides = [1, 1]} : vector<64x64xf32> to vector<8x64xf32>
    %126 = arith.truncf %124 : vector<8x16xf32> to vector<8x16xbf16>
    %cst_43 = arith.constant dense<0.000000e+00> : vector<8x64xf32>
    %127 = tpu.matmul %126, %1, %cst_43 {dimension_numbers = #tpu.dot_dimension_numbers<[1], [0], [0], [1], [0, 0, 1, 1], [], []>} : vector<8x16xbf16>, vector<16x64xbf16>, vector<8x64xf32> -> vector<8x64xf32>
    %128 = arith.addf %125, %127 : vector<8x64xf32>
    %129 = vector.extract_strided_slice %128 {offsets = [0, 0], sizes = [8, 48], strides = [1, 1]} : vector<8x64xf32> to vector<8x48xf32>
    %130 = arith.negf %129 : vector<8x48xf32>
    %131 = math.exp %130 : vector<8x48xf32>
    %cst_44 = arith.constant 1.000000e+00 : f32
    %132 = vector.broadcast %cst_44 : f32 to vector<8x48xf32>
    %133 = arith.addf %132, %131 : vector<8x48xf32>
    %134 = arith.divf %132, %133 : vector<8x48xf32>
    %135 = vector.extract_strided_slice %134 {offsets = [0, 0], sizes = [8, 16], strides = [1, 1]} : vector<8x48xf32> to vector<8x16xf32>
    %136 = vector.extract_strided_slice %134 {offsets = [0, 16], sizes = [8, 16], strides = [1, 1]} : vector<8x48xf32> to vector<8x16xf32>
    %137 = vector.extract_strided_slice %134 {offsets = [0, 32], sizes = [8, 16], strides = [1, 1]} : vector<8x48xf32> to vector<8x16xf32>
    %138 = arith.mulf %136, %122 : vector<8x16xf32>
    %139 = vector.extract_strided_slice %128 {offsets = [0, 48], sizes = [8, 16], strides = [1, 1]} : vector<8x64xf32> to vector<8x16xf32>
    %140 = math.tanh %139 : vector<8x16xf32>
    %141 = arith.mulf %135, %140 : vector<8x16xf32>
    %142 = arith.addf %138, %141 : vector<8x16xf32>
    %143 = math.tanh %142 : vector<8x16xf32>
    %144 = arith.mulf %137, %143 : vector<8x16xf32>
    %145 = vector.extract_strided_slice %42 {offsets = [40, 0], sizes = [8, 64], strides = [1, 1]} : vector<64x64xf32> to vector<8x64xf32>
    %146 = arith.truncf %144 : vector<8x16xf32> to vector<8x16xbf16>
    %cst_45 = arith.constant dense<0.000000e+00> : vector<8x64xf32>
    %147 = tpu.matmul %146, %1, %cst_45 {dimension_numbers = #tpu.dot_dimension_numbers<[1], [0], [0], [1], [0, 0, 1, 1], [], []>} : vector<8x16xbf16>, vector<16x64xbf16>, vector<8x64xf32> -> vector<8x64xf32>
    %148 = arith.addf %145, %147 : vector<8x64xf32>
    %149 = vector.extract_strided_slice %148 {offsets = [0, 0], sizes = [8, 48], strides = [1, 1]} : vector<8x64xf32> to vector<8x48xf32>
    %150 = arith.negf %149 : vector<8x48xf32>
    %151 = math.exp %150 : vector<8x48xf32>
    %cst_46 = arith.constant 1.000000e+00 : f32
    %152 = vector.broadcast %cst_46 : f32 to vector<8x48xf32>
    %153 = arith.addf %152, %151 : vector<8x48xf32>
    %154 = arith.divf %152, %153 : vector<8x48xf32>
    %155 = vector.extract_strided_slice %154 {offsets = [0, 0], sizes = [8, 16], strides = [1, 1]} : vector<8x48xf32> to vector<8x16xf32>
    %156 = vector.extract_strided_slice %154 {offsets = [0, 16], sizes = [8, 16], strides = [1, 1]} : vector<8x48xf32> to vector<8x16xf32>
    %157 = vector.extract_strided_slice %154 {offsets = [0, 32], sizes = [8, 16], strides = [1, 1]} : vector<8x48xf32> to vector<8x16xf32>
    %158 = arith.mulf %156, %142 : vector<8x16xf32>
    %159 = vector.extract_strided_slice %148 {offsets = [0, 48], sizes = [8, 16], strides = [1, 1]} : vector<8x64xf32> to vector<8x16xf32>
    %160 = math.tanh %159 : vector<8x16xf32>
    %161 = arith.mulf %155, %160 : vector<8x16xf32>
    %162 = arith.addf %158, %161 : vector<8x16xf32>
    %163 = math.tanh %162 : vector<8x16xf32>
    %164 = arith.mulf %157, %163 : vector<8x16xf32>
    %165 = vector.extract_strided_slice %42 {offsets = [48, 0], sizes = [8, 64], strides = [1, 1]} : vector<64x64xf32> to vector<8x64xf32>
    %166 = arith.truncf %164 : vector<8x16xf32> to vector<8x16xbf16>
    %cst_47 = arith.constant dense<0.000000e+00> : vector<8x64xf32>
    %167 = tpu.matmul %166, %1, %cst_47 {dimension_numbers = #tpu.dot_dimension_numbers<[1], [0], [0], [1], [0, 0, 1, 1], [], []>} : vector<8x16xbf16>, vector<16x64xbf16>, vector<8x64xf32> -> vector<8x64xf32>
    %168 = arith.addf %165, %167 : vector<8x64xf32>
    %169 = vector.extract_strided_slice %168 {offsets = [0, 0], sizes = [8, 48], strides = [1, 1]} : vector<8x64xf32> to vector<8x48xf32>
    %170 = arith.negf %169 : vector<8x48xf32>
    %171 = math.exp %170 : vector<8x48xf32>
    %cst_48 = arith.constant 1.000000e+00 : f32
    %172 = vector.broadcast %cst_48 : f32 to vector<8x48xf32>
    %173 = arith.addf %172, %171 : vector<8x48xf32>
    %174 = arith.divf %172, %173 : vector<8x48xf32>
    %175 = vector.extract_strided_slice %174 {offsets = [0, 0], sizes = [8, 16], strides = [1, 1]} : vector<8x48xf32> to vector<8x16xf32>
    %176 = vector.extract_strided_slice %174 {offsets = [0, 16], sizes = [8, 16], strides = [1, 1]} : vector<8x48xf32> to vector<8x16xf32>
    %177 = vector.extract_strided_slice %174 {offsets = [0, 32], sizes = [8, 16], strides = [1, 1]} : vector<8x48xf32> to vector<8x16xf32>
    %178 = arith.mulf %176, %162 : vector<8x16xf32>
    %179 = vector.extract_strided_slice %168 {offsets = [0, 48], sizes = [8, 16], strides = [1, 1]} : vector<8x64xf32> to vector<8x16xf32>
    %180 = math.tanh %179 : vector<8x16xf32>
    %181 = arith.mulf %175, %180 : vector<8x16xf32>
    %182 = arith.addf %178, %181 : vector<8x16xf32>
    %183 = math.tanh %182 : vector<8x16xf32>
    %184 = arith.mulf %177, %183 : vector<8x16xf32>
    %185 = vector.extract_strided_slice %42 {offsets = [56, 0], sizes = [8, 64], strides = [1, 1]} : vector<64x64xf32> to vector<8x64xf32>
    %186 = arith.truncf %184 : vector<8x16xf32> to vector<8x16xbf16>
    %cst_49 = arith.constant dense<0.000000e+00> : vector<8x64xf32>
    %187 = tpu.matmul %186, %1, %cst_49 {dimension_numbers = #tpu.dot_dimension_numbers<[1], [0], [0], [1], [0, 0, 1, 1], [], []>} : vector<8x16xbf16>, vector<16x64xbf16>, vector<8x64xf32> -> vector<8x64xf32>
    %188 = arith.addf %185, %187 : vector<8x64xf32>
    %189 = vector.extract_strided_slice %188 {offsets = [0, 0], sizes = [8, 48], strides = [1, 1]} : vector<8x64xf32> to vector<8x48xf32>
    %190 = arith.negf %189 : vector<8x48xf32>
    %191 = math.exp %190 : vector<8x48xf32>
    %cst_50 = arith.constant 1.000000e+00 : f32
    %192 = vector.broadcast %cst_50 : f32 to vector<8x48xf32>
    %193 = arith.addf %192, %191 : vector<8x48xf32>
    %194 = arith.divf %192, %193 : vector<8x48xf32>
    %195 = vector.extract_strided_slice %194 {offsets = [0, 0], sizes = [8, 16], strides = [1, 1]} : vector<8x48xf32> to vector<8x16xf32>
    %196 = vector.extract_strided_slice %194 {offsets = [0, 16], sizes = [8, 16], strides = [1, 1]} : vector<8x48xf32> to vector<8x16xf32>
    %197 = vector.extract_strided_slice %194 {offsets = [0, 32], sizes = [8, 16], strides = [1, 1]} : vector<8x48xf32> to vector<8x16xf32>
    %198 = arith.mulf %196, %182 : vector<8x16xf32>
    %199 = vector.extract_strided_slice %188 {offsets = [0, 48], sizes = [8, 16], strides = [1, 1]} : vector<8x64xf32> to vector<8x16xf32>
    %200 = math.tanh %199 : vector<8x16xf32>
    %201 = arith.mulf %195, %200 : vector<8x16xf32>
    %202 = arith.addf %198, %201 : vector<8x16xf32>
    %203 = math.tanh %202 : vector<8x16xf32>
    %204 = arith.mulf %197, %203 : vector<8x16xf32>
    %205 = arith.truncf %204 : vector<8x16xf32> to vector<8x16xbf16>
    %cst_51 = arith.constant dense<0.000000e+00> : vector<8x32xf32>
    %206 = tpu.matmul %205, %4, %cst_51 {dimension_numbers = #tpu.dot_dimension_numbers<[1], [0], [0], [1], [0, 0, 1, 1], [], []>} : vector<8x16xbf16>, vector<16x32xbf16>, vector<8x32xf32> -> vector<8x32xf32>
    %207 = vector.broadcast %10 : vector<1x32xf32> to vector<8x32xf32>
    %208 = arith.addf %206, %207 : vector<8x32xf32>
    %209 = vector.extract_strided_slice %208 {offsets = [0, 0], sizes = [8, 16], strides = [1, 1]} : vector<8x32xf32> to vector<8x16xf32>
    %210 = math.tanh %209 : vector<8x16xf32>
    %cst_52 = arith.constant 4.000000e+00 : f32
    %211 = vector.broadcast %cst_52 : f32 to vector<8x16xf32>
    %212 = arith.mulf %211, %210 : vector<8x16xf32>
    %213 = vector.extract_strided_slice %208 {offsets = [0, 16], sizes = [8, 16], strides = [1, 1]} : vector<8x32xf32> to vector<8x16xf32>
    %214 = arith.negf %213 : vector<8x16xf32>
    %215 = math.exp %214 : vector<8x16xf32>
    %cst_53 = arith.constant 1.000000e+00 : f32
    %216 = vector.broadcast %cst_53 : f32 to vector<8x16xf32>
    %217 = arith.addf %216, %215 : vector<8x16xf32>
    %218 = arith.divf %216, %217 : vector<8x16xf32>
    %cst_54 = arith.constant 5.000000e-01 : f32
    %219 = vector.broadcast %cst_54 : f32 to vector<8x16xf32>
    %220 = arith.mulf %219, %218 : vector<8x16xf32>
    %cst_55 = arith.constant 5.000000e-01 : f32
    %221 = vector.broadcast %cst_55 : f32 to vector<8x16xf32>
    %222 = arith.mulf %221, %220 : vector<8x16xf32>
    %223 = math.exp %222 : vector<8x16xf32>
    %c112 = arith.constant 112 : index
    %c0_56 = arith.constant 0 : index
    %224 = vector.load %arg1[%c112, %c0_56] : memref<184x128xf32, #tpu.memory_space<vmem>>, vector<8x16xf32>
    %225 = arith.mulf %223, %224 : vector<8x16xf32>
    %226 = arith.addf %212, %225 : vector<8x16xf32>
    %227 = arith.truncf %226 : vector<8x16xf32> to vector<8x16xbf16>
    %cst_57 = arith.constant dense<0.000000e+00> : vector<8x16xf32>
    %228 = tpu.matmul %227, %5, %cst_57 {dimension_numbers = #tpu.dot_dimension_numbers<[1], [0], [0], [1], [0, 0, 1, 1], [], []>} : vector<8x16xbf16>, vector<16x16xbf16>, vector<8x16xf32> -> vector<8x16xf32>
    %229 = vector.broadcast %11 : vector<1x16xf32> to vector<8x16xf32>
    %230 = arith.addf %228, %229 : vector<8x16xf32>
    %cst_58 = arith.constant 0.000000e+00 : f32
    %231 = vector.broadcast %cst_58 : f32 to vector<8x16xf32>
    %232 = arith.maximumf %230, %231 : vector<8x16xf32>
    %233 = arith.addf %204, %232 : vector<8x16xf32>
    %234 = arith.truncf %233 : vector<8x16xf32> to vector<8x16xbf16>
    %cst_59 = arith.constant 0.000000e+00 : f32
    %235 = vector.broadcast %cst_59 : f32 to vector<8x16xf32>
    %c88 = arith.constant 88 : index
    %c0_60 = arith.constant 0 : index
    %236 = vector.load %arg1[%c88, %c0_60] : memref<184x128xf32, #tpu.memory_space<vmem>>, vector<8x2xf32>
    %c88_61 = arith.constant 88 : index
    %c2_62 = arith.constant 2 : index
    %237 = vector.load %arg1[%c88_61, %c2_62] : memref<184x128xf32, #tpu.memory_space<vmem>>, vector<8x2xf32>
    %cst_63 = arith.constant 0.000000e+00 : f32
    %238 = vector.broadcast %cst_63 : f32 to vector<8x2xf32>
    %cst_64 = arith.constant 0.000000e+00 : f32
    %239 = vector.broadcast %cst_64 : f32 to vector<8x16xf32>
    %240 = vector.extract_strided_slice %237 {offsets = [0, 0], sizes = [8, 1], strides = [1, 1]} : vector<8x2xf32> to vector<8x1xf32>
    %241 = vector.broadcast %240 : vector<8x1xf32> to vector<8x16xf32>
    %242 = vector.broadcast %17 : vector<1x16xf32> to vector<8x16xf32>
    %243 = arith.mulf %241, %242 : vector<8x16xf32>
    %244 = arith.addf %239, %243 : vector<8x16xf32>
    %245 = vector.extract_strided_slice %237 {offsets = [0, 1], sizes = [8, 1], strides = [1, 1]} : vector<8x2xf32> to vector<8x1xf32>
    %246 = vector.broadcast %245 : vector<8x1xf32> to vector<8x16xf32>
    %247 = vector.broadcast %18 : vector<1x16xf32> to vector<8x16xf32>
    %248 = arith.mulf %246, %247 : vector<8x16xf32>
    %249 = arith.addf %244, %248 : vector<8x16xf32>
    %250 = vector.extract_strided_slice %238 {offsets = [0, 0], sizes = [8, 1], strides = [1, 1]} : vector<8x2xf32> to vector<8x1xf32>
    %251 = vector.broadcast %250 : vector<8x1xf32> to vector<8x16xf32>
    %252 = vector.broadcast %19 : vector<1x16xf32> to vector<8x16xf32>
    %253 = arith.mulf %251, %252 : vector<8x16xf32>
    %254 = arith.addf %249, %253 : vector<8x16xf32>
    %255 = vector.extract_strided_slice %238 {offsets = [0, 1], sizes = [8, 1], strides = [1, 1]} : vector<8x2xf32> to vector<8x1xf32>
    %256 = vector.broadcast %255 : vector<8x1xf32> to vector<8x16xf32>
    %257 = vector.broadcast %20 : vector<1x16xf32> to vector<8x16xf32>
    %258 = arith.mulf %256, %257 : vector<8x16xf32>
    %259 = arith.addf %254, %258 : vector<8x16xf32>
    %260 = vector.broadcast %12 : vector<1x16xf32> to vector<8x16xf32>
    %261 = arith.addf %259, %260 : vector<8x16xf32>
    %cst_65 = arith.constant 0.000000e+00 : f32
    %262 = vector.broadcast %cst_65 : f32 to vector<8x16xf32>
    %263 = arith.maximumf %261, %262 : vector<8x16xf32>
    %264 = arith.truncf %263 : vector<8x16xf32> to vector<8x16xbf16>
    %cst_66 = arith.constant dense<0.000000e+00> : vector<8x64xf32>
    %265 = tpu.matmul %264, %2, %cst_66 {dimension_numbers = #tpu.dot_dimension_numbers<[1], [0], [0], [1], [0, 0, 1, 1], [], []>} : vector<8x16xbf16>, vector<16x64xbf16>, vector<8x64xf32> -> vector<8x64xf32>
    %cst_67 = arith.constant dense<0.000000e+00> : vector<8x64xf32>
    %266 = tpu.matmul %234, %3, %cst_67 {dimension_numbers = #tpu.dot_dimension_numbers<[1], [0], [0], [1], [0, 0, 1, 1], [], []>} : vector<8x16xbf16>, vector<16x64xbf16>, vector<8x64xf32> -> vector<8x64xf32>
    %267 = arith.addf %265, %266 : vector<8x64xf32>
    %268 = vector.broadcast %9 : vector<1x64xf32> to vector<8x64xf32>
    %269 = arith.addf %267, %268 : vector<8x64xf32>
    %270 = vector.extract_strided_slice %269 {offsets = [0, 0], sizes = [8, 48], strides = [1, 1]} : vector<8x64xf32> to vector<8x48xf32>
    %271 = arith.negf %270 : vector<8x48xf32>
    %272 = math.exp %271 : vector<8x48xf32>
    %cst_68 = arith.constant 1.000000e+00 : f32
    %273 = vector.broadcast %cst_68 : f32 to vector<8x48xf32>
    %274 = arith.addf %273, %272 : vector<8x48xf32>
    %275 = arith.divf %273, %274 : vector<8x48xf32>
    %276 = vector.extract_strided_slice %275 {offsets = [0, 0], sizes = [8, 16], strides = [1, 1]} : vector<8x48xf32> to vector<8x16xf32>
    %277 = vector.extract_strided_slice %275 {offsets = [0, 16], sizes = [8, 16], strides = [1, 1]} : vector<8x48xf32> to vector<8x16xf32>
    %278 = vector.extract_strided_slice %275 {offsets = [0, 32], sizes = [8, 16], strides = [1, 1]} : vector<8x48xf32> to vector<8x16xf32>
    %279 = arith.mulf %277, %235 : vector<8x16xf32>
    %280 = vector.extract_strided_slice %269 {offsets = [0, 48], sizes = [8, 16], strides = [1, 1]} : vector<8x64xf32> to vector<8x16xf32>
    %281 = math.tanh %280 : vector<8x16xf32>
    %282 = arith.mulf %276, %281 : vector<8x16xf32>
    %283 = arith.addf %279, %282 : vector<8x16xf32>
    %284 = math.tanh %283 : vector<8x16xf32>
    %285 = arith.mulf %278, %284 : vector<8x16xf32>
    %286 = arith.truncf %285 : vector<8x16xf32> to vector<8x16xbf16>
    %287 = vector.extract_strided_slice %236 {offsets = [0, 0], sizes = [8, 1], strides = [1, 1]} : vector<8x2xf32> to vector<8x1xf32>
    %288 = vector.extract_strided_slice %236 {offsets = [0, 1], sizes = [8, 1], strides = [1, 1]} : vector<8x2xf32> to vector<8x1xf32>
    %289 = vector.broadcast %287 : vector<8x1xf32> to vector<8x128xf32>
    %290 = vector.broadcast %21 : vector<1x128xf32> to vector<8x128xf32>
    %291 = arith.mulf %289, %290 : vector<8x128xf32>
    %292 = vector.broadcast %288 : vector<8x1xf32> to vector<8x128xf32>
    %293 = vector.broadcast %22 : vector<1x128xf32> to vector<8x128xf32>
    %294 = arith.mulf %292, %293 : vector<8x128xf32>
    %295 = arith.addf %291, %294 : vector<8x128xf32>
    %296 = arith.mulf %295, %24 : vector<8x128xf32>
    %cst_69 = arith.constant dense<0.000000e+00> : vector<8x128xf32>
    %297 = tpu.matmul %25, %296, %cst_69 {dimension_numbers = #tpu.dot_dimension_numbers<[1], [0], [0], [1], [0, 0, 1, 1], [], []>} : vector<8x8xf32>, vector<8x128xf32>, vector<8x128xf32> -> vector<8x128xf32>
    %298 = arith.subf %295, %297 : vector<8x128xf32>
    %299 = vector.broadcast %23 : vector<1x128xf32> to vector<8x128xf32>
    %300 = arith.addf %298, %299 : vector<8x128xf32>
    %cst_70 = arith.constant 0.000000e+00 : f32
    %301 = vector.broadcast %cst_70 : f32 to vector<8x128xf32>
    %302 = arith.maximumf %300, %301 : vector<8x128xf32>
    %cst_71 = arith.constant dense<0.000000e+00> : vector<8x128xf32>
    %303 = tpu.matmul %286, %7, %cst_71 {dimension_numbers = #tpu.dot_dimension_numbers<[1], [0], [0], [1], [0, 0, 1, 1], [], []>} : vector<8x16xbf16>, vector<16x128xbf16>, vector<8x128xf32> -> vector<8x128xf32>
    %304 = arith.mulf %303, %24 : vector<8x128xf32>
    %cst_72 = arith.constant dense<0.000000e+00> : vector<8x128xf32>
    %305 = tpu.matmul %25, %304, %cst_72 {dimension_numbers = #tpu.dot_dimension_numbers<[1], [0], [0], [1], [0, 0, 1, 1], [], []>} : vector<8x8xf32>, vector<8x128xf32>, vector<8x128xf32> -> vector<8x128xf32>
    %306 = arith.addf %302, %305 : vector<8x128xf32>
    %cst_73 = arith.constant 0.000000e+00 : f32
    %307 = vector.broadcast %cst_73 : f32 to vector<8x128xf32>
    %308 = arith.maximumf %306, %307 : vector<8x128xf32>
    %c272 = arith.constant 272 : index
    %c0_74 = arith.constant 0 : index
    %309 = vector.load %arg0[%c272, %c0_74] : memref<336x128xbf16, #tpu.memory_space<vmem>>, vector<8x128xbf16>
    %310 = arith.truncf %308 : vector<8x128xf32> to vector<8x128xbf16>
    %311 = arith.mulf %310, %309 : vector<8x128xbf16>
    %c112_75 = arith.constant 112 : index
    %c0_76 = arith.constant 0 : index
    %312 = vector.load %arg0[%c112_75, %c0_76] : memref<336x128xbf16, #tpu.memory_space<vmem>>, vector<128x20xbf16>
    %cst_77 = arith.constant dense<0.000000e+00> : vector<8x20xf32>
    %313 = tpu.matmul %311, %312, %cst_77 {dimension_numbers = #tpu.dot_dimension_numbers<[1], [0], [0], [1], [0, 0, 1, 1], [], []>} : vector<8x128xbf16>, vector<128x20xbf16>, vector<8x20xf32> -> vector<8x20xf32>
    %314 = vector.extract_strided_slice %313 {offsets = [0, 0], sizes = [8, 16], strides = [1, 1]} : vector<8x20xf32> to vector<8x16xf32>
    %315 = vector.extract_strided_slice %313 {offsets = [0, 16], sizes = [8, 4], strides = [1, 1]} : vector<8x20xf32> to vector<8x4xf32>
    %cst_78 = arith.constant dense<0.000000e+00> : vector<8x4xf32>
    %316 = tpu.matmul %286, %6, %cst_78 {dimension_numbers = #tpu.dot_dimension_numbers<[1], [0], [0], [1], [0, 0, 1, 1], [], []>} : vector<8x16xbf16>, vector<16x4xbf16>, vector<8x4xf32> -> vector<8x4xf32>
    %317 = arith.addf %315, %316 : vector<8x4xf32>
    %318 = vector.broadcast %13 : vector<1x4xf32> to vector<8x4xf32>
    %319 = arith.addf %317, %318 : vector<8x4xf32>
    %320 = vector.extract_strided_slice %319 {offsets = [0, 0], sizes = [8, 2], strides = [1, 1]} : vector<8x4xf32> to vector<8x2xf32>
    %321 = vector.extract_strided_slice %319 {offsets = [0, 2], sizes = [8, 2], strides = [1, 1]} : vector<8x4xf32> to vector<8x2xf32>
    %cst_79 = arith.constant -9.000000e+00 : f32
    %cst_80 = arith.constant 4.000000e+00 : f32
    %322 = vector.broadcast %cst_79 : f32 to vector<8x2xf32>
    %323 = arith.maximumf %322, %321 : vector<8x2xf32>
    %324 = vector.broadcast %cst_80 : f32 to vector<8x2xf32>
    %325 = arith.minimumf %324, %323 : vector<8x2xf32>
    %326 = math.exp %325 : vector<8x2xf32>
    %c120 = arith.constant 120 : index
    %c0_81 = arith.constant 0 : index
    %327 = vector.load %arg1[%c120, %c0_81] : memref<184x128xf32, #tpu.memory_space<vmem>>, vector<8x2xf32>
    %328 = arith.mulf %326, %327 : vector<8x2xf32>
    %329 = arith.addf %320, %328 : vector<8x2xf32>
    %330 = arith.addf %236, %329 : vector<8x2xf32>
    %331 = vector.extract_strided_slice %320 {offsets = [0, 0], sizes = [8, 1], strides = [1, 1]} : vector<8x2xf32> to vector<8x1xf32>
    %332 = vector.broadcast %331 : vector<8x1xf32> to vector<8x16xf32>
    %333 = vector.broadcast %17 : vector<1x16xf32> to vector<8x16xf32>
    %334 = arith.mulf %332, %333 : vector<8x16xf32>
    %335 = arith.addf %314, %334 : vector<8x16xf32>
    %336 = vector.extract_strided_slice %320 {offsets = [0, 1], sizes = [8, 1], strides = [1, 1]} : vector<8x2xf32> to vector<8x1xf32>
    %337 = vector.broadcast %336 : vector<8x1xf32> to vector<8x16xf32>
    %338 = vector.broadcast %18 : vector<1x16xf32> to vector<8x16xf32>
    %339 = arith.mulf %337, %338 : vector<8x16xf32>
    %340 = arith.addf %335, %339 : vector<8x16xf32>
    %341 = vector.extract_strided_slice %325 {offsets = [0, 0], sizes = [8, 1], strides = [1, 1]} : vector<8x2xf32> to vector<8x1xf32>
    %342 = vector.broadcast %341 : vector<8x1xf32> to vector<8x16xf32>
    %343 = vector.broadcast %19 : vector<1x16xf32> to vector<8x16xf32>
    %344 = arith.mulf %342, %343 : vector<8x16xf32>
    %345 = arith.addf %340, %344 : vector<8x16xf32>
    %346 = vector.extract_strided_slice %325 {offsets = [0, 1], sizes = [8, 1], strides = [1, 1]} : vector<8x2xf32> to vector<8x1xf32>
    %347 = vector.broadcast %346 : vector<8x1xf32> to vector<8x16xf32>
    %348 = vector.broadcast %20 : vector<1x16xf32> to vector<8x16xf32>
    %349 = arith.mulf %347, %348 : vector<8x16xf32>
    %350 = arith.addf %345, %349 : vector<8x16xf32>
    %351 = vector.broadcast %12 : vector<1x16xf32> to vector<8x16xf32>
    %352 = arith.addf %350, %351 : vector<8x16xf32>
    %cst_82 = arith.constant 0.000000e+00 : f32
    %353 = vector.broadcast %cst_82 : f32 to vector<8x16xf32>
    %354 = arith.maximumf %352, %353 : vector<8x16xf32>
    %355 = arith.truncf %354 : vector<8x16xf32> to vector<8x16xbf16>
    %cst_83 = arith.constant dense<0.000000e+00> : vector<8x64xf32>
    %356 = tpu.matmul %355, %2, %cst_83 {dimension_numbers = #tpu.dot_dimension_numbers<[1], [0], [0], [1], [0, 0, 1, 1], [], []>} : vector<8x16xbf16>, vector<16x64xbf16>, vector<8x64xf32> -> vector<8x64xf32>
    %cst_84 = arith.constant dense<0.000000e+00> : vector<8x64xf32>
    %357 = tpu.matmul %286, %3, %cst_84 {dimension_numbers = #tpu.dot_dimension_numbers<[1], [0], [0], [1], [0, 0, 1, 1], [], []>} : vector<8x16xbf16>, vector<16x64xbf16>, vector<8x64xf32> -> vector<8x64xf32>
    %358 = arith.addf %356, %357 : vector<8x64xf32>
    %359 = vector.broadcast %9 : vector<1x64xf32> to vector<8x64xf32>
    %360 = arith.addf %358, %359 : vector<8x64xf32>
    %361 = vector.extract_strided_slice %360 {offsets = [0, 0], sizes = [8, 48], strides = [1, 1]} : vector<8x64xf32> to vector<8x48xf32>
    %362 = arith.negf %361 : vector<8x48xf32>
    %363 = math.exp %362 : vector<8x48xf32>
    %cst_85 = arith.constant 1.000000e+00 : f32
    %364 = vector.broadcast %cst_85 : f32 to vector<8x48xf32>
    %365 = arith.addf %364, %363 : vector<8x48xf32>
    %366 = arith.divf %364, %365 : vector<8x48xf32>
    %367 = vector.extract_strided_slice %366 {offsets = [0, 0], sizes = [8, 16], strides = [1, 1]} : vector<8x48xf32> to vector<8x16xf32>
    %368 = vector.extract_strided_slice %366 {offsets = [0, 16], sizes = [8, 16], strides = [1, 1]} : vector<8x48xf32> to vector<8x16xf32>
    %369 = vector.extract_strided_slice %366 {offsets = [0, 32], sizes = [8, 16], strides = [1, 1]} : vector<8x48xf32> to vector<8x16xf32>
    %370 = arith.mulf %368, %283 : vector<8x16xf32>
    %371 = vector.extract_strided_slice %360 {offsets = [0, 48], sizes = [8, 16], strides = [1, 1]} : vector<8x64xf32> to vector<8x16xf32>
    %372 = math.tanh %371 : vector<8x16xf32>
    %373 = arith.mulf %367, %372 : vector<8x16xf32>
    %374 = arith.addf %370, %373 : vector<8x16xf32>
    %375 = math.tanh %374 : vector<8x16xf32>
    %376 = arith.mulf %369, %375 : vector<8x16xf32>
    %377 = arith.truncf %376 : vector<8x16xf32> to vector<8x16xbf16>
    %378 = vector.extract_strided_slice %330 {offsets = [0, 0], sizes = [8, 1], strides = [1, 1]} : vector<8x2xf32> to vector<8x1xf32>
    %379 = vector.extract_strided_slice %330 {offsets = [0, 1], sizes = [8, 1], strides = [1, 1]} : vector<8x2xf32> to vector<8x1xf32>
    %380 = vector.broadcast %378 : vector<8x1xf32> to vector<8x128xf32>
    %381 = vector.broadcast %21 : vector<1x128xf32> to vector<8x128xf32>
    %382 = arith.mulf %380, %381 : vector<8x128xf32>
    %383 = vector.broadcast %379 : vector<8x1xf32> to vector<8x128xf32>
    %384 = vector.broadcast %22 : vector<1x128xf32> to vector<8x128xf32>
    %385 = arith.mulf %383, %384 : vector<8x128xf32>
    %386 = arith.addf %382, %385 : vector<8x128xf32>
    %387 = arith.mulf %386, %24 : vector<8x128xf32>
    %cst_86 = arith.constant dense<0.000000e+00> : vector<8x128xf32>
    %388 = tpu.matmul %25, %387, %cst_86 {dimension_numbers = #tpu.dot_dimension_numbers<[1], [0], [0], [1], [0, 0, 1, 1], [], []>} : vector<8x8xf32>, vector<8x128xf32>, vector<8x128xf32> -> vector<8x128xf32>
    %389 = arith.subf %386, %388 : vector<8x128xf32>
    %390 = vector.broadcast %23 : vector<1x128xf32> to vector<8x128xf32>
    %391 = arith.addf %389, %390 : vector<8x128xf32>
    %cst_87 = arith.constant 0.000000e+00 : f32
    %392 = vector.broadcast %cst_87 : f32 to vector<8x128xf32>
    %393 = arith.maximumf %391, %392 : vector<8x128xf32>
    %cst_88 = arith.constant dense<0.000000e+00> : vector<8x128xf32>
    %394 = tpu.matmul %377, %7, %cst_88 {dimension_numbers = #tpu.dot_dimension_numbers<[1], [0], [0], [1], [0, 0, 1, 1], [], []>} : vector<8x16xbf16>, vector<16x128xbf16>, vector<8x128xf32> -> vector<8x128xf32>
    %395 = arith.mulf %394, %24 : vector<8x128xf32>
    %cst_89 = arith.constant dense<0.000000e+00> : vector<8x128xf32>
    %396 = tpu.matmul %25, %395, %cst_89 {dimension_numbers = #tpu.dot_dimension_numbers<[1], [0], [0], [1], [0, 0, 1, 1], [], []>} : vector<8x8xf32>, vector<8x128xf32>, vector<8x128xf32> -> vector<8x128xf32>
    %397 = arith.addf %393, %396 : vector<8x128xf32>
    %cst_90 = arith.constant 0.000000e+00 : f32
    %398 = vector.broadcast %cst_90 : f32 to vector<8x128xf32>
    %399 = arith.maximumf %397, %398 : vector<8x128xf32>
    %c280 = arith.constant 280 : index
    %c0_91 = arith.constant 0 : index
    %400 = vector.load %arg0[%c280, %c0_91] : memref<336x128xbf16, #tpu.memory_space<vmem>>, vector<8x128xbf16>
    %401 = arith.truncf %399 : vector<8x128xf32> to vector<8x128xbf16>
    %402 = arith.mulf %401, %400 : vector<8x128xbf16>
    %c112_92 = arith.constant 112 : index
    %c0_93 = arith.constant 0 : index
    %403 = vector.load %arg0[%c112_92, %c0_93] : memref<336x128xbf16, #tpu.memory_space<vmem>>, vector<128x20xbf16>
    %cst_94 = arith.constant dense<0.000000e+00> : vector<8x20xf32>
    %404 = tpu.matmul %402, %403, %cst_94 {dimension_numbers = #tpu.dot_dimension_numbers<[1], [0], [0], [1], [0, 0, 1, 1], [], []>} : vector<8x128xbf16>, vector<128x20xbf16>, vector<8x20xf32> -> vector<8x20xf32>
    %405 = vector.extract_strided_slice %404 {offsets = [0, 0], sizes = [8, 16], strides = [1, 1]} : vector<8x20xf32> to vector<8x16xf32>
    %406 = vector.extract_strided_slice %404 {offsets = [0, 16], sizes = [8, 4], strides = [1, 1]} : vector<8x20xf32> to vector<8x4xf32>
    %cst_95 = arith.constant dense<0.000000e+00> : vector<8x4xf32>
    %407 = tpu.matmul %377, %6, %cst_95 {dimension_numbers = #tpu.dot_dimension_numbers<[1], [0], [0], [1], [0, 0, 1, 1], [], []>} : vector<8x16xbf16>, vector<16x4xbf16>, vector<8x4xf32> -> vector<8x4xf32>
    %408 = arith.addf %406, %407 : vector<8x4xf32>
    %409 = vector.broadcast %13 : vector<1x4xf32> to vector<8x4xf32>
    %410 = arith.addf %408, %409 : vector<8x4xf32>
    %411 = vector.extract_strided_slice %410 {offsets = [0, 0], sizes = [8, 2], strides = [1, 1]} : vector<8x4xf32> to vector<8x2xf32>
    %412 = vector.extract_strided_slice %410 {offsets = [0, 2], sizes = [8, 2], strides = [1, 1]} : vector<8x4xf32> to vector<8x2xf32>
    %cst_96 = arith.constant -9.000000e+00 : f32
    %cst_97 = arith.constant 4.000000e+00 : f32
    %413 = vector.broadcast %cst_96 : f32 to vector<8x2xf32>
    %414 = arith.maximumf %413, %412 : vector<8x2xf32>
    %415 = vector.broadcast %cst_97 : f32 to vector<8x2xf32>
    %416 = arith.minimumf %415, %414 : vector<8x2xf32>
    %417 = math.exp %416 : vector<8x2xf32>
    %c128 = arith.constant 128 : index
    %c0_98 = arith.constant 0 : index
    %418 = vector.load %arg1[%c128, %c0_98] : memref<184x128xf32, #tpu.memory_space<vmem>>, vector<8x2xf32>
    %419 = arith.mulf %417, %418 : vector<8x2xf32>
    %420 = arith.addf %411, %419 : vector<8x2xf32>
    %421 = arith.addf %330, %420 : vector<8x2xf32>
    %422 = vector.extract_strided_slice %411 {offsets = [0, 0], sizes = [8, 1], strides = [1, 1]} : vector<8x2xf32> to vector<8x1xf32>
    %423 = vector.broadcast %422 : vector<8x1xf32> to vector<8x16xf32>
    %424 = vector.broadcast %17 : vector<1x16xf32> to vector<8x16xf32>
    %425 = arith.mulf %423, %424 : vector<8x16xf32>
    %426 = arith.addf %405, %425 : vector<8x16xf32>
    %427 = vector.extract_strided_slice %411 {offsets = [0, 1], sizes = [8, 1], strides = [1, 1]} : vector<8x2xf32> to vector<8x1xf32>
    %428 = vector.broadcast %427 : vector<8x1xf32> to vector<8x16xf32>
    %429 = vector.broadcast %18 : vector<1x16xf32> to vector<8x16xf32>
    %430 = arith.mulf %428, %429 : vector<8x16xf32>
    %431 = arith.addf %426, %430 : vector<8x16xf32>
    %432 = vector.extract_strided_slice %416 {offsets = [0, 0], sizes = [8, 1], strides = [1, 1]} : vector<8x2xf32> to vector<8x1xf32>
    %433 = vector.broadcast %432 : vector<8x1xf32> to vector<8x16xf32>
    %434 = vector.broadcast %19 : vector<1x16xf32> to vector<8x16xf32>
    %435 = arith.mulf %433, %434 : vector<8x16xf32>
    %436 = arith.addf %431, %435 : vector<8x16xf32>
    %437 = vector.extract_strided_slice %416 {offsets = [0, 1], sizes = [8, 1], strides = [1, 1]} : vector<8x2xf32> to vector<8x1xf32>
    %438 = vector.broadcast %437 : vector<8x1xf32> to vector<8x16xf32>
    %439 = vector.broadcast %20 : vector<1x16xf32> to vector<8x16xf32>
    %440 = arith.mulf %438, %439 : vector<8x16xf32>
    %441 = arith.addf %436, %440 : vector<8x16xf32>
    %442 = vector.broadcast %12 : vector<1x16xf32> to vector<8x16xf32>
    %443 = arith.addf %441, %442 : vector<8x16xf32>
    %cst_99 = arith.constant 0.000000e+00 : f32
    %444 = vector.broadcast %cst_99 : f32 to vector<8x16xf32>
    %445 = arith.maximumf %443, %444 : vector<8x16xf32>
    %446 = arith.truncf %445 : vector<8x16xf32> to vector<8x16xbf16>
    %cst_100 = arith.constant dense<0.000000e+00> : vector<8x64xf32>
    %447 = tpu.matmul %446, %2, %cst_100 {dimension_numbers = #tpu.dot_dimension_numbers<[1], [0], [0], [1], [0, 0, 1, 1], [], []>} : vector<8x16xbf16>, vector<16x64xbf16>, vector<8x64xf32> -> vector<8x64xf32>
    %cst_101 = arith.constant dense<0.000000e+00> : vector<8x64xf32>
    %448 = tpu.matmul %377, %3, %cst_101 {dimension_numbers = #tpu.dot_dimension_numbers<[1], [0], [0], [1], [0, 0, 1, 1], [], []>} : vector<8x16xbf16>, vector<16x64xbf16>, vector<8x64xf32> -> vector<8x64xf32>
    %449 = arith.addf %447, %448 : vector<8x64xf32>
    %450 = vector.broadcast %9 : vector<1x64xf32> to vector<8x64xf32>
    %451 = arith.addf %449, %450 : vector<8x64xf32>
    %452 = vector.extract_strided_slice %451 {offsets = [0, 0], sizes = [8, 48], strides = [1, 1]} : vector<8x64xf32> to vector<8x48xf32>
    %453 = arith.negf %452 : vector<8x48xf32>
    %454 = math.exp %453 : vector<8x48xf32>
    %cst_102 = arith.constant 1.000000e+00 : f32
    %455 = vector.broadcast %cst_102 : f32 to vector<8x48xf32>
    %456 = arith.addf %455, %454 : vector<8x48xf32>
    %457 = arith.divf %455, %456 : vector<8x48xf32>
    %458 = vector.extract_strided_slice %457 {offsets = [0, 0], sizes = [8, 16], strides = [1, 1]} : vector<8x48xf32> to vector<8x16xf32>
    %459 = vector.extract_strided_slice %457 {offsets = [0, 16], sizes = [8, 16], strides = [1, 1]} : vector<8x48xf32> to vector<8x16xf32>
    %460 = vector.extract_strided_slice %457 {offsets = [0, 32], sizes = [8, 16], strides = [1, 1]} : vector<8x48xf32> to vector<8x16xf32>
    %461 = arith.mulf %459, %374 : vector<8x16xf32>
    %462 = vector.extract_strided_slice %451 {offsets = [0, 48], sizes = [8, 16], strides = [1, 1]} : vector<8x64xf32> to vector<8x16xf32>
    %463 = math.tanh %462 : vector<8x16xf32>
    %464 = arith.mulf %458, %463 : vector<8x16xf32>
    %465 = arith.addf %461, %464 : vector<8x16xf32>
    %466 = math.tanh %465 : vector<8x16xf32>
    %467 = arith.mulf %460, %466 : vector<8x16xf32>
    %468 = arith.truncf %467 : vector<8x16xf32> to vector<8x16xbf16>
    %469 = vector.extract_strided_slice %421 {offsets = [0, 0], sizes = [8, 1], strides = [1, 1]} : vector<8x2xf32> to vector<8x1xf32>
    %470 = vector.extract_strided_slice %421 {offsets = [0, 1], sizes = [8, 1], strides = [1, 1]} : vector<8x2xf32> to vector<8x1xf32>
    %471 = vector.broadcast %469 : vector<8x1xf32> to vector<8x128xf32>
    %472 = vector.broadcast %21 : vector<1x128xf32> to vector<8x128xf32>
    %473 = arith.mulf %471, %472 : vector<8x128xf32>
    %474 = vector.broadcast %470 : vector<8x1xf32> to vector<8x128xf32>
    %475 = vector.broadcast %22 : vector<1x128xf32> to vector<8x128xf32>
    %476 = arith.mulf %474, %475 : vector<8x128xf32>
    %477 = arith.addf %473, %476 : vector<8x128xf32>
    %478 = arith.mulf %477, %24 : vector<8x128xf32>
    %cst_103 = arith.constant dense<0.000000e+00> : vector<8x128xf32>
    %479 = tpu.matmul %25, %478, %cst_103 {dimension_numbers = #tpu.dot_dimension_numbers<[1], [0], [0], [1], [0, 0, 1, 1], [], []>} : vector<8x8xf32>, vector<8x128xf32>, vector<8x128xf32> -> vector<8x128xf32>
    %480 = arith.subf %477, %479 : vector<8x128xf32>
    %481 = vector.broadcast %23 : vector<1x128xf32> to vector<8x128xf32>
    %482 = arith.addf %480, %481 : vector<8x128xf32>
    %cst_104 = arith.constant 0.000000e+00 : f32
    %483 = vector.broadcast %cst_104 : f32 to vector<8x128xf32>
    %484 = arith.maximumf %482, %483 : vector<8x128xf32>
    %cst_105 = arith.constant dense<0.000000e+00> : vector<8x128xf32>
    %485 = tpu.matmul %468, %7, %cst_105 {dimension_numbers = #tpu.dot_dimension_numbers<[1], [0], [0], [1], [0, 0, 1, 1], [], []>} : vector<8x16xbf16>, vector<16x128xbf16>, vector<8x128xf32> -> vector<8x128xf32>
    %486 = arith.mulf %485, %24 : vector<8x128xf32>
    %cst_106 = arith.constant dense<0.000000e+00> : vector<8x128xf32>
    %487 = tpu.matmul %25, %486, %cst_106 {dimension_numbers = #tpu.dot_dimension_numbers<[1], [0], [0], [1], [0, 0, 1, 1], [], []>} : vector<8x8xf32>, vector<8x128xf32>, vector<8x128xf32> -> vector<8x128xf32>
    %488 = arith.addf %484, %487 : vector<8x128xf32>
    %cst_107 = arith.constant 0.000000e+00 : f32
    %489 = vector.broadcast %cst_107 : f32 to vector<8x128xf32>
    %490 = arith.maximumf %488, %489 : vector<8x128xf32>
    %c288 = arith.constant 288 : index
    %c0_108 = arith.constant 0 : index
    %491 = vector.load %arg0[%c288, %c0_108] : memref<336x128xbf16, #tpu.memory_space<vmem>>, vector<8x128xbf16>
    %492 = arith.truncf %490 : vector<8x128xf32> to vector<8x128xbf16>
    %493 = arith.mulf %492, %491 : vector<8x128xbf16>
    %c112_109 = arith.constant 112 : index
    %c0_110 = arith.constant 0 : index
    %494 = vector.load %arg0[%c112_109, %c0_110] : memref<336x128xbf16, #tpu.memory_space<vmem>>, vector<128x20xbf16>
    %cst_111 = arith.constant dense<0.000000e+00> : vector<8x20xf32>
    %495 = tpu.matmul %493, %494, %cst_111 {dimension_numbers = #tpu.dot_dimension_numbers<[1], [0], [0], [1], [0, 0, 1, 1], [], []>} : vector<8x128xbf16>, vector<128x20xbf16>, vector<8x20xf32> -> vector<8x20xf32>
    %496 = vector.extract_strided_slice %495 {offsets = [0, 0], sizes = [8, 16], strides = [1, 1]} : vector<8x20xf32> to vector<8x16xf32>
    %497 = vector.extract_strided_slice %495 {offsets = [0, 16], sizes = [8, 4], strides = [1, 1]} : vector<8x20xf32> to vector<8x4xf32>
    %cst_112 = arith.constant dense<0.000000e+00> : vector<8x4xf32>
    %498 = tpu.matmul %468, %6, %cst_112 {dimension_numbers = #tpu.dot_dimension_numbers<[1], [0], [0], [1], [0, 0, 1, 1], [], []>} : vector<8x16xbf16>, vector<16x4xbf16>, vector<8x4xf32> -> vector<8x4xf32>
    %499 = arith.addf %497, %498 : vector<8x4xf32>
    %500 = vector.broadcast %13 : vector<1x4xf32> to vector<8x4xf32>
    %501 = arith.addf %499, %500 : vector<8x4xf32>
    %502 = vector.extract_strided_slice %501 {offsets = [0, 0], sizes = [8, 2], strides = [1, 1]} : vector<8x4xf32> to vector<8x2xf32>
    %503 = vector.extract_strided_slice %501 {offsets = [0, 2], sizes = [8, 2], strides = [1, 1]} : vector<8x4xf32> to vector<8x2xf32>
    %cst_113 = arith.constant -9.000000e+00 : f32
    %cst_114 = arith.constant 4.000000e+00 : f32
    %504 = vector.broadcast %cst_113 : f32 to vector<8x2xf32>
    %505 = arith.maximumf %504, %503 : vector<8x2xf32>
    %506 = vector.broadcast %cst_114 : f32 to vector<8x2xf32>
    %507 = arith.minimumf %506, %505 : vector<8x2xf32>
    %508 = math.exp %507 : vector<8x2xf32>
    %c136 = arith.constant 136 : index
    %c0_115 = arith.constant 0 : index
    %509 = vector.load %arg1[%c136, %c0_115] : memref<184x128xf32, #tpu.memory_space<vmem>>, vector<8x2xf32>
    %510 = arith.mulf %508, %509 : vector<8x2xf32>
    %511 = arith.addf %502, %510 : vector<8x2xf32>
    %512 = arith.addf %421, %511 : vector<8x2xf32>
    %513 = vector.extract_strided_slice %502 {offsets = [0, 0], sizes = [8, 1], strides = [1, 1]} : vector<8x2xf32> to vector<8x1xf32>
    %514 = vector.broadcast %513 : vector<8x1xf32> to vector<8x16xf32>
    %515 = vector.broadcast %17 : vector<1x16xf32> to vector<8x16xf32>
    %516 = arith.mulf %514, %515 : vector<8x16xf32>
    %517 = arith.addf %496, %516 : vector<8x16xf32>
    %518 = vector.extract_strided_slice %502 {offsets = [0, 1], sizes = [8, 1], strides = [1, 1]} : vector<8x2xf32> to vector<8x1xf32>
    %519 = vector.broadcast %518 : vector<8x1xf32> to vector<8x16xf32>
    %520 = vector.broadcast %18 : vector<1x16xf32> to vector<8x16xf32>
    %521 = arith.mulf %519, %520 : vector<8x16xf32>
    %522 = arith.addf %517, %521 : vector<8x16xf32>
    %523 = vector.extract_strided_slice %507 {offsets = [0, 0], sizes = [8, 1], strides = [1, 1]} : vector<8x2xf32> to vector<8x1xf32>
    %524 = vector.broadcast %523 : vector<8x1xf32> to vector<8x16xf32>
    %525 = vector.broadcast %19 : vector<1x16xf32> to vector<8x16xf32>
    %526 = arith.mulf %524, %525 : vector<8x16xf32>
    %527 = arith.addf %522, %526 : vector<8x16xf32>
    %528 = vector.extract_strided_slice %507 {offsets = [0, 1], sizes = [8, 1], strides = [1, 1]} : vector<8x2xf32> to vector<8x1xf32>
    %529 = vector.broadcast %528 : vector<8x1xf32> to vector<8x16xf32>
    %530 = vector.broadcast %20 : vector<1x16xf32> to vector<8x16xf32>
    %531 = arith.mulf %529, %530 : vector<8x16xf32>
    %532 = arith.addf %527, %531 : vector<8x16xf32>
    %533 = vector.broadcast %12 : vector<1x16xf32> to vector<8x16xf32>
    %534 = arith.addf %532, %533 : vector<8x16xf32>
    %cst_116 = arith.constant 0.000000e+00 : f32
    %535 = vector.broadcast %cst_116 : f32 to vector<8x16xf32>
    %536 = arith.maximumf %534, %535 : vector<8x16xf32>
    %537 = arith.truncf %536 : vector<8x16xf32> to vector<8x16xbf16>
    %cst_117 = arith.constant dense<0.000000e+00> : vector<8x64xf32>
    %538 = tpu.matmul %537, %2, %cst_117 {dimension_numbers = #tpu.dot_dimension_numbers<[1], [0], [0], [1], [0, 0, 1, 1], [], []>} : vector<8x16xbf16>, vector<16x64xbf16>, vector<8x64xf32> -> vector<8x64xf32>
    %cst_118 = arith.constant dense<0.000000e+00> : vector<8x64xf32>
    %539 = tpu.matmul %468, %3, %cst_118 {dimension_numbers = #tpu.dot_dimension_numbers<[1], [0], [0], [1], [0, 0, 1, 1], [], []>} : vector<8x16xbf16>, vector<16x64xbf16>, vector<8x64xf32> -> vector<8x64xf32>
    %540 = arith.addf %538, %539 : vector<8x64xf32>
    %541 = vector.broadcast %9 : vector<1x64xf32> to vector<8x64xf32>
    %542 = arith.addf %540, %541 : vector<8x64xf32>
    %543 = vector.extract_strided_slice %542 {offsets = [0, 0], sizes = [8, 48], strides = [1, 1]} : vector<8x64xf32> to vector<8x48xf32>
    %544 = arith.negf %543 : vector<8x48xf32>
    %545 = math.exp %544 : vector<8x48xf32>
    %cst_119 = arith.constant 1.000000e+00 : f32
    %546 = vector.broadcast %cst_119 : f32 to vector<8x48xf32>
    %547 = arith.addf %546, %545 : vector<8x48xf32>
    %548 = arith.divf %546, %547 : vector<8x48xf32>
    %549 = vector.extract_strided_slice %548 {offsets = [0, 0], sizes = [8, 16], strides = [1, 1]} : vector<8x48xf32> to vector<8x16xf32>
    %550 = vector.extract_strided_slice %548 {offsets = [0, 16], sizes = [8, 16], strides = [1, 1]} : vector<8x48xf32> to vector<8x16xf32>
    %551 = vector.extract_strided_slice %548 {offsets = [0, 32], sizes = [8, 16], strides = [1, 1]} : vector<8x48xf32> to vector<8x16xf32>
    %552 = arith.mulf %550, %465 : vector<8x16xf32>
    %553 = vector.extract_strided_slice %542 {offsets = [0, 48], sizes = [8, 16], strides = [1, 1]} : vector<8x64xf32> to vector<8x16xf32>
    %554 = math.tanh %553 : vector<8x16xf32>
    %555 = arith.mulf %549, %554 : vector<8x16xf32>
    %556 = arith.addf %552, %555 : vector<8x16xf32>
    %557 = math.tanh %556 : vector<8x16xf32>
    %558 = arith.mulf %551, %557 : vector<8x16xf32>
    %559 = arith.truncf %558 : vector<8x16xf32> to vector<8x16xbf16>
    %560 = vector.extract_strided_slice %512 {offsets = [0, 0], sizes = [8, 1], strides = [1, 1]} : vector<8x2xf32> to vector<8x1xf32>
    %561 = vector.extract_strided_slice %512 {offsets = [0, 1], sizes = [8, 1], strides = [1, 1]} : vector<8x2xf32> to vector<8x1xf32>
    %562 = vector.broadcast %560 : vector<8x1xf32> to vector<8x128xf32>
    %563 = vector.broadcast %21 : vector<1x128xf32> to vector<8x128xf32>
    %564 = arith.mulf %562, %563 : vector<8x128xf32>
    %565 = vector.broadcast %561 : vector<8x1xf32> to vector<8x128xf32>
    %566 = vector.broadcast %22 : vector<1x128xf32> to vector<8x128xf32>
    %567 = arith.mulf %565, %566 : vector<8x128xf32>
    %568 = arith.addf %564, %567 : vector<8x128xf32>
    %569 = arith.mulf %568, %24 : vector<8x128xf32>
    %cst_120 = arith.constant dense<0.000000e+00> : vector<8x128xf32>
    %570 = tpu.matmul %25, %569, %cst_120 {dimension_numbers = #tpu.dot_dimension_numbers<[1], [0], [0], [1], [0, 0, 1, 1], [], []>} : vector<8x8xf32>, vector<8x128xf32>, vector<8x128xf32> -> vector<8x128xf32>
    %571 = arith.subf %568, %570 : vector<8x128xf32>
    %572 = vector.broadcast %23 : vector<1x128xf32> to vector<8x128xf32>
    %573 = arith.addf %571, %572 : vector<8x128xf32>
    %cst_121 = arith.constant 0.000000e+00 : f32
    %574 = vector.broadcast %cst_121 : f32 to vector<8x128xf32>
    %575 = arith.maximumf %573, %574 : vector<8x128xf32>
    %cst_122 = arith.constant dense<0.000000e+00> : vector<8x128xf32>
    %576 = tpu.matmul %559, %7, %cst_122 {dimension_numbers = #tpu.dot_dimension_numbers<[1], [0], [0], [1], [0, 0, 1, 1], [], []>} : vector<8x16xbf16>, vector<16x128xbf16>, vector<8x128xf32> -> vector<8x128xf32>
    %577 = arith.mulf %576, %24 : vector<8x128xf32>
    %cst_123 = arith.constant dense<0.000000e+00> : vector<8x128xf32>
    %578 = tpu.matmul %25, %577, %cst_123 {dimension_numbers = #tpu.dot_dimension_numbers<[1], [0], [0], [1], [0, 0, 1, 1], [], []>} : vector<8x8xf32>, vector<8x128xf32>, vector<8x128xf32> -> vector<8x128xf32>
    %579 = arith.addf %575, %578 : vector<8x128xf32>
    %cst_124 = arith.constant 0.000000e+00 : f32
    %580 = vector.broadcast %cst_124 : f32 to vector<8x128xf32>
    %581 = arith.maximumf %579, %580 : vector<8x128xf32>
    %c296 = arith.constant 296 : index
    %c0_125 = arith.constant 0 : index
    %582 = vector.load %arg0[%c296, %c0_125] : memref<336x128xbf16, #tpu.memory_space<vmem>>, vector<8x128xbf16>
    %583 = arith.truncf %581 : vector<8x128xf32> to vector<8x128xbf16>
    %584 = arith.mulf %583, %582 : vector<8x128xbf16>
    %c112_126 = arith.constant 112 : index
    %c0_127 = arith.constant 0 : index
    %585 = vector.load %arg0[%c112_126, %c0_127] : memref<336x128xbf16, #tpu.memory_space<vmem>>, vector<128x20xbf16>
    %cst_128 = arith.constant dense<0.000000e+00> : vector<8x20xf32>
    %586 = tpu.matmul %584, %585, %cst_128 {dimension_numbers = #tpu.dot_dimension_numbers<[1], [0], [0], [1], [0, 0, 1, 1], [], []>} : vector<8x128xbf16>, vector<128x20xbf16>, vector<8x20xf32> -> vector<8x20xf32>
    %587 = vector.extract_strided_slice %586 {offsets = [0, 0], sizes = [8, 16], strides = [1, 1]} : vector<8x20xf32> to vector<8x16xf32>
    %588 = vector.extract_strided_slice %586 {offsets = [0, 16], sizes = [8, 4], strides = [1, 1]} : vector<8x20xf32> to vector<8x4xf32>
    %cst_129 = arith.constant dense<0.000000e+00> : vector<8x4xf32>
    %589 = tpu.matmul %559, %6, %cst_129 {dimension_numbers = #tpu.dot_dimension_numbers<[1], [0], [0], [1], [0, 0, 1, 1], [], []>} : vector<8x16xbf16>, vector<16x4xbf16>, vector<8x4xf32> -> vector<8x4xf32>
    %590 = arith.addf %588, %589 : vector<8x4xf32>
    %591 = vector.broadcast %13 : vector<1x4xf32> to vector<8x4xf32>
    %592 = arith.addf %590, %591 : vector<8x4xf32>
    %593 = vector.extract_strided_slice %592 {offsets = [0, 0], sizes = [8, 2], strides = [1, 1]} : vector<8x4xf32> to vector<8x2xf32>
    %594 = vector.extract_strided_slice %592 {offsets = [0, 2], sizes = [8, 2], strides = [1, 1]} : vector<8x4xf32> to vector<8x2xf32>
    %cst_130 = arith.constant -9.000000e+00 : f32
    %cst_131 = arith.constant 4.000000e+00 : f32
    %595 = vector.broadcast %cst_130 : f32 to vector<8x2xf32>
    %596 = arith.maximumf %595, %594 : vector<8x2xf32>
    %597 = vector.broadcast %cst_131 : f32 to vector<8x2xf32>
    %598 = arith.minimumf %597, %596 : vector<8x2xf32>
    %599 = math.exp %598 : vector<8x2xf32>
    %c144 = arith.constant 144 : index
    %c0_132 = arith.constant 0 : index
    %600 = vector.load %arg1[%c144, %c0_132] : memref<184x128xf32, #tpu.memory_space<vmem>>, vector<8x2xf32>
    %601 = arith.mulf %599, %600 : vector<8x2xf32>
    %602 = arith.addf %593, %601 : vector<8x2xf32>
    %603 = arith.addf %512, %602 : vector<8x2xf32>
    %604 = vector.extract_strided_slice %593 {offsets = [0, 0], sizes = [8, 1], strides = [1, 1]} : vector<8x2xf32> to vector<8x1xf32>
    %605 = vector.broadcast %604 : vector<8x1xf32> to vector<8x16xf32>
    %606 = vector.broadcast %17 : vector<1x16xf32> to vector<8x16xf32>
    %607 = arith.mulf %605, %606 : vector<8x16xf32>
    %608 = arith.addf %587, %607 : vector<8x16xf32>
    %609 = vector.extract_strided_slice %593 {offsets = [0, 1], sizes = [8, 1], strides = [1, 1]} : vector<8x2xf32> to vector<8x1xf32>
    %610 = vector.broadcast %609 : vector<8x1xf32> to vector<8x16xf32>
    %611 = vector.broadcast %18 : vector<1x16xf32> to vector<8x16xf32>
    %612 = arith.mulf %610, %611 : vector<8x16xf32>
    %613 = arith.addf %608, %612 : vector<8x16xf32>
    %614 = vector.extract_strided_slice %598 {offsets = [0, 0], sizes = [8, 1], strides = [1, 1]} : vector<8x2xf32> to vector<8x1xf32>
    %615 = vector.broadcast %614 : vector<8x1xf32> to vector<8x16xf32>
    %616 = vector.broadcast %19 : vector<1x16xf32> to vector<8x16xf32>
    %617 = arith.mulf %615, %616 : vector<8x16xf32>
    %618 = arith.addf %613, %617 : vector<8x16xf32>
    %619 = vector.extract_strided_slice %598 {offsets = [0, 1], sizes = [8, 1], strides = [1, 1]} : vector<8x2xf32> to vector<8x1xf32>
    %620 = vector.broadcast %619 : vector<8x1xf32> to vector<8x16xf32>
    %621 = vector.broadcast %20 : vector<1x16xf32> to vector<8x16xf32>
    %622 = arith.mulf %620, %621 : vector<8x16xf32>
    %623 = arith.addf %618, %622 : vector<8x16xf32>
    %624 = vector.broadcast %12 : vector<1x16xf32> to vector<8x16xf32>
    %625 = arith.addf %623, %624 : vector<8x16xf32>
    %cst_133 = arith.constant 0.000000e+00 : f32
    %626 = vector.broadcast %cst_133 : f32 to vector<8x16xf32>
    %627 = arith.maximumf %625, %626 : vector<8x16xf32>
    %628 = arith.truncf %627 : vector<8x16xf32> to vector<8x16xbf16>
    %cst_134 = arith.constant dense<0.000000e+00> : vector<8x64xf32>
    %629 = tpu.matmul %628, %2, %cst_134 {dimension_numbers = #tpu.dot_dimension_numbers<[1], [0], [0], [1], [0, 0, 1, 1], [], []>} : vector<8x16xbf16>, vector<16x64xbf16>, vector<8x64xf32> -> vector<8x64xf32>
    %cst_135 = arith.constant dense<0.000000e+00> : vector<8x64xf32>
    %630 = tpu.matmul %559, %3, %cst_135 {dimension_numbers = #tpu.dot_dimension_numbers<[1], [0], [0], [1], [0, 0, 1, 1], [], []>} : vector<8x16xbf16>, vector<16x64xbf16>, vector<8x64xf32> -> vector<8x64xf32>
    %631 = arith.addf %629, %630 : vector<8x64xf32>
    %632 = vector.broadcast %9 : vector<1x64xf32> to vector<8x64xf32>
    %633 = arith.addf %631, %632 : vector<8x64xf32>
    %634 = vector.extract_strided_slice %633 {offsets = [0, 0], sizes = [8, 48], strides = [1, 1]} : vector<8x64xf32> to vector<8x48xf32>
    %635 = arith.negf %634 : vector<8x48xf32>
    %636 = math.exp %635 : vector<8x48xf32>
    %cst_136 = arith.constant 1.000000e+00 : f32
    %637 = vector.broadcast %cst_136 : f32 to vector<8x48xf32>
    %638 = arith.addf %637, %636 : vector<8x48xf32>
    %639 = arith.divf %637, %638 : vector<8x48xf32>
    %640 = vector.extract_strided_slice %639 {offsets = [0, 0], sizes = [8, 16], strides = [1, 1]} : vector<8x48xf32> to vector<8x16xf32>
    %641 = vector.extract_strided_slice %639 {offsets = [0, 16], sizes = [8, 16], strides = [1, 1]} : vector<8x48xf32> to vector<8x16xf32>
    %642 = vector.extract_strided_slice %639 {offsets = [0, 32], sizes = [8, 16], strides = [1, 1]} : vector<8x48xf32> to vector<8x16xf32>
    %643 = arith.mulf %641, %556 : vector<8x16xf32>
    %644 = vector.extract_strided_slice %633 {offsets = [0, 48], sizes = [8, 16], strides = [1, 1]} : vector<8x64xf32> to vector<8x16xf32>
    %645 = math.tanh %644 : vector<8x16xf32>
    %646 = arith.mulf %640, %645 : vector<8x16xf32>
    %647 = arith.addf %643, %646 : vector<8x16xf32>
    %648 = math.tanh %647 : vector<8x16xf32>
    %649 = arith.mulf %642, %648 : vector<8x16xf32>
    %650 = arith.truncf %649 : vector<8x16xf32> to vector<8x16xbf16>
    %651 = vector.extract_strided_slice %603 {offsets = [0, 0], sizes = [8, 1], strides = [1, 1]} : vector<8x2xf32> to vector<8x1xf32>
    %652 = vector.extract_strided_slice %603 {offsets = [0, 1], sizes = [8, 1], strides = [1, 1]} : vector<8x2xf32> to vector<8x1xf32>
    %653 = vector.broadcast %651 : vector<8x1xf32> to vector<8x128xf32>
    %654 = vector.broadcast %21 : vector<1x128xf32> to vector<8x128xf32>
    %655 = arith.mulf %653, %654 : vector<8x128xf32>
    %656 = vector.broadcast %652 : vector<8x1xf32> to vector<8x128xf32>
    %657 = vector.broadcast %22 : vector<1x128xf32> to vector<8x128xf32>
    %658 = arith.mulf %656, %657 : vector<8x128xf32>
    %659 = arith.addf %655, %658 : vector<8x128xf32>
    %660 = arith.mulf %659, %24 : vector<8x128xf32>
    %cst_137 = arith.constant dense<0.000000e+00> : vector<8x128xf32>
    %661 = tpu.matmul %25, %660, %cst_137 {dimension_numbers = #tpu.dot_dimension_numbers<[1], [0], [0], [1], [0, 0, 1, 1], [], []>} : vector<8x8xf32>, vector<8x128xf32>, vector<8x128xf32> -> vector<8x128xf32>
    %662 = arith.subf %659, %661 : vector<8x128xf32>
    %663 = vector.broadcast %23 : vector<1x128xf32> to vector<8x128xf32>
    %664 = arith.addf %662, %663 : vector<8x128xf32>
    %cst_138 = arith.constant 0.000000e+00 : f32
    %665 = vector.broadcast %cst_138 : f32 to vector<8x128xf32>
    %666 = arith.maximumf %664, %665 : vector<8x128xf32>
    %cst_139 = arith.constant dense<0.000000e+00> : vector<8x128xf32>
    %667 = tpu.matmul %650, %7, %cst_139 {dimension_numbers = #tpu.dot_dimension_numbers<[1], [0], [0], [1], [0, 0, 1, 1], [], []>} : vector<8x16xbf16>, vector<16x128xbf16>, vector<8x128xf32> -> vector<8x128xf32>
    %668 = arith.mulf %667, %24 : vector<8x128xf32>
    %cst_140 = arith.constant dense<0.000000e+00> : vector<8x128xf32>
    %669 = tpu.matmul %25, %668, %cst_140 {dimension_numbers = #tpu.dot_dimension_numbers<[1], [0], [0], [1], [0, 0, 1, 1], [], []>} : vector<8x8xf32>, vector<8x128xf32>, vector<8x128xf32> -> vector<8x128xf32>
    %670 = arith.addf %666, %669 : vector<8x128xf32>
    %cst_141 = arith.constant 0.000000e+00 : f32
    %671 = vector.broadcast %cst_141 : f32 to vector<8x128xf32>
    %672 = arith.maximumf %670, %671 : vector<8x128xf32>
    %c304 = arith.constant 304 : index
    %c0_142 = arith.constant 0 : index
    %673 = vector.load %arg0[%c304, %c0_142] : memref<336x128xbf16, #tpu.memory_space<vmem>>, vector<8x128xbf16>
    %674 = arith.truncf %672 : vector<8x128xf32> to vector<8x128xbf16>
    %675 = arith.mulf %674, %673 : vector<8x128xbf16>
    %c112_143 = arith.constant 112 : index
    %c0_144 = arith.constant 0 : index
    %676 = vector.load %arg0[%c112_143, %c0_144] : memref<336x128xbf16, #tpu.memory_space<vmem>>, vector<128x20xbf16>
    %cst_145 = arith.constant dense<0.000000e+00> : vector<8x20xf32>
    %677 = tpu.matmul %675, %676, %cst_145 {dimension_numbers = #tpu.dot_dimension_numbers<[1], [0], [0], [1], [0, 0, 1, 1], [], []>} : vector<8x128xbf16>, vector<128x20xbf16>, vector<8x20xf32> -> vector<8x20xf32>
    %678 = vector.extract_strided_slice %677 {offsets = [0, 0], sizes = [8, 16], strides = [1, 1]} : vector<8x20xf32> to vector<8x16xf32>
    %679 = vector.extract_strided_slice %677 {offsets = [0, 16], sizes = [8, 4], strides = [1, 1]} : vector<8x20xf32> to vector<8x4xf32>
    %cst_146 = arith.constant dense<0.000000e+00> : vector<8x4xf32>
    %680 = tpu.matmul %650, %6, %cst_146 {dimension_numbers = #tpu.dot_dimension_numbers<[1], [0], [0], [1], [0, 0, 1, 1], [], []>} : vector<8x16xbf16>, vector<16x4xbf16>, vector<8x4xf32> -> vector<8x4xf32>
    %681 = arith.addf %679, %680 : vector<8x4xf32>
    %682 = vector.broadcast %13 : vector<1x4xf32> to vector<8x4xf32>
    %683 = arith.addf %681, %682 : vector<8x4xf32>
    %684 = vector.extract_strided_slice %683 {offsets = [0, 0], sizes = [8, 2], strides = [1, 1]} : vector<8x4xf32> to vector<8x2xf32>
    %685 = vector.extract_strided_slice %683 {offsets = [0, 2], sizes = [8, 2], strides = [1, 1]} : vector<8x4xf32> to vector<8x2xf32>
    %cst_147 = arith.constant -9.000000e+00 : f32
    %cst_148 = arith.constant 4.000000e+00 : f32
    %686 = vector.broadcast %cst_147 : f32 to vector<8x2xf32>
    %687 = arith.maximumf %686, %685 : vector<8x2xf32>
    %688 = vector.broadcast %cst_148 : f32 to vector<8x2xf32>
    %689 = arith.minimumf %688, %687 : vector<8x2xf32>
    %690 = math.exp %689 : vector<8x2xf32>
    %c152 = arith.constant 152 : index
    %c0_149 = arith.constant 0 : index
    %691 = vector.load %arg1[%c152, %c0_149] : memref<184x128xf32, #tpu.memory_space<vmem>>, vector<8x2xf32>
    %692 = arith.mulf %690, %691 : vector<8x2xf32>
    %693 = arith.addf %684, %692 : vector<8x2xf32>
    %694 = arith.addf %603, %693 : vector<8x2xf32>
    %695 = vector.extract_strided_slice %684 {offsets = [0, 0], sizes = [8, 1], strides = [1, 1]} : vector<8x2xf32> to vector<8x1xf32>
    %696 = vector.broadcast %695 : vector<8x1xf32> to vector<8x16xf32>
    %697 = vector.broadcast %17 : vector<1x16xf32> to vector<8x16xf32>
    %698 = arith.mulf %696, %697 : vector<8x16xf32>
    %699 = arith.addf %678, %698 : vector<8x16xf32>
    %700 = vector.extract_strided_slice %684 {offsets = [0, 1], sizes = [8, 1], strides = [1, 1]} : vector<8x2xf32> to vector<8x1xf32>
    %701 = vector.broadcast %700 : vector<8x1xf32> to vector<8x16xf32>
    %702 = vector.broadcast %18 : vector<1x16xf32> to vector<8x16xf32>
    %703 = arith.mulf %701, %702 : vector<8x16xf32>
    %704 = arith.addf %699, %703 : vector<8x16xf32>
    %705 = vector.extract_strided_slice %689 {offsets = [0, 0], sizes = [8, 1], strides = [1, 1]} : vector<8x2xf32> to vector<8x1xf32>
    %706 = vector.broadcast %705 : vector<8x1xf32> to vector<8x16xf32>
    %707 = vector.broadcast %19 : vector<1x16xf32> to vector<8x16xf32>
    %708 = arith.mulf %706, %707 : vector<8x16xf32>
    %709 = arith.addf %704, %708 : vector<8x16xf32>
    %710 = vector.extract_strided_slice %689 {offsets = [0, 1], sizes = [8, 1], strides = [1, 1]} : vector<8x2xf32> to vector<8x1xf32>
    %711 = vector.broadcast %710 : vector<8x1xf32> to vector<8x16xf32>
    %712 = vector.broadcast %20 : vector<1x16xf32> to vector<8x16xf32>
    %713 = arith.mulf %711, %712 : vector<8x16xf32>
    %714 = arith.addf %709, %713 : vector<8x16xf32>
    %715 = vector.broadcast %12 : vector<1x16xf32> to vector<8x16xf32>
    %716 = arith.addf %714, %715 : vector<8x16xf32>
    %cst_150 = arith.constant 0.000000e+00 : f32
    %717 = vector.broadcast %cst_150 : f32 to vector<8x16xf32>
    %718 = arith.maximumf %716, %717 : vector<8x16xf32>
    %719 = arith.truncf %718 : vector<8x16xf32> to vector<8x16xbf16>
    %cst_151 = arith.constant dense<0.000000e+00> : vector<8x64xf32>
    %720 = tpu.matmul %719, %2, %cst_151 {dimension_numbers = #tpu.dot_dimension_numbers<[1], [0], [0], [1], [0, 0, 1, 1], [], []>} : vector<8x16xbf16>, vector<16x64xbf16>, vector<8x64xf32> -> vector<8x64xf32>
    %cst_152 = arith.constant dense<0.000000e+00> : vector<8x64xf32>
    %721 = tpu.matmul %650, %3, %cst_152 {dimension_numbers = #tpu.dot_dimension_numbers<[1], [0], [0], [1], [0, 0, 1, 1], [], []>} : vector<8x16xbf16>, vector<16x64xbf16>, vector<8x64xf32> -> vector<8x64xf32>
    %722 = arith.addf %720, %721 : vector<8x64xf32>
    %723 = vector.broadcast %9 : vector<1x64xf32> to vector<8x64xf32>
    %724 = arith.addf %722, %723 : vector<8x64xf32>
    %725 = vector.extract_strided_slice %724 {offsets = [0, 0], sizes = [8, 48], strides = [1, 1]} : vector<8x64xf32> to vector<8x48xf32>
    %726 = arith.negf %725 : vector<8x48xf32>
    %727 = math.exp %726 : vector<8x48xf32>
    %cst_153 = arith.constant 1.000000e+00 : f32
    %728 = vector.broadcast %cst_153 : f32 to vector<8x48xf32>
    %729 = arith.addf %728, %727 : vector<8x48xf32>
    %730 = arith.divf %728, %729 : vector<8x48xf32>
    %731 = vector.extract_strided_slice %730 {offsets = [0, 0], sizes = [8, 16], strides = [1, 1]} : vector<8x48xf32> to vector<8x16xf32>
    %732 = vector.extract_strided_slice %730 {offsets = [0, 16], sizes = [8, 16], strides = [1, 1]} : vector<8x48xf32> to vector<8x16xf32>
    %733 = vector.extract_strided_slice %730 {offsets = [0, 32], sizes = [8, 16], strides = [1, 1]} : vector<8x48xf32> to vector<8x16xf32>
    %734 = arith.mulf %732, %647 : vector<8x16xf32>
    %735 = vector.extract_strided_slice %724 {offsets = [0, 48], sizes = [8, 16], strides = [1, 1]} : vector<8x64xf32> to vector<8x16xf32>
    %736 = math.tanh %735 : vector<8x16xf32>
    %737 = arith.mulf %731, %736 : vector<8x16xf32>
    %738 = arith.addf %734, %737 : vector<8x16xf32>
    %739 = math.tanh %738 : vector<8x16xf32>
    %740 = arith.mulf %733, %739 : vector<8x16xf32>
    %741 = arith.truncf %740 : vector<8x16xf32> to vector<8x16xbf16>
    %742 = vector.extract_strided_slice %694 {offsets = [0, 0], sizes = [8, 1], strides = [1, 1]} : vector<8x2xf32> to vector<8x1xf32>
    %743 = vector.extract_strided_slice %694 {offsets = [0, 1], sizes = [8, 1], strides = [1, 1]} : vector<8x2xf32> to vector<8x1xf32>
    %744 = vector.broadcast %742 : vector<8x1xf32> to vector<8x128xf32>
    %745 = vector.broadcast %21 : vector<1x128xf32> to vector<8x128xf32>
    %746 = arith.mulf %744, %745 : vector<8x128xf32>
    %747 = vector.broadcast %743 : vector<8x1xf32> to vector<8x128xf32>
    %748 = vector.broadcast %22 : vector<1x128xf32> to vector<8x128xf32>
    %749 = arith.mulf %747, %748 : vector<8x128xf32>
    %750 = arith.addf %746, %749 : vector<8x128xf32>
    %751 = arith.mulf %750, %24 : vector<8x128xf32>
    %cst_154 = arith.constant dense<0.000000e+00> : vector<8x128xf32>
    %752 = tpu.matmul %25, %751, %cst_154 {dimension_numbers = #tpu.dot_dimension_numbers<[1], [0], [0], [1], [0, 0, 1, 1], [], []>} : vector<8x8xf32>, vector<8x128xf32>, vector<8x128xf32> -> vector<8x128xf32>
    %753 = arith.subf %750, %752 : vector<8x128xf32>
    %754 = vector.broadcast %23 : vector<1x128xf32> to vector<8x128xf32>
    %755 = arith.addf %753, %754 : vector<8x128xf32>
    %cst_155 = arith.constant 0.000000e+00 : f32
    %756 = vector.broadcast %cst_155 : f32 to vector<8x128xf32>
    %757 = arith.maximumf %755, %756 : vector<8x128xf32>
    %cst_156 = arith.constant dense<0.000000e+00> : vector<8x128xf32>
    %758 = tpu.matmul %741, %7, %cst_156 {dimension_numbers = #tpu.dot_dimension_numbers<[1], [0], [0], [1], [0, 0, 1, 1], [], []>} : vector<8x16xbf16>, vector<16x128xbf16>, vector<8x128xf32> -> vector<8x128xf32>
    %759 = arith.mulf %758, %24 : vector<8x128xf32>
    %cst_157 = arith.constant dense<0.000000e+00> : vector<8x128xf32>
    %760 = tpu.matmul %25, %759, %cst_157 {dimension_numbers = #tpu.dot_dimension_numbers<[1], [0], [0], [1], [0, 0, 1, 1], [], []>} : vector<8x8xf32>, vector<8x128xf32>, vector<8x128xf32> -> vector<8x128xf32>
    %761 = arith.addf %757, %760 : vector<8x128xf32>
    %cst_158 = arith.constant 0.000000e+00 : f32
    %762 = vector.broadcast %cst_158 : f32 to vector<8x128xf32>
    %763 = arith.maximumf %761, %762 : vector<8x128xf32>
    %c312 = arith.constant 312 : index
    %c0_159 = arith.constant 0 : index
    %764 = vector.load %arg0[%c312, %c0_159] : memref<336x128xbf16, #tpu.memory_space<vmem>>, vector<8x128xbf16>
    %765 = arith.truncf %763 : vector<8x128xf32> to vector<8x128xbf16>
    %766 = arith.mulf %765, %764 : vector<8x128xbf16>
    %c112_160 = arith.constant 112 : index
    %c0_161 = arith.constant 0 : index
    %767 = vector.load %arg0[%c112_160, %c0_161] : memref<336x128xbf16, #tpu.memory_space<vmem>>, vector<128x20xbf16>
    %cst_162 = arith.constant dense<0.000000e+00> : vector<8x20xf32>
    %768 = tpu.matmul %766, %767, %cst_162 {dimension_numbers = #tpu.dot_dimension_numbers<[1], [0], [0], [1], [0, 0, 1, 1], [], []>} : vector<8x128xbf16>, vector<128x20xbf16>, vector<8x20xf32> -> vector<8x20xf32>
    %769 = vector.extract_strided_slice %768 {offsets = [0, 0], sizes = [8, 16], strides = [1, 1]} : vector<8x20xf32> to vector<8x16xf32>
    %770 = vector.extract_strided_slice %768 {offsets = [0, 16], sizes = [8, 4], strides = [1, 1]} : vector<8x20xf32> to vector<8x4xf32>
    %cst_163 = arith.constant dense<0.000000e+00> : vector<8x4xf32>
    %771 = tpu.matmul %741, %6, %cst_163 {dimension_numbers = #tpu.dot_dimension_numbers<[1], [0], [0], [1], [0, 0, 1, 1], [], []>} : vector<8x16xbf16>, vector<16x4xbf16>, vector<8x4xf32> -> vector<8x4xf32>
    %772 = arith.addf %770, %771 : vector<8x4xf32>
    %773 = vector.broadcast %13 : vector<1x4xf32> to vector<8x4xf32>
    %774 = arith.addf %772, %773 : vector<8x4xf32>
    %775 = vector.extract_strided_slice %774 {offsets = [0, 0], sizes = [8, 2], strides = [1, 1]} : vector<8x4xf32> to vector<8x2xf32>
    %776 = vector.extract_strided_slice %774 {offsets = [0, 2], sizes = [8, 2], strides = [1, 1]} : vector<8x4xf32> to vector<8x2xf32>
    %cst_164 = arith.constant -9.000000e+00 : f32
    %cst_165 = arith.constant 4.000000e+00 : f32
    %777 = vector.broadcast %cst_164 : f32 to vector<8x2xf32>
    %778 = arith.maximumf %777, %776 : vector<8x2xf32>
    %779 = vector.broadcast %cst_165 : f32 to vector<8x2xf32>
    %780 = arith.minimumf %779, %778 : vector<8x2xf32>
    %781 = math.exp %780 : vector<8x2xf32>
    %c160 = arith.constant 160 : index
    %c0_166 = arith.constant 0 : index
    %782 = vector.load %arg1[%c160, %c0_166] : memref<184x128xf32, #tpu.memory_space<vmem>>, vector<8x2xf32>
    %783 = arith.mulf %781, %782 : vector<8x2xf32>
    %784 = arith.addf %775, %783 : vector<8x2xf32>
    %785 = arith.addf %694, %784 : vector<8x2xf32>
    %786 = vector.extract_strided_slice %775 {offsets = [0, 0], sizes = [8, 1], strides = [1, 1]} : vector<8x2xf32> to vector<8x1xf32>
    %787 = vector.broadcast %786 : vector<8x1xf32> to vector<8x16xf32>
    %788 = vector.broadcast %17 : vector<1x16xf32> to vector<8x16xf32>
    %789 = arith.mulf %787, %788 : vector<8x16xf32>
    %790 = arith.addf %769, %789 : vector<8x16xf32>
    %791 = vector.extract_strided_slice %775 {offsets = [0, 1], sizes = [8, 1], strides = [1, 1]} : vector<8x2xf32> to vector<8x1xf32>
    %792 = vector.broadcast %791 : vector<8x1xf32> to vector<8x16xf32>
    %793 = vector.broadcast %18 : vector<1x16xf32> to vector<8x16xf32>
    %794 = arith.mulf %792, %793 : vector<8x16xf32>
    %795 = arith.addf %790, %794 : vector<8x16xf32>
    %796 = vector.extract_strided_slice %780 {offsets = [0, 0], sizes = [8, 1], strides = [1, 1]} : vector<8x2xf32> to vector<8x1xf32>
    %797 = vector.broadcast %796 : vector<8x1xf32> to vector<8x16xf32>
    %798 = vector.broadcast %19 : vector<1x16xf32> to vector<8x16xf32>
    %799 = arith.mulf %797, %798 : vector<8x16xf32>
    %800 = arith.addf %795, %799 : vector<8x16xf32>
    %801 = vector.extract_strided_slice %780 {offsets = [0, 1], sizes = [8, 1], strides = [1, 1]} : vector<8x2xf32> to vector<8x1xf32>
    %802 = vector.broadcast %801 : vector<8x1xf32> to vector<8x16xf32>
    %803 = vector.broadcast %20 : vector<1x16xf32> to vector<8x16xf32>
    %804 = arith.mulf %802, %803 : vector<8x16xf32>
    %805 = arith.addf %800, %804 : vector<8x16xf32>
    %806 = vector.broadcast %12 : vector<1x16xf32> to vector<8x16xf32>
    %807 = arith.addf %805, %806 : vector<8x16xf32>
    %cst_167 = arith.constant 0.000000e+00 : f32
    %808 = vector.broadcast %cst_167 : f32 to vector<8x16xf32>
    %809 = arith.maximumf %807, %808 : vector<8x16xf32>
    %810 = arith.truncf %809 : vector<8x16xf32> to vector<8x16xbf16>
    %cst_168 = arith.constant dense<0.000000e+00> : vector<8x64xf32>
    %811 = tpu.matmul %810, %2, %cst_168 {dimension_numbers = #tpu.dot_dimension_numbers<[1], [0], [0], [1], [0, 0, 1, 1], [], []>} : vector<8x16xbf16>, vector<16x64xbf16>, vector<8x64xf32> -> vector<8x64xf32>
    %cst_169 = arith.constant dense<0.000000e+00> : vector<8x64xf32>
    %812 = tpu.matmul %741, %3, %cst_169 {dimension_numbers = #tpu.dot_dimension_numbers<[1], [0], [0], [1], [0, 0, 1, 1], [], []>} : vector<8x16xbf16>, vector<16x64xbf16>, vector<8x64xf32> -> vector<8x64xf32>
    %813 = arith.addf %811, %812 : vector<8x64xf32>
    %814 = vector.broadcast %9 : vector<1x64xf32> to vector<8x64xf32>
    %815 = arith.addf %813, %814 : vector<8x64xf32>
    %816 = vector.extract_strided_slice %815 {offsets = [0, 0], sizes = [8, 48], strides = [1, 1]} : vector<8x64xf32> to vector<8x48xf32>
    %817 = arith.negf %816 : vector<8x48xf32>
    %818 = math.exp %817 : vector<8x48xf32>
    %cst_170 = arith.constant 1.000000e+00 : f32
    %819 = vector.broadcast %cst_170 : f32 to vector<8x48xf32>
    %820 = arith.addf %819, %818 : vector<8x48xf32>
    %821 = arith.divf %819, %820 : vector<8x48xf32>
    %822 = vector.extract_strided_slice %821 {offsets = [0, 0], sizes = [8, 16], strides = [1, 1]} : vector<8x48xf32> to vector<8x16xf32>
    %823 = vector.extract_strided_slice %821 {offsets = [0, 16], sizes = [8, 16], strides = [1, 1]} : vector<8x48xf32> to vector<8x16xf32>
    %824 = vector.extract_strided_slice %821 {offsets = [0, 32], sizes = [8, 16], strides = [1, 1]} : vector<8x48xf32> to vector<8x16xf32>
    %825 = arith.mulf %823, %738 : vector<8x16xf32>
    %826 = vector.extract_strided_slice %815 {offsets = [0, 48], sizes = [8, 16], strides = [1, 1]} : vector<8x64xf32> to vector<8x16xf32>
    %827 = math.tanh %826 : vector<8x16xf32>
    %828 = arith.mulf %822, %827 : vector<8x16xf32>
    %829 = arith.addf %825, %828 : vector<8x16xf32>
    %830 = math.tanh %829 : vector<8x16xf32>
    %831 = arith.mulf %824, %830 : vector<8x16xf32>
    %832 = arith.truncf %831 : vector<8x16xf32> to vector<8x16xbf16>
    %833 = vector.extract_strided_slice %785 {offsets = [0, 0], sizes = [8, 1], strides = [1, 1]} : vector<8x2xf32> to vector<8x1xf32>
    %834 = vector.extract_strided_slice %785 {offsets = [0, 1], sizes = [8, 1], strides = [1, 1]} : vector<8x2xf32> to vector<8x1xf32>
    %835 = vector.broadcast %833 : vector<8x1xf32> to vector<8x128xf32>
    %836 = vector.broadcast %21 : vector<1x128xf32> to vector<8x128xf32>
    %837 = arith.mulf %835, %836 : vector<8x128xf32>
    %838 = vector.broadcast %834 : vector<8x1xf32> to vector<8x128xf32>
    %839 = vector.broadcast %22 : vector<1x128xf32> to vector<8x128xf32>
    %840 = arith.mulf %838, %839 : vector<8x128xf32>
    %841 = arith.addf %837, %840 : vector<8x128xf32>
    %842 = arith.mulf %841, %24 : vector<8x128xf32>
    %cst_171 = arith.constant dense<0.000000e+00> : vector<8x128xf32>
    %843 = tpu.matmul %25, %842, %cst_171 {dimension_numbers = #tpu.dot_dimension_numbers<[1], [0], [0], [1], [0, 0, 1, 1], [], []>} : vector<8x8xf32>, vector<8x128xf32>, vector<8x128xf32> -> vector<8x128xf32>
    %844 = arith.subf %841, %843 : vector<8x128xf32>
    %845 = vector.broadcast %23 : vector<1x128xf32> to vector<8x128xf32>
    %846 = arith.addf %844, %845 : vector<8x128xf32>
    %cst_172 = arith.constant 0.000000e+00 : f32
    %847 = vector.broadcast %cst_172 : f32 to vector<8x128xf32>
    %848 = arith.maximumf %846, %847 : vector<8x128xf32>
    %cst_173 = arith.constant dense<0.000000e+00> : vector<8x128xf32>
    %849 = tpu.matmul %832, %7, %cst_173 {dimension_numbers = #tpu.dot_dimension_numbers<[1], [0], [0], [1], [0, 0, 1, 1], [], []>} : vector<8x16xbf16>, vector<16x128xbf16>, vector<8x128xf32> -> vector<8x128xf32>
    %850 = arith.mulf %849, %24 : vector<8x128xf32>
    %cst_174 = arith.constant dense<0.000000e+00> : vector<8x128xf32>
    %851 = tpu.matmul %25, %850, %cst_174 {dimension_numbers = #tpu.dot_dimension_numbers<[1], [0], [0], [1], [0, 0, 1, 1], [], []>} : vector<8x8xf32>, vector<8x128xf32>, vector<8x128xf32> -> vector<8x128xf32>
    %852 = arith.addf %848, %851 : vector<8x128xf32>
    %cst_175 = arith.constant 0.000000e+00 : f32
    %853 = vector.broadcast %cst_175 : f32 to vector<8x128xf32>
    %854 = arith.maximumf %852, %853 : vector<8x128xf32>
    %c320 = arith.constant 320 : index
    %c0_176 = arith.constant 0 : index
    %855 = vector.load %arg0[%c320, %c0_176] : memref<336x128xbf16, #tpu.memory_space<vmem>>, vector<8x128xbf16>
    %856 = arith.truncf %854 : vector<8x128xf32> to vector<8x128xbf16>
    %857 = arith.mulf %856, %855 : vector<8x128xbf16>
    %c112_177 = arith.constant 112 : index
    %c0_178 = arith.constant 0 : index
    %858 = vector.load %arg0[%c112_177, %c0_178] : memref<336x128xbf16, #tpu.memory_space<vmem>>, vector<128x20xbf16>
    %cst_179 = arith.constant dense<0.000000e+00> : vector<8x20xf32>
    %859 = tpu.matmul %857, %858, %cst_179 {dimension_numbers = #tpu.dot_dimension_numbers<[1], [0], [0], [1], [0, 0, 1, 1], [], []>} : vector<8x128xbf16>, vector<128x20xbf16>, vector<8x20xf32> -> vector<8x20xf32>
    %860 = vector.extract_strided_slice %859 {offsets = [0, 0], sizes = [8, 16], strides = [1, 1]} : vector<8x20xf32> to vector<8x16xf32>
    %861 = vector.extract_strided_slice %859 {offsets = [0, 16], sizes = [8, 4], strides = [1, 1]} : vector<8x20xf32> to vector<8x4xf32>
    %cst_180 = arith.constant dense<0.000000e+00> : vector<8x4xf32>
    %862 = tpu.matmul %832, %6, %cst_180 {dimension_numbers = #tpu.dot_dimension_numbers<[1], [0], [0], [1], [0, 0, 1, 1], [], []>} : vector<8x16xbf16>, vector<16x4xbf16>, vector<8x4xf32> -> vector<8x4xf32>
    %863 = arith.addf %861, %862 : vector<8x4xf32>
    %864 = vector.broadcast %13 : vector<1x4xf32> to vector<8x4xf32>
    %865 = arith.addf %863, %864 : vector<8x4xf32>
    %866 = vector.extract_strided_slice %865 {offsets = [0, 0], sizes = [8, 2], strides = [1, 1]} : vector<8x4xf32> to vector<8x2xf32>
    %867 = vector.extract_strided_slice %865 {offsets = [0, 2], sizes = [8, 2], strides = [1, 1]} : vector<8x4xf32> to vector<8x2xf32>
    %cst_181 = arith.constant -9.000000e+00 : f32
    %cst_182 = arith.constant 4.000000e+00 : f32
    %868 = vector.broadcast %cst_181 : f32 to vector<8x2xf32>
    %869 = arith.maximumf %868, %867 : vector<8x2xf32>
    %870 = vector.broadcast %cst_182 : f32 to vector<8x2xf32>
    %871 = arith.minimumf %870, %869 : vector<8x2xf32>
    %872 = math.exp %871 : vector<8x2xf32>
    %c168 = arith.constant 168 : index
    %c0_183 = arith.constant 0 : index
    %873 = vector.load %arg1[%c168, %c0_183] : memref<184x128xf32, #tpu.memory_space<vmem>>, vector<8x2xf32>
    %874 = arith.mulf %872, %873 : vector<8x2xf32>
    %875 = arith.addf %866, %874 : vector<8x2xf32>
    %876 = arith.addf %785, %875 : vector<8x2xf32>
    %877 = vector.extract_strided_slice %866 {offsets = [0, 0], sizes = [8, 1], strides = [1, 1]} : vector<8x2xf32> to vector<8x1xf32>
    %878 = vector.broadcast %877 : vector<8x1xf32> to vector<8x16xf32>
    %879 = vector.broadcast %17 : vector<1x16xf32> to vector<8x16xf32>
    %880 = arith.mulf %878, %879 : vector<8x16xf32>
    %881 = arith.addf %860, %880 : vector<8x16xf32>
    %882 = vector.extract_strided_slice %866 {offsets = [0, 1], sizes = [8, 1], strides = [1, 1]} : vector<8x2xf32> to vector<8x1xf32>
    %883 = vector.broadcast %882 : vector<8x1xf32> to vector<8x16xf32>
    %884 = vector.broadcast %18 : vector<1x16xf32> to vector<8x16xf32>
    %885 = arith.mulf %883, %884 : vector<8x16xf32>
    %886 = arith.addf %881, %885 : vector<8x16xf32>
    %887 = vector.extract_strided_slice %871 {offsets = [0, 0], sizes = [8, 1], strides = [1, 1]} : vector<8x2xf32> to vector<8x1xf32>
    %888 = vector.broadcast %887 : vector<8x1xf32> to vector<8x16xf32>
    %889 = vector.broadcast %19 : vector<1x16xf32> to vector<8x16xf32>
    %890 = arith.mulf %888, %889 : vector<8x16xf32>
    %891 = arith.addf %886, %890 : vector<8x16xf32>
    %892 = vector.extract_strided_slice %871 {offsets = [0, 1], sizes = [8, 1], strides = [1, 1]} : vector<8x2xf32> to vector<8x1xf32>
    %893 = vector.broadcast %892 : vector<8x1xf32> to vector<8x16xf32>
    %894 = vector.broadcast %20 : vector<1x16xf32> to vector<8x16xf32>
    %895 = arith.mulf %893, %894 : vector<8x16xf32>
    %896 = arith.addf %891, %895 : vector<8x16xf32>
    %897 = vector.broadcast %12 : vector<1x16xf32> to vector<8x16xf32>
    %898 = arith.addf %896, %897 : vector<8x16xf32>
    %cst_184 = arith.constant 0.000000e+00 : f32
    %899 = vector.broadcast %cst_184 : f32 to vector<8x16xf32>
    %900 = arith.maximumf %898, %899 : vector<8x16xf32>
    %901 = arith.truncf %900 : vector<8x16xf32> to vector<8x16xbf16>
    %cst_185 = arith.constant dense<0.000000e+00> : vector<8x64xf32>
    %902 = tpu.matmul %901, %2, %cst_185 {dimension_numbers = #tpu.dot_dimension_numbers<[1], [0], [0], [1], [0, 0, 1, 1], [], []>} : vector<8x16xbf16>, vector<16x64xbf16>, vector<8x64xf32> -> vector<8x64xf32>
    %cst_186 = arith.constant dense<0.000000e+00> : vector<8x64xf32>
    %903 = tpu.matmul %832, %3, %cst_186 {dimension_numbers = #tpu.dot_dimension_numbers<[1], [0], [0], [1], [0, 0, 1, 1], [], []>} : vector<8x16xbf16>, vector<16x64xbf16>, vector<8x64xf32> -> vector<8x64xf32>
    %904 = arith.addf %902, %903 : vector<8x64xf32>
    %905 = vector.broadcast %9 : vector<1x64xf32> to vector<8x64xf32>
    %906 = arith.addf %904, %905 : vector<8x64xf32>
    %907 = vector.extract_strided_slice %906 {offsets = [0, 0], sizes = [8, 48], strides = [1, 1]} : vector<8x64xf32> to vector<8x48xf32>
    %908 = arith.negf %907 : vector<8x48xf32>
    %909 = math.exp %908 : vector<8x48xf32>
    %cst_187 = arith.constant 1.000000e+00 : f32
    %910 = vector.broadcast %cst_187 : f32 to vector<8x48xf32>
    %911 = arith.addf %910, %909 : vector<8x48xf32>
    %912 = arith.divf %910, %911 : vector<8x48xf32>
    %913 = vector.extract_strided_slice %912 {offsets = [0, 0], sizes = [8, 16], strides = [1, 1]} : vector<8x48xf32> to vector<8x16xf32>
    %914 = vector.extract_strided_slice %912 {offsets = [0, 16], sizes = [8, 16], strides = [1, 1]} : vector<8x48xf32> to vector<8x16xf32>
    %915 = vector.extract_strided_slice %912 {offsets = [0, 32], sizes = [8, 16], strides = [1, 1]} : vector<8x48xf32> to vector<8x16xf32>
    %916 = arith.mulf %914, %829 : vector<8x16xf32>
    %917 = vector.extract_strided_slice %906 {offsets = [0, 48], sizes = [8, 16], strides = [1, 1]} : vector<8x64xf32> to vector<8x16xf32>
    %918 = math.tanh %917 : vector<8x16xf32>
    %919 = arith.mulf %913, %918 : vector<8x16xf32>
    %920 = arith.addf %916, %919 : vector<8x16xf32>
    %921 = math.tanh %920 : vector<8x16xf32>
    %922 = arith.mulf %915, %921 : vector<8x16xf32>
    %923 = arith.truncf %922 : vector<8x16xf32> to vector<8x16xbf16>
    %924 = vector.extract_strided_slice %876 {offsets = [0, 0], sizes = [8, 1], strides = [1, 1]} : vector<8x2xf32> to vector<8x1xf32>
    %925 = vector.extract_strided_slice %876 {offsets = [0, 1], sizes = [8, 1], strides = [1, 1]} : vector<8x2xf32> to vector<8x1xf32>
    %926 = vector.broadcast %924 : vector<8x1xf32> to vector<8x128xf32>
    %927 = vector.broadcast %21 : vector<1x128xf32> to vector<8x128xf32>
    %928 = arith.mulf %926, %927 : vector<8x128xf32>
    %929 = vector.broadcast %925 : vector<8x1xf32> to vector<8x128xf32>
    %930 = vector.broadcast %22 : vector<1x128xf32> to vector<8x128xf32>
    %931 = arith.mulf %929, %930 : vector<8x128xf32>
    %932 = arith.addf %928, %931 : vector<8x128xf32>
    %933 = arith.mulf %932, %24 : vector<8x128xf32>
    %cst_188 = arith.constant dense<0.000000e+00> : vector<8x128xf32>
    %934 = tpu.matmul %25, %933, %cst_188 {dimension_numbers = #tpu.dot_dimension_numbers<[1], [0], [0], [1], [0, 0, 1, 1], [], []>} : vector<8x8xf32>, vector<8x128xf32>, vector<8x128xf32> -> vector<8x128xf32>
    %935 = arith.subf %932, %934 : vector<8x128xf32>
    %936 = vector.broadcast %23 : vector<1x128xf32> to vector<8x128xf32>
    %937 = arith.addf %935, %936 : vector<8x128xf32>
    %cst_189 = arith.constant 0.000000e+00 : f32
    %938 = vector.broadcast %cst_189 : f32 to vector<8x128xf32>
    %939 = arith.maximumf %937, %938 : vector<8x128xf32>
    %cst_190 = arith.constant dense<0.000000e+00> : vector<8x128xf32>
    %940 = tpu.matmul %923, %7, %cst_190 {dimension_numbers = #tpu.dot_dimension_numbers<[1], [0], [0], [1], [0, 0, 1, 1], [], []>} : vector<8x16xbf16>, vector<16x128xbf16>, vector<8x128xf32> -> vector<8x128xf32>
    %941 = arith.mulf %940, %24 : vector<8x128xf32>
    %cst_191 = arith.constant dense<0.000000e+00> : vector<8x128xf32>
    %942 = tpu.matmul %25, %941, %cst_191 {dimension_numbers = #tpu.dot_dimension_numbers<[1], [0], [0], [1], [0, 0, 1, 1], [], []>} : vector<8x8xf32>, vector<8x128xf32>, vector<8x128xf32> -> vector<8x128xf32>
    %943 = arith.addf %939, %942 : vector<8x128xf32>
    %cst_192 = arith.constant 0.000000e+00 : f32
    %944 = vector.broadcast %cst_192 : f32 to vector<8x128xf32>
    %945 = arith.maximumf %943, %944 : vector<8x128xf32>
    %c328 = arith.constant 328 : index
    %c0_193 = arith.constant 0 : index
    %946 = vector.load %arg0[%c328, %c0_193] : memref<336x128xbf16, #tpu.memory_space<vmem>>, vector<8x128xbf16>
    %947 = arith.truncf %945 : vector<8x128xf32> to vector<8x128xbf16>
    %948 = arith.mulf %947, %946 : vector<8x128xbf16>
    %c112_194 = arith.constant 112 : index
    %c0_195 = arith.constant 0 : index
    %949 = vector.load %arg0[%c112_194, %c0_195] : memref<336x128xbf16, #tpu.memory_space<vmem>>, vector<128x20xbf16>
    %cst_196 = arith.constant dense<0.000000e+00> : vector<8x20xf32>
    %950 = tpu.matmul %948, %949, %cst_196 {dimension_numbers = #tpu.dot_dimension_numbers<[1], [0], [0], [1], [0, 0, 1, 1], [], []>} : vector<8x128xbf16>, vector<128x20xbf16>, vector<8x20xf32> -> vector<8x20xf32>
    %951 = vector.extract_strided_slice %950 {offsets = [0, 16], sizes = [8, 4], strides = [1, 1]} : vector<8x20xf32> to vector<8x4xf32>
    %cst_197 = arith.constant dense<0.000000e+00> : vector<8x4xf32>
    %952 = tpu.matmul %923, %6, %cst_197 {dimension_numbers = #tpu.dot_dimension_numbers<[1], [0], [0], [1], [0, 0, 1, 1], [], []>} : vector<8x16xbf16>, vector<16x4xbf16>, vector<8x4xf32> -> vector<8x4xf32>
    %953 = arith.addf %951, %952 : vector<8x4xf32>
    %954 = vector.broadcast %13 : vector<1x4xf32> to vector<8x4xf32>
    %955 = arith.addf %953, %954 : vector<8x4xf32>
    %956 = vector.extract_strided_slice %955 {offsets = [0, 0], sizes = [8, 2], strides = [1, 1]} : vector<8x4xf32> to vector<8x2xf32>
    %957 = vector.extract_strided_slice %955 {offsets = [0, 2], sizes = [8, 2], strides = [1, 1]} : vector<8x4xf32> to vector<8x2xf32>
    %cst_198 = arith.constant -9.000000e+00 : f32
    %cst_199 = arith.constant 4.000000e+00 : f32
    %958 = vector.broadcast %cst_198 : f32 to vector<8x2xf32>
    %959 = arith.maximumf %958, %957 : vector<8x2xf32>
    %960 = vector.broadcast %cst_199 : f32 to vector<8x2xf32>
    %961 = arith.minimumf %960, %959 : vector<8x2xf32>
    %962 = math.exp %961 : vector<8x2xf32>
    %c176 = arith.constant 176 : index
    %c0_200 = arith.constant 0 : index
    %963 = vector.load %arg1[%c176, %c0_200] : memref<184x128xf32, #tpu.memory_space<vmem>>, vector<8x2xf32>
    %964 = arith.mulf %962, %963 : vector<8x2xf32>
    %965 = arith.addf %956, %964 : vector<8x2xf32>
    %966 = tpu.concatenate %329, %420, %511, %602, %693, %784, %875, %965 in 1 : vector<8x2xf32>, vector<8x2xf32>, vector<8x2xf32>, vector<8x2xf32>, vector<8x2xf32>, vector<8x2xf32>, vector<8x2xf32>, vector<8x2xf32> -> vector<8x16xf32>
    %c0_201 = arith.constant 0 : index
    %c0_202 = arith.constant 0 : index
    %967 = vector.load %arg2[%c0_201, %c0_202] : memref<8x16xf32, #tpu.memory_space<vmem>>, vector<8x16xf32>
    tpu.vector_store %arg2[%c0_201, %c0_202], %966 {strides = array<i32>} : memref<8x16xf32, #tpu.memory_space<vmem>>, vector<8x16xf32>,
    return
  }
}

</mosaic_0001>

<bundles_post_ra>
// kernel: trajectory_generator_forward.1
= control target key start
LH: loop header
LB: loop body
LE: loop exit
PB: predicated region body
PF: predicated region fallthrough
CT: control target
= control target key end

     0   :  { %v3211_v0 = vmov 1   ;;  %v3212_v1 = vmov 0   ;;  %s3213_s27 = smov 16   ;;  %vm179_vm0 = vcmask 130048   ;;  %s3214_s6 = smov 80   ;;  %s4233_s1 = inlined_call_operand.vmem [shape: f32[184,128], index: 1, kind: input, shape index: {}]   ;;  %s4234_s0 = inlined_call_operand.vmem [shape: bf16[336,128], index: 0, kind: input, shape index: {}]   ;;  %s4235_s2 = inlined_call_operand.vmem [shape: f32[8,16], index: 2, kind: output, shape index: {}]  }
   0x1   :  { %2973 = vset.pattern.permute.xlu1 %v3211_v0  ;;  %2972 = vset.pattern.permute.xlu0 %v3212_v1  ;;  %v51_v2 = vld [vmem:[%s4233_s1 + $0x48] sm:$0xff]  ;;  %v45_v3 = vld [vmem:[%s4233_s1 + $0x18] sm:$0xff]  ;;  %v52_v4 = vld [vmem:[%s4233_s1 + $0x50] sm:$0xff]  ;;  %s3215_s7 = smov 96   ;;  %s3216_s22 = smov 112  }
   0x2   :  { %127 = vperm.xlu1 %2973, %v51_v2   ;;  %85 = vperm.xlu0 %2972, %v51_v2   ;;  %v46_v5 = vld [vmem:[%s4233_s1 + $0x20] sm:$0xff]  ;;  %v3271_v7 = vld [vmem:[%s4234_s0 + $0x8] sm:$0xff]  ;;  %s3218_s30 = smov 32   ;;  %s3225_s5 = smov 18  }
   0x3   :  { %2974 = vset.pattern.permute.xlu2 %v3212_v1  ;;  %v2933_v6 = vld [vmem:[%s4234_s0] sm:$0xff]  ;;  %302 = vmatpush.bf16.msra.mxu2 %v3271_v7  ;;  %v3278_v8 = vld [vmem:[%s4233_s1 + $0x8] ss:$0 sm:$0xff]  ;;  %s3226_s8 = smov 126   ;;  %s3227_s29 = smov 114  }
   0x4   :  { %55 = vperm.xlu2 %2974, %v45_v3   ;;  %2949 = vmatpush.bf16.msra.mxu1 %v2933_v6  ;;  %v3283_v9 = vld [vmem:[%s4233_s1 + $0x7] ss:$0 sm:$0xff]  ;;  %v222_v14 = vld [vmem:[%s4233_s1 + $0x68] sm:$0xff]  ;;  %v3297_v17 = vld [vmem:[%s4233_s1 + $0x6] ss:$0 sm:$0xff] }
   0x5   :  { %199 = vmatpush.bf16.msra.mxu0 %v2933_v6  ;;  %360 = vmatpush.bf16.msra.mxu3 %v3271_v7  ;;  %v221_v42 = vld [vmem:[%s4233_s1 + $0x60] sm:$0xff] }
   0x6   :  { %v223_v43 = vpack.c.bf16 %v221_v42, %v221_v42  ;;  %v3324_v47 = vld [vmem:[%s4233_s1] ss:$0 sm:$0xff] }
   0x7   :  { %476 = vmatpush.bf16.msrb.mxu2 %v3271_v7 }
   0x8   :  { %240 = vmatpush.bf16.msrb.mxu1 %v3271_v7 }
   0x9   :  { %534 = vmatpush.bf16.msrb.mxu3 %v3271_v7 }
   0xa   :  { %131 = vperm.xlu1 %2973, %v52_v4   ;;  %90 = vperm.xlu0 %2972, %v52_v4  }
   0xc   :  { %60 = vperm.xlu2 %2974, %v46_v5  }
  0x12   :  { %2975 = vset.pattern.permute.xlu0 %v3211_v0  ;;  %107 = vperm.xlu1 %2973, %v46_v5  }
  0x13   :  { %103 = vperm.xlu0 %2975, %v45_v3  }
  0x1a   :  { %267 = vrot.lane.b32.xlu1 %v222_v14, %s3213_s27 }
  0x1b   :  { %2976 = vset.pattern.permute.xlu0 %v3212_v1 }
  0x5e   :  { %v56_v15 = vpop.permute.xlu2 %55 }
  0x5f   :  { %v94_v33 = vmul.f32 %v3283_v9, %v56_v15 }
  0x66   :  { %v61_v25 = vpop.permute.xlu2 %60 }
  0x67   :  { %v95_v29 = vmul.f32 %v3283_v9, %v61_v25  ;;  %v47_v25 = vld [vmem:[%s4233_s1 + $0x28] sm:$0xff] }
  0x74   :  { %v128_v10 = vpop.permute.xlu1 %127  ;;  %v86_v11 = vpop.permute.xlu0 %85 }
  0x75   :  { %v141_v12 = vmul.f32 %v3278_v8, %v128_v10  ;;  %v100_v13 = vmul.f32 %v3283_v9, %v86_v11 }
  0x77   :  { %v149_v16 = vadd.f32 %v141_v12, %v100_v13 }
  0x79   :  { %v158_v22 = vadd.f32 %v3297_v17, %v149_v16 }
  0x7b   :  { %v166_v27 = vmax.f32 %v158_v22, 0.0 }
  0x7c   :  { %v132_v18 = vpop.permute.xlu1 %131  ;;  %v91_v19 = vpop.permute.xlu0 %90 }
  0x7d   :  { %v142_v20 = vmul.f32 %v3278_v8, %v132_v18  ;;  %v101_v21 = vmul.f32 %v3283_v9, %v91_v19 }
  0x7f   :  { %v150_v23 = vadd.f32 %v142_v20, %v101_v21 }
  0x81   :  { %v159_v24 = vadd.f32 %v3297_v17, %v150_v23 }
  0x83   :  { %v167_v26 = vmax.f32 %v159_v24, 0.0 }
  0x84   :  { %v108_v28 = vpop.permute.xlu1 %107 }
  0x85   :  { %v136_v30 = vmul.f32 %v3278_v8, %v108_v28  ;;  %v104_v31 = vpop.permute.xlu0 %103  ;;  %v171_v32 = vpack.c.bf16 %v167_v26, %v166_v27 }
  0x86   :  { %v135_v34 = vmul.f32 %v3278_v8, %v104_v31 }
  0x87   :  { %v144_v35 = vadd.f32 %v136_v30, %v95_v29  ;;  %2797 = vmatmul.msk.bf16.vlgmr.msra.gmra.mxu1 %vm179_vm0, %v171_v32 }
  0x88   :  { %v143_v36 = vadd.f32 %v135_v34, %v94_v33  ;;  %418 = vmatpush.bf16.msra.mxu1 %v3271_v7 }
  0x89   :  { %v153_v37 = vadd.f32 %v3297_v17, %v144_v35 }
  0x8a   :  { %v152_v38 = vadd.f32 %v3297_v17, %v143_v36 }
  0x8b   :  { %v161_v39 = vmax.f32 %v153_v37, 0.0 }
  0x8c   :  { %v160_v40 = vmax.f32 %v152_v38, 0.0  ;;  %v268_v6 = vpop.permute.xlu1 %267 }
  0x8e   :  { %v168_v41 = vpack.c.bf16 %v161_v39, %v160_v40  ;;  %v48_v40 = vld [vmem:[%s4233_s1 + $0x30] sm:$0xff] }
  0x90   :  { %2794 = vmatmul.msk.bf16.vlgmr.msra.gmra.mxu0 %vm179_vm0, %v168_v41 }
  0x97   :  { %2802 = vmatmul.msk.bf16.vlgmr.msrb.gmra.mxu1 %vm179_vm0, %v223_v43 }
  0x98   :  { %592 = vmatpush.bf16.msrb.mxu1 %v3271_v7 }
 0x104   :  { %v3317_v44 = vpop.f32.mrf.mxu1 }
 0x10c   :  { %v3319_v45 = vpop.f32.mrf.mxu1 }
 0x10d   :  { %v201_v46 = vpop.f32.mrf.mxu0 }
 0x10e   :  { %v202_v48 = vadd.f32 %v3324_v47, %v201_v46 }
 0x114   :  { %v242_v49 = vpop.f32.mrf.mxu1 }
 0x115   :  { %v246_v50 = vadd.f32 %v242_v49, %v202_v48  ;;  %v203_v19 = vpop.f32.mrf.mxu0 }
 0x116   :  { %v204_v20 = vadd.f32 %v3324_v47, %v203_v19 }
 0x117   :  { %3037 = vtanh.f32 %v246_v50  ;;  %v2803_v53 = vmul.f32 -1.442695, %v246_v50 }
 0x119   :  { %3039 = vpow2.f32 %v2803_v53 }
 0x11c   :  { %v244_v51 = vpop.f32.mrf.mxu1 }
 0x11d   :  { %v3038_v52 = vpop.eup %3037 }
 0x11e   :  { %273 = vrot.lane.b32.xlu2 %v3038_v52, %s3214_s6 }
 0x11f   :  { %v3040_v54 = vpop.eup %3039 }
 0x120   :  { %v250_v55 = vadd.f32 1.0, %v3040_v54 }
 0x122   :  { %3041 = vrcp.f32 %v250_v55  ;;  %v262_v61 = vand.u32 2147483648, %v250_v55  ;;  %vm256_vm2 = vweird.f32 %v250_v55  ;;  %v260_v62 = vand.u32 2147483647, %v250_v55 }
 0x124   :  { %v263_v2 = vor.u32 1.1754944e-38, %v262_v61  ;;  %vm261_vm4 = vcmp.eq.f32.partialorder %v260_v62, 8.507059e+37 }
 0x128   :  { %v3042_v56 = vpop.eup %3041 }
 0x129   :  { %v252_v57 = vmul.f32 %v3042_v56, %v250_v55  ;;  %vm257_vm1 = vweird.f32 %v3042_v56 }
 0x12a   :  { %vm258_vm3 = vmor %vm256_vm2, %vm257_vm1 }
 0x12b   :  { %v253_v58 = vsub.f32 1.0, %v252_v57 }
 0x12d   :  { %v254_v59 = vmul.f32 %v3042_v56, %v253_v58 }
 0x12f   :  { %v255_v60 = vadd.f32 %v3042_v56, %v254_v59 }
 0x131   :  { %v259_v63 = vsel %vm258_vm3, %v3042_v56, %v255_v60 }
 0x132   :  { %v264_v3 = vsel %vm261_vm4, %v263_v2, %v259_v63 }
 0x133   :  { %v270_v10 = vmul.f32 %v268_v6, %v264_v3 }
 0x178   :  { %v274_v4 = vpop.permute.xlu2 %273 }
 0x179   :  { %v276_v5 = vmul.f32 %v274_v4, %v264_v3 }
 0x17b   :  { %278 = vrot.lane.b32.xlu2 %v276_v5, %s3213_s27 }
 0x1d5   :  { %v279_v11 = vpop.permute.xlu2 %278 }
 0x1d6   :  { %v281_v12 = vadd.f32 %v279_v11, %v270_v10 }
 0x1d8   :  { %3043 = vtanh.f32 %v281_v12 }
 0x1de   :  { %v3044_v13 = vpop.eup %3043 }
 0x1df   :  { %284 = vrot.lane.b32.xlu0 %v3044_v13, %s3213_s27 }
 0x251   :  { %v285_v14 = vpop.permute.xlu0 %284 }
 0x252   :  { %v287_v15 = vmul.f32 %v285_v14, %v264_v3 }
 0x254   :  { %v288_v16 = vpack.c.bf16 %v287_v15, %v287_v15 }
 0x256   :  { %290 = vrot.lane.b32.xlu1 %v288_v16, %s3215_s7 }
 0x2c8   :  { %v291_v18 = vpop.permute.xlu1 %290 }
 0x2c9   :  { %2804 = vmatmul.msk.bf16.vlgmr.msra.gmra.mxu2 %vm179_vm0, %v291_v18 }
 0x2ca   :  { %650 = vmatpush.bf16.msra.mxu2 %v3271_v7 }
 0x34c   :  { %v304_v21 = vpop.f32.mrf.mxu2 }
 0x34d   :  { %v308_v22 = vadd.f32 %v304_v21, %v204_v20 }
 0x34f   :  { %3045 = vtanh.f32 %v308_v22  ;;  %v2805_v26 = vmul.f32 -1.442695, %v308_v22 }
 0x351   :  { %3047 = vpow2.f32 %v2805_v26 }
 0x354   :  { %v306_v23 = vpop.f32.mrf.mxu2 }
 0x355   :  { %v3046_v24 = vpop.eup %3045 }
 0x356   :  { %331 = vrot.lane.b32.xlu2 %v3046_v24, %s3214_s6 }
 0x357   :  { %v3048_v7 = vpop.eup %3047 }
 0x358   :  { %v312_v27 = vadd.f32 1.0, %v3048_v7 }
 0x35a   :  { %3049 = vrcp.f32 %v312_v27  ;;  %v324_v33 = vand.u32 2147483648, %v312_v27  ;;  %vm318_vm6 = vweird.f32 %v312_v27  ;;  %v322_v34 = vand.u32 2147483647, %v312_v27 }
 0x35c   :  { %v325_v36 = vor.u32 1.1754944e-38, %v324_v33  ;;  %vm323_vm8 = vcmp.eq.f32.partialorder %v322_v34, 8.507059e+37 }
 0x35e   :  { %65 = vperm.xlu2 %2974, %v47_v25  }
 0x360   :  { %v3050_v28 = vpop.eup %3049 }
 0x361   :  { %v314_v29 = vmul.f32 %v3050_v28, %v312_v27  ;;  %vm319_vm5 = vweird.f32 %v3050_v28 }
 0x362   :  { %vm320_vm7 = vmor %vm318_vm6, %vm319_vm5 }
 0x363   :  { %v315_v30 = vsub.f32 1.0, %v314_v29 }
 0x365   :  { %v316_v31 = vmul.f32 %v3050_v28, %v315_v30 }
 0x366   :  { %2977 = vset.pattern.permute.xlu2 %v3211_v0 }
 0x367   :  { %v317_v32 = vadd.f32 %v3050_v28, %v316_v31  ;;  %115 = vperm.xlu2 %2977, %v48_v40  }
 0x369   :  { %v321_v35 = vsel %vm320_vm7, %v3050_v28, %v317_v32 }
 0x36a   :  { %v326_v38 = vsel %vm323_vm8, %v325_v36, %v321_v35 }
 0x36b   :  { %v328_v41 = vmul.f32 %v326_v38, %v281_v12 }
 0x3b0   :  { %v332_v37 = vpop.permute.xlu2 %331 }
 0x3b1   :  { %v334_v39 = vmul.f32 %v332_v37, %v326_v38 }
 0x3b3   :  { %336 = vrot.lane.b32.xlu0 %v334_v39, %s3213_s27 }
 0x3b8   :  { %v66_v48 = vpop.permute.xlu2 %65 }
 0x3b9   :  { %v96_v58 = vmul.f32 %v3283_v9, %v66_v48 }
 0x3bb   :  { %70 = vperm.xlu0 %2976, %v48_v40  }
 0x3c1   :  { %v116_v49 = vpop.permute.xlu2 %115 }
 0x3c2   :  { %v138_v53 = vmul.f32 %v3278_v8, %v116_v49 }
 0x425   :  { %v337_v42 = vpop.permute.xlu0 %336 }
 0x426   :  { %v339_v43 = vadd.f32 %v337_v42, %v328_v41 }
 0x428   :  { %3051 = vtanh.f32 %v339_v43 }
 0x42d   :  { %v71_v50 = vpop.permute.xlu0 %70 }
 0x42e   :  { %v3052_v46 = vpop.eup %3051  ;;  %v97_v54 = vmul.f32 %v3283_v9, %v71_v50  ;;  %v50_v50 = vld [vmem:[%s4233_s1 + $0x40] sm:$0xff] }
 0x42f   :  { %342 = vrot.lane.b32.xlu1 %v3052_v46, %s3213_s27 }
 0x430   :  { %v146_v56 = vadd.f32 %v138_v53, %v97_v54 }
 0x432   :  { %v155_v59 = vadd.f32 %v3297_v17, %v146_v56 }
 0x434   :  { %v163_v62 = vmax.f32 %v155_v59, 0.0 }
 0x437   :  { %111 = vperm.xlu1 %2973, %v47_v25  }
 0x43f   :  { %2978 = vset.pattern.permute.xlu1 %v3212_v1 }
 0x4a1   :  { %v343_v51 = vpop.permute.xlu1 %342 }
 0x4a2   :  { %v345_v52 = vmul.f32 %v343_v51, %v326_v38 }
 0x4a4   :  { %v346_v55 = vpack.c.bf16 %v345_v52, %v345_v52 }
 0x4a6   :  { %348 = vrot.lane.b32.xlu1 %v346_v55, %s3215_s7 }
 0x4a9   :  { %v112_v57 = vpop.permute.xlu1 %111 }
 0x4aa   :  { %v137_v60 = vmul.f32 %v3278_v8, %v112_v57 }
 0x4ac   :  { %v145_v61 = vadd.f32 %v137_v60, %v96_v58 }
 0x4ae   :  { %v154_v63 = vadd.f32 %v3297_v17, %v145_v61 }
 0x4b0   :  { %v162_v2 = vmax.f32 %v154_v63, 0.0 }
 0x4b2   :  { %v169_v3 = vpack.c.bf16 %v163_v62, %v162_v2 }
 0x4b4   :  { %2795 = vmatmul.msk.bf16.gmra.mxu0 %vm179_vm0, %v169_v3 }
 0x518   :  { %v349_v4 = vpop.permute.xlu1 %348 }
 0x519   :  { %2806 = vmatmul.msk.bf16.vlgmr.msra.gmra.mxu3 %vm179_vm0, %v349_v4 }
 0x531   :  { %v206_v5 = vpop.f32.mrf.mxu0 }
 0x532   :  { %v207_v6 = vadd.f32 %v3324_v47, %v206_v5 }
 0x539   :  { %v208_v37 = vpop.f32.mrf.mxu0 }
 0x53a   :  { %v209_v38 = vadd.f32 %v3324_v47, %v208_v37 }
 0x59c   :  { %v362_v10 = vpop.f32.mrf.mxu3 }
 0x59d   :  { %v366_v11 = vadd.f32 %v362_v10, %v207_v6 }
 0x59f   :  { %3053 = vtanh.f32 %v366_v11  ;;  %v2807_v14 = vmul.f32 -1.442695, %v366_v11 }
 0x5a1   :  { %3055 = vpow2.f32 %v2807_v14 }
 0x5a4   :  { %v364_v12 = vpop.f32.mrf.mxu3 }
 0x5a5   :  { %v3054_v13 = vpop.eup %3053 }
 0x5a6   :  { %389 = vrot.lane.b32.xlu2 %v3054_v13, %s3214_s6 }
 0x5a7   :  { %v3056_v15 = vpop.eup %3055 }
 0x5a8   :  { %v370_v16 = vadd.f32 1.0, %v3056_v15 }
 0x5aa   :  { %3057 = vrcp.f32 %v370_v16  ;;  %v382_v23 = vand.u32 2147483648, %v370_v16  ;;  %vm376_vm10 = vweird.f32 %v370_v16  ;;  %v380_v24 = vand.u32 2147483647, %v370_v16 }
 0x5ac   :  { %v383_v26 = vor.u32 1.1754944e-38, %v382_v23  ;;  %vm381_vm12 = vcmp.eq.f32.partialorder %v380_v24, 8.507059e+37 }
 0x5b0   :  { %v3058_v18 = vpop.eup %3057 }
 0x5b1   :  { %v372_v19 = vmul.f32 %v3058_v18, %v370_v16  ;;  %vm377_vm9 = vweird.f32 %v3058_v18 }
 0x5b2   :  { %vm378_vm11 = vmor %vm376_vm10, %vm377_vm9 }
 0x5b3   :  { %v373_v20 = vsub.f32 1.0, %v372_v19 }
 0x5b5   :  { %v374_v21 = vmul.f32 %v3058_v18, %v373_v20 }
 0x5b7   :  { %v375_v22 = vadd.f32 %v3058_v18, %v374_v21 }
 0x5b9   :  { %v379_v25 = vsel %vm378_vm11, %v3058_v18, %v375_v22 }
 0x5ba   :  { %v384_v27 = vsel %vm381_vm12, %v383_v26, %v379_v25 }
 0x5bb   :  { %v386_v29 = vmul.f32 %v384_v27, %v339_v43  ;;  %v49_v43 = vld [vmem:[%s4233_s1 + $0x38] sm:$0xff] }
 0x600   :  { %v390_v7 = vpop.permute.xlu2 %389 }
 0x601   :  { %v392_v28 = vmul.f32 %v390_v7, %v384_v27 }
 0x603   :  { %394 = vrot.lane.b32.xlu0 %v392_v28, %s3213_s27 }
 0x675   :  { %v395_v30 = vpop.permute.xlu0 %394 }
 0x676   :  { %v397_v31 = vadd.f32 %v395_v30, %v386_v29 }
 0x678   :  { %3059 = vtanh.f32 %v397_v31 }
 0x67e   :  { %v3060_v32 = vpop.eup %3059 }
 0x67f   :  { %400 = vrot.lane.b32.xlu1 %v3060_v32, %s3213_s27 }
 0x6f1   :  { %v401_v33 = vpop.permute.xlu1 %400 }
 0x6f2   :  { %v403_v34 = vmul.f32 %v401_v33, %v384_v27 }
 0x6f4   :  { %v404_v35 = vpack.c.bf16 %v403_v34, %v403_v34 }
 0x6f6   :  { %406 = vrot.lane.b32.xlu2 %v404_v35, %s3215_s7 }
 0x750   :  { %v407_v36 = vpop.permute.xlu2 %406 }
 0x751   :  { %2808 = vmatmul.msk.bf16.vlgmr.msra.gmra.mxu1 %vm179_vm0, %v407_v36 }
 0x7ce   :  { %v420_v39 = vpop.f32.mrf.mxu1 }
 0x7cf   :  { %v424_v40 = vadd.f32 %v420_v39, %v209_v38 }
 0x7d1   :  { %3061 = vtanh.f32 %v424_v40  ;;  %v2809_v46 = vmul.f32 -1.442695, %v424_v40 }
 0x7d3   :  { %3063 = vpow2.f32 %v2809_v46 }
 0x7d6   :  { %v422_v41 = vpop.f32.mrf.mxu1 }
 0x7d7   :  { %v3062_v42 = vpop.eup %3061 }
 0x7d8   :  { %447 = vrot.lane.b32.xlu0 %v3062_v42, %s3214_s6 }
 0x7d9   :  { %v3064_v48 = vpop.eup %3063 }
 0x7da   :  { %v428_v49 = vadd.f32 1.0, %v3064_v48 }
 0x7dc   :  { %3065 = vrcp.f32 %v428_v49  ;;  %v440_v56 = vand.u32 2147483648, %v428_v49  ;;  %vm434_vm14 = vweird.f32 %v428_v49  ;;  %v438_v57 = vand.u32 2147483647, %v428_v49 }
 0x7de   :  { %v441_v59 = vor.u32 1.1754944e-38, %v440_v56  ;;  %vm439_vm1 = vcmp.eq.f32.partialorder %v438_v57, 8.507059e+37 }
 0x7e0   :  { %75 = vperm.xlu0 %2976, %v49_v43  }
 0x7e2   :  { %v3066_v51 = vpop.eup %3065 }
 0x7e3   :  { %v430_v52 = vmul.f32 %v3066_v51, %v428_v49  ;;  %vm435_vm13 = vweird.f32 %v3066_v51 }
 0x7e4   :  { %vm436_vm15 = vmor %vm434_vm14, %vm435_vm13 }
 0x7e5   :  { %v431_v53 = vsub.f32 1.0, %v430_v52 }
 0x7e7   :  { %v432_v54 = vmul.f32 %v3066_v51, %v431_v53 }
 0x7e8   :  { %2979 = vset.pattern.permute.xlu0 %v3211_v0 }
 0x7e9   :  { %123 = vperm.xlu0 %2979, %v50_v50   ;;  %v433_v55 = vadd.f32 %v3066_v51, %v432_v54 }
 0x7eb   :  { %v437_v58 = vsel %vm436_vm15, %v3066_v51, %v433_v55 }
 0x7ec   :  { %v442_v61 = vsel %vm439_vm1, %v441_v59, %v437_v58 }
 0x7ed   :  { %v444_v63 = vmul.f32 %v442_v61, %v397_v31 }
 0x84a   :  { %v448_v60 = vpop.permute.xlu0 %447 }
 0x84b   :  { %v450_v62 = vmul.f32 %v448_v60, %v442_v61 }
 0x84d   :  { %452 = vrot.lane.b32.xlu1 %v450_v62, %s3213_s27 }
 0x852   :  { %v76_v5 = vpop.permute.xlu0 %75 }
 0x853   :  { %v98_v19 = vmul.f32 %v3283_v9, %v76_v5 }
 0x855   :  { %80 = vperm.xlu1 %2978, %v50_v50  }
 0x85b   :  { %v124_v6 = vpop.permute.xlu0 %123 }
 0x85c   :  { %v140_v13 = vmul.f32 %v3278_v8, %v124_v6 }
 0x8bf   :  { %v453_v2 = vpop.permute.xlu1 %452 }
 0x8c0   :  { %v455_v3 = vadd.f32 %v453_v2, %v444_v63 }
 0x8c2   :  { %3067 = vtanh.f32 %v455_v3 }
 0x8c7   :  { %v81_v10 = vpop.permute.xlu1 %80 }
 0x8c8   :  { %v3068_v4 = vpop.eup %3067  ;;  %v99_v14 = vmul.f32 %v3283_v9, %v81_v10 }
 0x8c9   :  { %458 = vrot.lane.b32.xlu2 %v3068_v4, %s3213_s27 }
 0x8ca   :  { %v148_v16 = vadd.f32 %v140_v13, %v99_v14 }
 0x8cc   :  { %v157_v20 = vadd.f32 %v3297_v17, %v148_v16 }
 0x8ce   :  { %v165_v24 = vmax.f32 %v157_v20, 0.0 }
 0x8d1   :  { %119 = vperm.xlu2 %2977, %v49_v43  }
 0x923   :  { %v459_v11 = vpop.permute.xlu2 %458 }
 0x924   :  { %v461_v12 = vmul.f32 %v459_v11, %v442_v61 }
 0x926   :  { %v462_v15 = vpack.c.bf16 %v461_v12, %v461_v12 }
 0x928   :  { %464 = vrot.lane.b32.xlu1 %v462_v15, %s3215_s7 }
 0x92b   :  { %v120_v18 = vpop.permute.xlu2 %119 }
 0x92c   :  { %v139_v21 = vmul.f32 %v3278_v8, %v120_v18 }
 0x92e   :  { %v147_v22 = vadd.f32 %v139_v21, %v98_v19 }
 0x930   :  { %v156_v23 = vadd.f32 %v3297_v17, %v147_v22 }
 0x932   :  { %v164_v25 = vmax.f32 %v156_v23, 0.0 }
 0x934   :  { %v170_v26 = vpack.c.bf16 %v165_v24, %v164_v25 }
 0x936   :  { %2796 = vmatmul.msk.bf16.gmra.mxu0 %vm179_vm0, %v170_v26 }
 0x99a   :  { %v465_v7 = vpop.permute.xlu1 %464 }
 0x99b   :  { %2810 = vmatmul.msk.bf16.vlgmr.msrb.gmra.mxu2 %vm179_vm0, %v465_v7  ;;  %v217_v7 = vadd.f32 %v3324_v47, %v3317_v44 }
 0x9b3   :  { %v211_v27 = vpop.f32.mrf.mxu0 }
 0x9b4   :  { %v212_v28 = vadd.f32 %v3324_v47, %v211_v27 }
 0x9bb   :  { %v213_v56 = vpop.f32.mrf.mxu0 }
 0x9bc   :  { %v214_v57 = vadd.f32 %v3324_v47, %v213_v56 }
 0xa1e   :  { %v478_v29 = vpop.f32.mrf.mxu2 }
 0xa1f   :  { %v482_v9 = vadd.f32 %v478_v29, %v212_v28 }
 0xa21   :  { %3069 = vtanh.f32 %v482_v9  ;;  %v2811_v8 = vmul.f32 -1.442695, %v482_v9 }
 0xa23   :  { %3071 = vpow2.f32 %v2811_v8 }
 0xa26   :  { %v480_v30 = vpop.f32.mrf.mxu2 }
 0xa27   :  { %v3070_v31 = vpop.eup %3069 }
 0xa28   :  { %505 = vrot.lane.b32.xlu2 %v3070_v31, %s3214_s6 }
 0xa29   :  { %v3072_v17 = vpop.eup %3071 }
 0xa2a   :  { %v486_v32 = vadd.f32 1.0, %v3072_v17 }
 0xa2c   :  { %3073 = vrcp.f32 %v486_v32  ;;  %v498_v38 = vand.u32 2147483648, %v486_v32  ;;  %vm492_vm3 = vweird.f32 %v486_v32  ;;  %v496_v39 = vand.u32 2147483647, %v486_v32 }
 0xa2e   :  { %v499_v41 = vor.u32 1.1754944e-38, %v498_v38  ;;  %vm497_vm5 = vcmp.eq.f32.partialorder %v496_v39, 8.507059e+37 }
 0xa32   :  { %v3074_v33 = vpop.eup %3073 }
 0xa33   :  { %v488_v34 = vmul.f32 %v3074_v33, %v486_v32  ;;  %vm493_vm2 = vweird.f32 %v3074_v33 }
 0xa34   :  { %vm494_vm4 = vmor %vm492_vm3, %vm493_vm2 }
 0xa35   :  { %v489_v35 = vsub.f32 1.0, %v488_v34 }
 0xa37   :  { %v490_v36 = vmul.f32 %v3074_v33, %v489_v35 }
 0xa39   :  { %v491_v37 = vadd.f32 %v3074_v33, %v490_v36 }
 0xa3b   :  { %v495_v40 = vsel %vm494_vm4, %v3074_v33, %v491_v37 }
 0xa3c   :  { %v500_v43 = vsel %vm497_vm5, %v499_v41, %v495_v40 }
 0xa3d   :  { %v502_v48 = vmul.f32 %v500_v43, %v455_v3 }
 0xa82   :  { %v506_v42 = vpop.permute.xlu2 %505 }
 0xa83   :  { %v508_v46 = vmul.f32 %v506_v42, %v500_v43 }
 0xa85   :  { %510 = vrot.lane.b32.xlu1 %v508_v46, %s3213_s27 }
 0xaf7   :  { %v511_v49 = vpop.permute.xlu1 %510 }
 0xaf8   :  { %v513_v50 = vadd.f32 %v511_v49, %v502_v48 }
 0xafa   :  { %3075 = vtanh.f32 %v513_v50 }
 0xb00   :  { %v3076_v51 = vpop.eup %3075 }
 0xb01   :  { %516 = vrot.lane.b32.xlu2 %v3076_v51, %s3213_s27 }
 0xb5b   :  { %v517_v52 = vpop.permute.xlu2 %516 }
 0xb5c   :  { %v519_v53 = vmul.f32 %v517_v52, %v500_v43 }
 0xb5e   :  { %v520_v54 = vpack.c.bf16 %v519_v53, %v519_v53  ;;  %v219_v53 = vadd.f32 %v3324_v47, %v3319_v45 }
 0xb60   :  { %522 = vrot.lane.b32.xlu0 %v520_v54, %s3215_s7 }
 0xbd2   :  { %v523_v55 = vpop.permute.xlu0 %522 }
 0xbd3   :  { %2812 = vmatmul.msk.bf16.vlgmr.msrb.gmra.mxu3 %vm179_vm0, %v523_v55 }
 0xc56   :  { %v536_v58 = vpop.f32.mrf.mxu3 }
 0xc57   :  { %v540_v59 = vadd.f32 %v536_v58, %v214_v57 }
 0xc59   :  { %3077 = vtanh.f32 %v540_v59  ;;  %v2813_v62 = vmul.f32 -1.442695, %v540_v59 }
 0xc5b   :  { %3079 = vpow2.f32 %v2813_v62 }
 0xc5e   :  { %v538_v60 = vpop.f32.mrf.mxu3 }
 0xc5f   :  { %v3078_v61 = vpop.eup %3077 }
 0xc60   :  { %563 = vrot.lane.b32.xlu1 %v3078_v61, %s3214_s6 }
 0xc61   :  { %v3080_v63 = vpop.eup %3079 }
 0xc62   :  { %v544_v2 = vadd.f32 1.0, %v3080_v63 }
 0xc64   :  { %3081 = vrcp.f32 %v544_v2  ;;  %v556_v11 = vand.u32 2147483648, %v544_v2  ;;  %vm550_vm7 = vweird.f32 %v544_v2  ;;  %v554_v12 = vand.u32 2147483647, %v544_v2 }
 0xc66   :  { %v557_v14 = vor.u32 1.1754944e-38, %v556_v11  ;;  %vm555_vm9 = vcmp.eq.f32.partialorder %v554_v12, 8.507059e+37 }
 0xc6a   :  { %v3082_v3 = vpop.eup %3081 }
 0xc6b   :  { %v546_v4 = vmul.f32 %v3082_v3, %v544_v2  ;;  %vm551_vm6 = vweird.f32 %v3082_v3 }
 0xc6c   :  { %vm552_vm8 = vmor %vm550_vm7, %vm551_vm6 }
 0xc6d   :  { %v547_v5 = vsub.f32 1.0, %v546_v4 }
 0xc6f   :  { %v548_v6 = vmul.f32 %v3082_v3, %v547_v5 }
 0xc71   :  { %v549_v10 = vadd.f32 %v3082_v3, %v548_v6 }
 0xc73   :  { %v553_v13 = vsel %vm552_vm8, %v3082_v3, %v549_v10 }
 0xc74   :  { %v558_v16 = vsel %vm555_vm9, %v557_v14, %v553_v13 }
 0xc75   :  { %v560_v19 = vmul.f32 %v558_v16, %v513_v50 }
 0xcd2   :  { %v564_v15 = vpop.permute.xlu1 %563 }
 0xcd3   :  { %v566_v18 = vmul.f32 %v564_v15, %v558_v16 }
 0xcd5   :  { %568 = vrot.lane.b32.xlu2 %v566_v18, %s3213_s27 }
 0xd2f   :  { %v569_v20 = vpop.permute.xlu2 %568 }
 0xd30   :  { %v571_v21 = vadd.f32 %v569_v20, %v560_v19 }
 0xd32   :  { %3083 = vtanh.f32 %v571_v21 }
 0xd38   :  { %v3084_v22 = vpop.eup %3083 }
 0xd39   :  { %574 = vrot.lane.b32.xlu0 %v3084_v22, %s3213_s27 }
 0xdab   :  { %v575_v23 = vpop.permute.xlu0 %574 }
 0xdac   :  { %v577_v24 = vmul.f32 %v575_v23, %v558_v16  ;;  %v2937_v16 = vld [vmem:[%s4234_s0 + $0x20] sm:$0xff] }
 0xdad   :  { %715 = vmatpush.bf16.msra.mxu3 %v2937_v16  ;;  %v3025_v23 = vld [vmem:[%s4233_s1 + $0x2] ss:$0 sm:$0xff] }
 0xdae   :  { %v578_v25 = vpack.c.bf16 %v577_v24, %v577_v24 }
 0xdb0   :  { %580 = vrot.lane.b32.xlu1 %v578_v25, %s3215_s7 }
 0xe22   :  { %v581_v26 = vpop.permute.xlu1 %580 }
 0xe23   :  { %2814 = vmatmul.msk.bf16.vlgmr.msrb.gmra.mxu1 %vm179_vm0, %v581_v26 }
 0xea0   :  { %v594_v27 = vpop.f32.mrf.mxu1 }
 0xea1   :  { %v598_v28 = vadd.f32 %v594_v27, %v217_v7 }
 0xea3   :  { %3085 = vtanh.f32 %v598_v28  ;;  %v2815_v30 = vmul.f32 -1.442695, %v598_v28 }
 0xea5   :  { %3087 = vpow2.f32 %v2815_v30 }
 0xea8   :  { %v596_v29 = vpop.f32.mrf.mxu1 }
 0xea9   :  { %v3086_v9 = vpop.eup %3085 }
 0xeaa   :  { %621 = vrot.lane.b32.xlu2 %v3086_v9, %s3214_s6 }
 0xeab   :  { %v3088_v31 = vpop.eup %3087 }
 0xeac   :  { %v602_v8 = vadd.f32 1.0, %v3088_v31 }
 0xeae   :  { %3089 = vrcp.f32 %v602_v8  ;;  %v614_v36 = vand.u32 2147483648, %v602_v8  ;;  %vm608_vm11 = vweird.f32 %v602_v8  ;;  %v612_v44 = vand.u32 2147483647, %v602_v8 }
 0xeb0   :  { %v615_v38 = vor.u32 1.1754944e-38, %v614_v36  ;;  %vm613_vm13 = vcmp.eq.f32.partialorder %v612_v44, 8.507059e+37 }
 0xeb4   :  { %v3090_v17 = vpop.eup %3089 }
 0xeb5   :  { %v604_v32 = vmul.f32 %v3090_v17, %v602_v8  ;;  %vm609_vm10 = vweird.f32 %v3090_v17 }
 0xeb6   :  { %vm610_vm12 = vmor %vm608_vm11, %vm609_vm10  ;;  %vm915_vm11 = vcmask 64512  }
 0xeb7   :  { %v605_v33 = vsub.f32 1.0, %v604_v32 }
 0xeb9   :  { %v606_v34 = vmul.f32 %v3090_v17, %v605_v33 }
 0xebb   :  { %v607_v35 = vadd.f32 %v3090_v17, %v606_v34 }
 0xebd   :  { %v611_v37 = vsel %vm610_vm12, %v3090_v17, %v607_v35 }
 0xebe   :  { %v616_v40 = vsel %vm613_vm13, %v615_v38, %v611_v37 }
 0xebf   :  { %v618_v42 = vmul.f32 %v616_v40, %v571_v21  ;;  %v746_v21 = vld [vmem:[%s4233_s1 + $0x70] sm:$0xff] }
 0xf04   :  { %v622_v39 = vpop.permute.xlu2 %621 }
 0xf05   :  { %v624_v41 = vmul.f32 %v622_v39, %v616_v40 }
 0xf07   :  { %626 = vrot.lane.b32.xlu0 %v624_v41, %s3213_s27  ;;  %v2938_v41 = vld [vmem:[%s4234_s0 + $0x28] sm:$0xff] }
 0xf08   :  { %775 = vmatpush.bf16.msra.mxu1 %v2938_v41 }
 0xf79   :  { %v627_v43 = vpop.permute.xlu0 %626 }
 0xf7a   :  { %v629_v46 = vadd.f32 %v627_v43, %v618_v42 }
 0xf7c   :  { %3091 = vtanh.f32 %v629_v46 }
 0xf82   :  { %v3092_v48 = vpop.eup %3091 }
 0xf83   :  { %632 = vrot.lane.b32.xlu1 %v3092_v48, %s3213_s27 }
 0xff5   :  { %v633_v49 = vpop.permute.xlu1 %632 }
 0xff6   :  { %v635_v50 = vmul.f32 %v633_v49, %v616_v40 }
 0xff8   :  { %v636_v51 = vpack.c.bf16 %v635_v50, %v635_v50  ;;  %v3428_v50 = vld [vmem:[%s4233_s1 + $0x58] sm:$0xff] }
 0xffa   :  { %638 = vrot.lane.b32.xlu2 %v636_v51, %s3215_s7  ;;  %v3217_v51 = vmov 2  }
 0xffb   :  { %2980 = vset.pattern.permute.xlu1 %v3217_v51  ;;  %v3506_v51 = vld [vmem:[%s4233_s1 + $0xd] ss:$0 sm:$0xff] }
0x1054   :  { %v639_v52 = vpop.permute.xlu2 %638 }
0x1055   :  { %2816 = vmatmul.msk.bf16.vlgmr.msra.gmra.mxu2 %vm179_vm0, %v639_v52  ;;  %v3026_v52 = vld [vmem:[%s4233_s1 + $0x3] ss:$0 sm:$0xff] }
0x10d8   :  { %v652_v54 = vpop.f32.mrf.mxu2 }
0x10d9   :  { %v656_v55 = vadd.f32 %v652_v54, %v219_v53 }
0x10db   :  { %3093 = vtanh.f32 %v656_v55  ;;  %v2817_v58 = vmul.f32 -1.442695, %v656_v55 }
0x10dd   :  { %3095 = vpow2.f32 %v2817_v58 }
0x10e0   :  { %v654_v56 = vpop.f32.mrf.mxu2 }
0x10e1   :  { %v3094_v57 = vpop.eup %3093 }
0x10e2   :  { %679 = vrot.lane.b32.xlu0 %v3094_v57, %s3214_s6  ;;  %v3219_v57 = vmov 3  }
0x10e3   :  { %v3096_v59 = vpop.eup %3095  ;;  %2981 = vset.pattern.permute.xlu2 %v3219_v57  ;;  %v3519_v57 = vld [vmem:[%s4233_s1 + $0x10] sm:$0xff] }
0x10e4   :  { %v660_v60 = vadd.f32 1.0, %v3096_v59 }
0x10e6   :  { %3097 = vrcp.f32 %v660_v60  ;;  %v672_v4 = vand.u32 2147483648, %v660_v60  ;;  %vm666_vm15 = vweird.f32 %v660_v60  ;;  %v670_v45 = vand.u32 2147483647, %v660_v60 }
0x10e8   :  { %v673_v5 = vor.u32 1.1754944e-38, %v672_v4  ;;  %vm671_vm2 = vcmp.eq.f32.partialorder %v670_v45, 8.507059e+37  ;;  %v3463_v4 = vld [vmem:[%s4233_s1 + $0xb] ss:$0 sm:$0xff] }
0x10ec   :  { %v3098_v61 = vpop.eup %3097 }
0x10ed   :  { %v662_v62 = vmul.f32 %v3098_v61, %v660_v60  ;;  %vm667_vm14 = vweird.f32 %v3098_v61 }
0x10ee   :  { %vm668_vm1 = vmor %vm666_vm15, %vm667_vm14 }
0x10ef   :  { %v663_v63 = vsub.f32 1.0, %v662_v62  ;;  %v3447_v62 = vld [vmem:[%s4234_s0 + $0x18] sm:$0xff] }
0x10f0   :  { %833 = vmatpush.bf16.msrb.mxu2 %v3447_v62 }
0x10f1   :  { %v664_v2 = vmul.f32 %v3098_v61, %v663_v63  ;;  %v3453_v63 = vld [vmem:[%s4233_s1 + $0x9] ss:$0 sm:$0xff] }
0x10f3   :  { %v665_v3 = vadd.f32 %v3098_v61, %v664_v2 }
0x10f5   :  { %v669_v47 = vsel %vm668_vm1, %v3098_v61, %v665_v3  ;;  %v3441_v61 = vld [vmem:[%s4234_s0 + $0x10] sm:$0xff]  ;;  %v3458_v3 = vld [vmem:[%s4233_s1 + $0xa] ss:$0 sm:$0xff] }
0x10f6   :  { %v674_v10 = vsel %vm671_vm2, %v673_v5, %v669_v47  ;;  %855 = vmatpush.bf16.msrb.mxu3 %v3441_v61  ;;  %v3469_v47 = vld [vmem:[%s4233_s1 + $0xc] ss:$0 sm:$0xff] }
0x10f7   :  { %v676_v12 = vmul.f32 %v674_v10, %v629_v46 }
0x1154   :  { %v680_v6 = vpop.permute.xlu0 %679 }
0x1155   :  { %v682_v11 = vmul.f32 %v680_v6, %v674_v10  ;;  %v805_v6 = vmul.f32 0.0, %v3463_v4 }
0x1157   :  { %684 = vrot.lane.b32.xlu1 %v682_v11, %s3213_s27  ;;  %v808_v11 = vmul.f32 0.0, %v3469_v47 }
0x115f   :  { %748 = vrot.lane.b32.xlu1 %v746_v21, %s3213_s27 }
0x1167   :  { %791 = vperm.xlu1 %2980, %v3428_v50  }
0x11c9   :  { %v685_v13 = vpop.permute.xlu1 %684 }
0x11ca   :  { %v687_v14 = vadd.f32 %v685_v13, %v676_v12  ;;  %v3477_v13 = vld [vmem:[%s4233_s1 + $0x4] ss:$0 sm:$0xff] }
0x11cc   :  { %3099 = vtanh.f32 %v687_v14 }
0x11d1   :  { %v749_v38 = vpop.permute.xlu1 %748 }
0x11d2   :  { %v3100_v15 = vpop.eup %3099 }
0x11d3   :  { %690 = vrot.lane.b32.xlu2 %v3100_v15, %s3213_s27 }
0x11d9   :  { %v792_v2 = vpop.permute.xlu1 %791 }
0x11da   :  { %v795_v45 = vmul.f32 %v3453_v63, %v792_v2  ;;  %v3220_v2 = vmov 1.0  }
0x122d   :  { %v691_v18 = vpop.permute.xlu2 %690 }
0x122e   :  { %v3407_v19 = vmul.f32 %v691_v18, %v674_v10 }
0x1230   :  { %v694_v20 = vpack.c.bf16 %v3407_v19, %v3407_v19 }
0x1232   :  { %697 = vrot.lane.b32.xlu0 %v694_v20, %s3215_s7 }
0x12a4   :  { %v698_v22 = vpop.permute.xlu0 %697 }
0x12a5   :  { %2822 = vmatmul.msk.bf16.vlgmr.msra.gmra.mxu3 %vm179_vm0, %v698_v22 }
0x1328   :  { %v717_v24 = vpop.f32.mrf.mxu3 }
0x1329   :  { %v718_v25 = vadd.f32 %v3025_v23, %v717_v24  ;;  %v3485_v23 = vld [vmem:[%s4233_s1 + $0x1] ss:$0 sm:$0xff] }
0x132b   :  { %v2823_v26 = vmul.f32 -1.442695, %v718_v25 }
0x132d   :  { %3101 = vpow2.f32 %v2823_v26 }
0x1330   :  { %v719_v7 = vpop.f32.mrf.mxu3 }
0x1333   :  { %v3102_v27 = vpop.eup %3101 }
0x1334   :  { %v726_v28 = vadd.f32 1.0, %v3102_v27 }
0x1336   :  { %3103 = vrcp.f32 %v726_v28  ;;  %v738_v31 = vand.u32 2147483648, %v726_v28  ;;  %v736_v17 = vand.u32 2147483647, %v726_v28  ;;  %vm732_vm4 = vweird.f32 %v726_v28 }
0x1338   :  { %v739_v33 = vor.u32 1.1754944e-38, %v738_v31  ;;  %vm737_vm6 = vcmp.eq.f32.partialorder %v736_v17, 8.507059e+37 }
0x133c   :  { %v3104_v29 = vpop.eup %3103 }
0x133d   :  { %v728_v9 = vmul.f32 %v3104_v29, %v726_v28  ;;  %vm733_vm3 = vweird.f32 %v3104_v29 }
0x133e   :  { %vm734_vm5 = vmor %vm732_vm4, %vm733_vm3 }
0x133f   :  { %v729_v30 = vsub.f32 1.0, %v728_v9 }
0x1341   :  { %v730_v8 = vmul.f32 %v3104_v29, %v729_v30 }
0x1343   :  { %v731_v32 = vadd.f32 %v3104_v29, %v730_v8 }
0x1345   :  { %v735_v34 = vsel %vm734_vm5, %v3104_v29, %v731_v32 }
0x1346   :  { %v740_v35 = vsel %vm737_vm6, %v739_v33, %v735_v34 }
0x1347   :  { %v742_v36 = vmul.f32 0.5, %v740_v35 }
0x1349   :  { %v743_v44 = vmul.f32 0.5, %v742_v36 }
0x134b   :  { %v744_v37 = vmul.f32 1.442695, %v743_v44 }
0x134d   :  { %3105 = vpow2.f32 %v744_v37 }
0x134e   :  { %3107 = vtanh.f32 %v718_v25 }
0x1353   :  { %v3106_v39 = vpop.eup %3105 }
0x1354   :  { %v751_v40 = vmul.f32 %v3106_v39, %v749_v38  ;;  %v3108_v42 = vpop.eup %3107 }
0x1355   :  { %v722_v43 = vmul.f32 4.0, %v3108_v42 }
0x1356   :  { %753 = vrot.lane.b32.xlu2 %v751_v40, %s3216_s22 }
0x135e   :  { %798 = vperm.xlu2 %2981, %v3428_v50  }
0x1366   :  { %2982 = vset.pattern.permute.xlu2 %v3212_v1 }
0x13b0   :  { %v754_v46 = vpop.permute.xlu2 %753 }
0x13b1   :  { %v756_v48 = vadd.f32 %v754_v46, %v722_v43  ;;  %v3499_v43 = vld [vmem:[%s4234_s0 + $0x78] sm:$0xff] }
0x13b2   :  { %962 = vmatpush.bf16.msrb.mxu1 %v3499_v43 }
0x13b3   :  { %v757_v49 = vpack.c.bf16 %v756_v48, %v756_v48 }
0x13b5   :  { %2828 = vmatmul.msk.bf16.vlgmr.msra.gmra.mxu1 %vm179_vm0, %v757_v49 }
0x13b6   :  { %1176 = vmatpush.bf16.msra.mxu1 %v3441_v61 }
0x13b8   :  { %v799_v5 = vpop.permute.xlu2 %798 }
0x13b9   :  { %v802_v10 = vmul.f32 %v3458_v3, %v799_v5 }
0x13bb   :  { %v803_v12 = vadd.f32 %v802_v10, %v795_v45 }
0x13bd   :  { %v806_v14 = vadd.f32 %v805_v6, %v803_v12 }
0x13bf   :  { %v809_v15 = vadd.f32 %v808_v11, %v806_v14 }
0x13c1   :  { %v811_v16 = vadd.f32 %v3477_v13, %v809_v15  ;;  %v3543_v15 = vld [vmem:[%s4234_s0 + $0x70] sm:$0xff] }
0x13c2   :  { %1061 = vmatpush.bf16.msra.mxu3 %v3543_v15 }
0x13c3   :  { %v812_v18 = vmax.f32 %v811_v16, 0.0  ;;  %v3549_v16 = vld [vmem:[%s4234_s0 + $0x68] sm:$0xff] }
0x13c6   :  { %1062 = vmatpush.bf16.msra.mxu3 %v3549_v16 }
0x1432   :  { %v777_v53 = vpop.f32.mrf.mxu1 }
0x1433   :  { %v778_v54 = vadd.f32 %v3026_v52, %v777_v53  ;;  %v3512_v53 = vld [vmem:[%s4233_s1 + $0xe] ss:$0 sm:$0xff] }
0x1435   :  { %v781_v55 = vmax.f32 %v778_v54, 0.0 }
0x1437   :  { %783 = vrot.lane.b32.xlu0 %v781_v55, %s3218_s30  ;;  %s3230_s30 = smov 122  }
0x143a   :  { %v779_v56 = vpop.f32.mrf.mxu1 }
0x14a9   :  { %v784_v58 = vpop.permute.xlu0 %783 }
0x14aa   :  { %v786_v59 = vadd.f32 %v784_v58, %v3407_v19  ;;  %v813_v19 = vpack.c.bf16 %v812_v18, %v812_v18  ;;  %v3556_v18 = vld [vmem:[%s4234_s0 + $0x60] sm:$0xff] }
0x14ab   :  { %1063 = vmatpush.bf16.msra.mxu3 %v3556_v18 }
0x14ac   :  { %v787_v60 = vpack.c.bf16 %v786_v59, %v786_v59  ;;  %2838 = vmatmul.msk.bf16.vlgmr.msrb.gmra.mxu3 %vm179_vm0, %v813_v19  ;;  %v3563_v19 = vld [vmem:[%s4234_s0 + $0x58] sm:$0xff] }
0x14ae   :  { %815 = vrot.lane.b32.xlu0 %v787_v60, %s3215_s7  ;;  %v3525_v60 = vld [vmem:[%s4234_s0 + $0x30] sm:$0xff] }
0x14af   :  { %1064 = vmatpush.bf16.msra.mxu3 %v3563_v19 }
0x1520   :  { %v816_v20 = vpop.permute.xlu0 %815 }
0x1521   :  { %2833 = vmatmul.msk.bf16.vlgmr.msrb.gmra.mxu2 %vm179_vm0, %v816_v20  ;;  %v3570_v20 = vld [vmem:[%s4234_s0 + $0x50] sm:$0xff] }
0x1522   :  { %1065 = vmatpush.bf16.msra.mxu3 %v3570_v20 }
0x152f   :  { %v857_v21 = vpop.f32.mrf.mxu3 }
0x1537   :  { %v859_v22 = vpop.f32.mrf.mxu3 }
0x1538   :  { %v3585_v22 = vld [vmem:[%s4234_s0 + $0x40] sm:$0xff] }
0x15a4   :  { %v835_v24 = vpop.f32.mrf.mxu2 }
0x15a5   :  { %v858_v25 = vadd.f32 %v857_v21, %v835_v24  ;;  %v3578_v21 = vld [vmem:[%s4234_s0 + $0x48] sm:$0xff]  ;;  %v3592_v24 = vld [vmem:[%s4234_s0 + $0x38] sm:$0xff] }
0x15a6   :  { %1066 = vmatpush.bf16.msra.mxu3 %v3578_v21 }
0x15a7   :  { %v862_v26 = vadd.f32 %v3485_v23, %v858_v25  ;;  %v3036_v25 = vld [vmem:[%s4233_s1 + $0x5] ss:$0 sm:$0xff] }
0x15a9   :  { %3109 = vtanh.f32 %v862_v26  ;;  %v2839_v28 = vmul.f32 -1.442695, %v862_v26 }
0x15aa   :  { %1067 = vmatpush.bf16.msra.mxu3 %v3585_v22 }
0x15ab   :  { %3111 = vpow2.f32 %v2839_v28 }
0x15ac   :  { %v837_v7 = vpop.f32.mrf.mxu2 }
0x15ad   :  { %v3604_v7 = vld [vmem:[%s4233_s1 + $0xf] ss:$0 sm:$0xff] }
0x15ae   :  { %1068 = vmatpush.bf16.msra.mxu3 %v3592_v24 }
0x15af   :  { %v3110_v27 = vpop.eup %3109 }
0x15b0   :  { %885 = vrot.lane.b32.xlu1 %v3110_v27, %s3214_s6 }
0x15b1   :  { %v3112_v29 = vpop.eup %3111 }
0x15b2   :  { %v866_v9 = vadd.f32 1.0, %v3112_v29  ;;  %1325 = vmatpush.bf16.msrb.mxu3 %v3525_v60 }
0x15b4   :  { %3113 = vrcp.f32 %v866_v9  ;;  %v878_v33 = vand.u32 2147483648, %v866_v9  ;;  %vm872_vm8 = vweird.f32 %v866_v9  ;;  %v876_v34 = vand.u32 2147483647, %v866_v9 }
0x15b6   :  { %v879_v36 = vor.u32 1.1754944e-38, %v878_v33  ;;  %vm877_vm10 = vcmp.eq.f32.partialorder %v876_v34, 8.507059e+37 }
0x15ba   :  { %v3114_v30 = vpop.eup %3113 }
0x15bb   :  { %v868_v31 = vmul.f32 %v3114_v30, %v866_v9  ;;  %vm873_vm7 = vweird.f32 %v3114_v30 }
0x15bc   :  { %vm874_vm9 = vmor %vm872_vm8, %vm873_vm7 }
0x15bd   :  { %v869_v8 = vsub.f32 1.0, %v868_v31 }
0x15bf   :  { %v870_v17 = vmul.f32 %v3114_v30, %v869_v8 }
0x15c1   :  { %v871_v32 = vadd.f32 %v3114_v30, %v870_v17 }
0x15c3   :  { %v875_v35 = vsel %vm874_vm9, %v3114_v30, %v871_v32  ;;  %v3610_v30 = vld [vmem:[%s4234_s0 + $0x88] sm:$0xff]  }
0x15c4   :  { %v880_v37 = vsel %vm877_vm10, %v879_v36, %v875_v35  ;;  %v994_v17 = vunpack.c.l.bf16 %v3610_v30 }
0x15c5   :  { %v882_v39 = vmul.f32 0.0, %v880_v37 }
0x1622   :  { %v886_v44 = vpop.permute.xlu1 %885 }
0x1623   :  { %v888_v38 = vmul.f32 %v886_v44, %v880_v37  ;;  %v3221_v44 = vmov 17  }
0x1624   :  { %2984 = vset.pattern.permute.xlu1 %v3221_v44 }
0x1625   :  { %890 = vrot.lane.b32.xlu2 %v888_v38, %s3213_s27  ;;  %v3223_v38 = vmov 18  }
0x162d   :  { %902 = vperm.xlu2 %2982, %v3428_v50  }
0x1635   :  { %1100 = vrot.lane.b32.xlu2 %v3036_v25, %s3213_s27 }
0x1636   :  { %2985 = vset.pattern.permute.xlu2 %v3223_v38 }
0x167f   :  { %v891_v40 = vpop.permute.xlu2 %890 }
0x1680   :  { %v3491_v41 = vadd.f32 %v891_v40, %v882_v39 }
0x1682   :  { %3115 = vtanh.f32 %v3491_v41 }
0x1687   :  { %v903_v52 = vpop.permute.xlu2 %902 }
0x1688   :  { %v3116_v42 = vpop.eup %3115  ;;  %v906_v54 = vmul.f32 %v3506_v51, %v903_v52 }
0x1689   :  { %896 = vrot.lane.b32.xlu0 %v3116_v42, %s3213_s27 }
0x168f   :  { %v3616_v42 = vpop.permute.xlu2 %1100 }
0x1691   :  { %908 = vperm.xlu0 %2979, %v3428_v50  }
0x16fb   :  { %v897_v46 = vpop.permute.xlu0 %896 }
0x16fc   :  { %v899_v48 = vmul.f32 %v897_v46, %v880_v37  ;;  %v3222_v37 = vmov 16  }
0x16fd   :  { %2983 = vset.pattern.permute.xlu0 %v3222_v37 }
0x16fe   :  { %v900_v49 = vpack.c.bf16 %v899_v48, %v899_v48 }
0x1700   :  { %944 = vrot.lane.b32.xlu1 %v900_v49, %s3215_s7 }
0x1703   :  { %v909_v55 = vpop.permute.xlu0 %908 }
0x1704   :  { %v912_v56 = vmul.f32 %v3512_v53, %v909_v55  ;;  %v3224_v55 = vmov 19  }
0x1706   :  { %v913_v58 = vadd.f32 %v912_v56, %v906_v54 }
0x1708   :  { %v914_v59 = vmul.f32 %v913_v58, %v3519_v57 }
0x170a   :  { %934 = vmatpush.msrb.mxu0 %v914_v59 }
0x170b   :  { %2840 = vmatmul.msk.f32.vlgmr.msrb.gmra.mxu0 %vm915_vm11, %v3220_v2 }
0x170c   :  { %1087 = vmatpush.bf16.msra.mxu0 %v3525_v60 }
0x1772   :  { %v945_v45 = vpop.permute.xlu1 %944 }
0x1773   :  { %2845 = vmatmul.msk.bf16.vlgmr.msrb.gmra.mxu1 %vm179_vm0, %v945_v45  ;;  %2883 = vmatmul.msk.bf16.vlgmr.msra.gmra.mxu0 %vm179_vm0, %v945_v45 }
0x1774   :  { %1305 = vmatpush.bf16.msrb.mxu1 %v3543_v15 }
0x1778   :  { %1306 = vmatpush.bf16.msrb.mxu1 %v3549_v16 }
0x177c   :  { %1307 = vmatpush.bf16.msrb.mxu1 %v3556_v18 }
0x1780   :  { %1308 = vmatpush.bf16.msrb.mxu1 %v3563_v19 }
0x1784   :  { %1309 = vmatpush.bf16.msrb.mxu1 %v3570_v20 }
0x1788   :  { %v936_v5 = vpop.f32.mrf.mxu0  ;;  %1310 = vmatpush.bf16.msrb.mxu1 %v3578_v21 }
0x1789   :  { %v939_v26 = vsub.f32 %v913_v58, %v936_v5 }
0x178b   :  { %v941_v27 = vadd.f32 %v3604_v7, %v939_v26 }
0x178c   :  { %1311 = vmatpush.bf16.msrb.mxu1 %v3585_v22 }
0x178d   :  { %v942_v28 = vmax.f32 %v941_v27, 0.0 }
0x1790   :  { %1312 = vmatpush.bf16.msrb.mxu1 %v3592_v24 }
0x17f0   :  { %v964_v6 = vpop.f32.mrf.mxu1  ;;  %v1089_v10 = vpop.f32.mrf.mxu0 }
0x17f1   :  { %v968_v11 = vmul.f32 %v964_v6, %v3519_v57  ;;  %1094 = vrot.lane.b32.xlu1 %v1089_v10, %s3213_s27 }
0x17f3   :  { %984 = vmatpush.msra.mxu2 %v968_v11 }
0x17f4   :  { %2846 = vmatmul.msk.f32.vlgmr.msra.gmra.mxu2 %vm915_vm11, %v3220_v2 }
0x17f5   :  { %1160 = vmatpush.bf16.msrb.mxu2 %v3447_v62 }
0x17f8   :  { %v966_v12 = vpop.f32.mrf.mxu1  ;;  %v1091_v14 = vpop.f32.mrf.mxu0 }
0x17f9   :  { %1270 = vmatpush.bf16.msra.mxu2 %v3499_v43 }
0x17fc   :  { %2884 = vmatmul.msk.bf16.vlgmr.msrb.gmra.mxu2 %vm179_vm0, %v945_v45 }
0x17fd   :  { %1409 = vmatpush.bf16.msrb.mxu2 %v3441_v61 }
0x1863   :  { %v1095_v39 = vpop.permute.xlu1 %1094 }
0x1877   :  { %v986_v29 = vpop.f32.mrf.mxu2 }
0x1878   :  { %v989_v9 = vadd.f32 %v986_v29, %v942_v28 }
0x187a   :  { %v990_v31 = vmax.f32 %v989_v9, 0.0 }
0x187c   :  { %v992_v8 = vpack.c.bf16 %v990_v31, %v990_v31 }
0x187e   :  { %v993_v32 = vunpack.c.l.bf16 %v992_v8 }
0x187f   :  { %v1162_v33 = vpop.f32.mrf.mxu2 }
0x1880   :  { %v995_v34 = vmul.f32 %v994_v17, %v993_v32 }
0x1882   :  { %v996_v35 = vpack.c.bf16 %v995_v34, %v995_v34  ;;  %v1108_v34 = vld [vmem:[%s4233_s1 + $0x78] sm:$0xff] }
0x1884   :  { %1069 = vmatmul.bf16.vlgmr.msra.gmra.mxu3 %v996_v35 }
0x1887   :  { %v1164_v36 = vpop.f32.mrf.mxu2 }
0x1907   :  { %v1070_v40 = vpop.f32.mrf.mxu3 }
0x1908   :  { %v1097_v46 = vadd.f32 %v1095_v39, %v1070_v40 }
0x190a   :  { %v3619_v48 = vadd.f32 %v3616_v42, %v1097_v46 }
0x190c   :  { %1132 = vperm.xlu1 %2984, %v3619_v48   ;;  %1126 = vperm.xlu0 %2983, %v3619_v48   ;;  %v1104_v49 = vmax.f32 %v3619_v48, -9.0 }
0x190e   :  { %v3624_v52 = vmin.f32 %v1104_v49, 4.0 }
0x190f   :  { %v1072_v54 = vpop.f32.mrf.mxu3 }
0x1910   :  { %1139 = vperm.xlu2 %2985, %v3624_v52  }
0x1914   :  { %2986 = vset.pattern.permute.xlu1 %v3224_v55  ;;  %2987 = vset.pattern.permute.xlu0 %v3212_v1 }
0x1915   :  { %1145 = vperm.xlu1 %2986, %v3624_v52  }
0x1918   :  { %2990 = vset.pattern.permute.xlu2 %v3221_v44 }
0x191d   :  { %2988 = vset.pattern.permute.xlu1 %v3211_v0 }
0x196a   :  { %v1140_v6 = vpop.permute.xlu2 %1139 }
0x196b   :  { %v1142_v11 = vmul.f32 %v3463_v4, %v1140_v6 }
0x197e   :  { %v1133_v56 = vpop.permute.xlu1 %1132  ;;  %v1127_v58 = vpop.permute.xlu0 %1126 }
0x197f   :  { %v1129_v59 = vmul.f32 %v3453_v63, %v1127_v58  ;;  %v1135_v5 = vmul.f32 %v3458_v3, %v1133_v56 }
0x1981   :  { %v1130_v45 = vadd.f32 %v1129_v59, %v1070_v40 }
0x1983   :  { %v1136_v10 = vadd.f32 %v1135_v5, %v1130_v45 }
0x1985   :  { %v1143_v14 = vadd.f32 %v1142_v11, %v1136_v10 }
0x1987   :  { %v1146_v12 = vpop.permute.xlu1 %1145 }
0x1988   :  { %v1148_v25 = vmul.f32 %v3469_v47, %v1146_v12 }
0x198a   :  { %v1149_v26 = vadd.f32 %v1148_v25, %v1143_v14  ;;  %v1106_v25 = vmul.f32 1.442695, %v3624_v52 }
0x198c   :  { %v1150_v27 = vadd.f32 %v3477_v13, %v1149_v26 }
0x198e   :  { %v1151_v28 = vmax.f32 %v1150_v27, 0.0 }
0x1990   :  { %v1152_v29 = vpack.c.bf16 %v1151_v28, %v1151_v28 }
0x1992   :  { %2885 = vmatmul.msk.bf16.vlgmr.msra.gmra.mxu1 %vm179_vm0, %v1152_v29 }
0x1993   :  { %1538 = vmatpush.bf16.msra.mxu1 %v3543_v15 }
0x1997   :  { %1539 = vmatpush.bf16.msra.mxu1 %v3549_v16 }
0x199b   :  { %1540 = vmatpush.bf16.msra.mxu1 %v3556_v18 }
0x199f   :  { %1541 = vmatpush.bf16.msra.mxu1 %v3563_v19 }
0x19a3   :  { %1542 = vmatpush.bf16.msra.mxu1 %v3570_v20 }
0x19a7   :  { %1543 = vmatpush.bf16.msra.mxu1 %v3578_v21 }
0x19ab   :  { %1544 = vmatpush.bf16.msra.mxu1 %v3585_v22 }
0x19af   :  { %1545 = vmatpush.bf16.msra.mxu1 %v3592_v24 }
0x1a0f   :  { %v1178_v9 = vpop.f32.mrf.mxu1 }
0x1a10   :  { %v1179_v31 = vadd.f32 %v1178_v9, %v1162_v33 }
0x1a12   :  { %v1182_v8 = vadd.f32 %v3485_v23, %v1179_v31 }
0x1a14   :  { %3117 = vtanh.f32 %v1182_v8  ;;  %v2886_v35 = vmul.f32 -1.442695, %v1182_v8 }
0x1a16   :  { %3119 = vpow2.f32 %v2886_v35 }
0x1a17   :  { %v1180_v17 = vpop.f32.mrf.mxu1 }
0x1a1a   :  { %v3118_v32 = vpop.eup %3117 }
0x1a1b   :  { %1205 = vrot.lane.b32.xlu2 %v3118_v32, %s3214_s6 }
0x1a1c   :  { %v3120_v36 = vpop.eup %3119 }
0x1a1d   :  { %v1186_v39 = vadd.f32 1.0, %v3120_v36 }
0x1a1f   :  { %3121 = vrcp.f32 %v1186_v39  ;;  %v1198_v56 = vand.u32 2147483648, %v1186_v39  ;;  %vm1192_vm13 = vweird.f32 %v1186_v39  ;;  %v1196_v58 = vand.u32 2147483647, %v1186_v39 }
0x1a21   :  { %v1199_v45 = vor.u32 1.1754944e-38, %v1198_v56  ;;  %vm1197_vm15 = vcmp.eq.f32.partialorder %v1196_v58, 8.507059e+37 }
0x1a23   :  { %1110 = vrot.lane.b32.xlu2 %v1108_v34, %s3225_s5 }
0x1a25   :  { %v3122_v33 = vpop.eup %3121 }
0x1a26   :  { %v1188_v40 = vmul.f32 %v3122_v33, %v1186_v39  ;;  %vm1193_vm12 = vweird.f32 %v3122_v33 }
0x1a27   :  { %vm1194_vm14 = vmor %vm1192_vm13, %vm1193_vm12 }
0x1a28   :  { %v1189_v46 = vsub.f32 1.0, %v1188_v40 }
0x1a2a   :  { %v1190_v49 = vmul.f32 %v3122_v33, %v1189_v46 }
0x1a2c   :  { %v1191_v54 = vadd.f32 %v3122_v33, %v1190_v49 }
0x1a2e   :  { %v1195_v59 = vsel %vm1194_vm14, %v3122_v33, %v1191_v54 }
0x1a2f   :  { %v1200_v6 = vsel %vm1197_vm15, %v1199_v45, %v1195_v59 }
0x1a30   :  { %v1202_v11 = vmul.f32 %v1200_v6, %v3491_v41 }
0x1a75   :  { %v1206_v5 = vpop.permute.xlu2 %1205 }
0x1a76   :  { %v1208_v10 = vmul.f32 %v1206_v5, %v1200_v6 }
0x1a78   :  { %1210 = vrot.lane.b32.xlu0 %v1208_v10, %s3213_s27 }
0x1a7d   :  { %v1111_v27 = vpop.permute.xlu2 %1110 }
0x1aea   :  { %v1211_v12 = vpop.permute.xlu0 %1210 }
0x1aeb   :  { %v3654_v14 = vadd.f32 %v1211_v12, %v1202_v11 }
0x1aed   :  { %3123 = vtanh.f32 %v3654_v14 }
0x1aee   :  { %3125 = vpow2.f32 %v1106_v25  ;;  %v1302_v25 = vunpack.c.h.bf16 %v3610_v30 }
0x1af3   :  { %v3124_v26 = vpop.eup %3123 }
0x1af4   :  { %1216 = vrot.lane.b32.xlu1 %v3124_v26, %s3213_s27  ;;  %v3126_v28 = vpop.eup %3125 }
0x1af5   :  { %v1113_v29 = vmul.f32 %v3126_v28, %v1111_v27 }
0x1afc   :  { %1115 = vrot.lane.b32.xlu1 %v1113_v29, %s3226_s8 }
0x1b66   :  { %v1217_v9 = vpop.permute.xlu1 %1216 }
0x1b67   :  { %v1219_v31 = vmul.f32 %v1217_v9, %v1200_v6 }
0x1b69   :  { %v1220_v41 = vpack.c.bf16 %v1219_v31, %v1219_v31 }
0x1b6b   :  { %1258 = vrot.lane.b32.xlu0 %v1220_v41, %s3215_s7 }
0x1b6e   :  { %v1116_v8 = vpop.permute.xlu1 %1115 }
0x1b6f   :  { %v1118_v17 = vadd.f32 %v1116_v8, %v3619_v48 }
0x1b71   :  { %1120 = vrot.lane.b32.xlu2 %v1118_v17, %s3216_s22 }
0x1bcb   :  { %v3663_v52 = vpop.permute.xlu2 %1120 }
0x1bcc   :  { %v3667_v32 = vadd.f32 %v3663_v52, %v3428_v50 }
0x1bce   :  { %1228 = vperm.xlu1 %2988, %v3667_v32   ;;  %1223 = vperm.xlu0 %2987, %v3667_v32  }
0x1bd6   :  { %2989 = vset.pattern.permute.xlu1 %v3222_v37  ;;  %2991 = vset.pattern.permute.xlu0 %v3223_v38 }
0x1bdd   :  { %v1259_v34 = vpop.permute.xlu0 %1258 }
0x1bde   :  { %2888 = vmatmul.msk.bf16.vlgmr.msra.gmra.mxu2 %vm179_vm0, %v1259_v34  ;;  %2890 = vmatmul.msk.bf16.vlgmr.msrb.gmra.mxu3 %vm179_vm0, %v1259_v34 }
0x1c40   :  { %v1229_v48 = vpop.permute.xlu1 %1228  ;;  %v1224_v35 = vpop.permute.xlu0 %1223 }
0x1c41   :  { %v1231_v36 = vmul.f32 %v3512_v53, %v1229_v48  ;;  %v1226_v50 = vmul.f32 %v3506_v51, %v1224_v35  ;;  %v1341_v35 = vld [vmem:[%s4233_s1 + $0x80] sm:$0xff] }
0x1c43   :  { %v1232_v39 = vadd.f32 %v1231_v36, %v1226_v50 }
0x1c45   :  { %v1233_v33 = vmul.f32 %v1232_v39, %v3519_v57 }
0x1c47   :  { %1249 = vmatpush.msrb.mxu0 %v1233_v33 }
0x1c48   :  { %2887 = vmatmul.msk.f32.vlgmr.msrb.gmra.mxu0 %vm915_vm11, %v3220_v2 }
0x1c61   :  { %v1272_v40 = vpop.f32.mrf.mxu2  ;;  %v1327_v46 = vpop.f32.mrf.mxu3 }
0x1c62   :  { %v1276_v49 = vmul.f32 %v1272_v40, %v3519_v57  ;;  %1332 = vrot.lane.b32.xlu2 %v1327_v46, %s3213_s27 }
0x1c64   :  { %1292 = vmatpush.msra.mxu0 %v1276_v49 }
0x1c65   :  { %2889 = vmatmul.msk.f32.vlgmr.msra.gmra.mxu0 %vm915_vm11, %v3220_v2 }
0x1c66   :  { %1393 = vmatpush.bf16.msrb.mxu0 %v3447_v62 }
0x1c69   :  { %v1274_v54 = vpop.f32.mrf.mxu2  ;;  %v1329_v56 = vpop.f32.mrf.mxu3 }
0x1c6a   :  { %1503 = vmatpush.bf16.msra.mxu0 %v3499_v43 }
0x1c6d   :  { %2891 = vmatmul.msk.bf16.vlgmr.msrb.gmra.mxu0 %vm179_vm0, %v1259_v34 }
0x1c6e   :  { %1642 = vmatpush.bf16.msrb.mxu0 %v3441_v61 }
0x1cbc   :  { %v1333_v31 = vpop.permute.xlu2 %1332 }
0x1cc5   :  { %v1251_v58 = vpop.f32.mrf.mxu0 }
0x1cc6   :  { %v1254_v59 = vsub.f32 %v1232_v39, %v1251_v58 }
0x1cc8   :  { %v1255_v45 = vadd.f32 %v3604_v7, %v1254_v59 }
0x1cca   :  { %v1256_v5 = vmax.f32 %v1255_v45, 0.0 }
0x1ce2   :  { %v1294_v6 = vpop.f32.mrf.mxu0 }
0x1ce3   :  { %v1297_v10 = vadd.f32 %v1294_v6, %v1256_v5 }
0x1ce5   :  { %v1298_v11 = vmax.f32 %v1297_v10, 0.0 }
0x1ce7   :  { %v1300_v12 = vpack.c.bf16 %v1298_v11, %v1298_v11 }
0x1ce9   :  { %v1301_v26 = vunpack.c.l.bf16 %v1300_v12 }
0x1cea   :  { %v1395_v27 = vpop.f32.mrf.mxu0 }
0x1ceb   :  { %v1303_v28 = vmul.f32 %v1302_v25, %v1301_v26 }
0x1ced   :  { %v1304_v29 = vpack.c.bf16 %v1303_v28, %v1303_v28 }
0x1cef   :  { %1313 = vmatmul.bf16.vlgmr.msrb.gmra.mxu1 %v1304_v29 }
0x1cf0   :  { %1859 = vmatpush.bf16.msrb.mxu1 %v3447_v62 }
0x1cf2   :  { %v1397_v9 = vpop.f32.mrf.mxu0 }
0x1d6c   :  { %v1314_v41 = vpop.f32.mrf.mxu1 }
0x1d6d   :  { %v1335_v8 = vadd.f32 %v1333_v31, %v1314_v41 }
0x1d6f   :  { %v3692_v17 = vadd.f32 %v1335_v8, %v3616_v42 }
0x1d71   :  { %1365 = vperm.xlu2 %2990, %v3692_v17   ;;  %1359 = vperm.xlu1 %2989, %v3692_v17   ;;  %v1337_v30 = vmax.f32 %v3692_v17, -9.0 }
0x1d73   :  { %v1338_v34 = vmin.f32 %v1337_v30, 4.0 }
0x1d74   :  { %v1316_v48 = vpop.f32.mrf.mxu1 }
0x1d75   :  { %1372 = vperm.xlu0 %2991, %v1338_v34  }
0x1d79   :  { %2992 = vset.pattern.permute.xlu1 %v3224_v55  ;;  %2994 = vset.pattern.permute.xlu2 %v3211_v0 }
0x1d7a   :  { %1378 = vperm.xlu1 %2992, %v1338_v34  }
0x1d7d   :  { %1343 = vrot.lane.b32.xlu0 %v1341_v35, %s3225_s5 }
0x1d82   :  { %2993 = vset.pattern.permute.xlu1 %v3212_v1 }
0x1dcb   :  { %v1366_v50 = vpop.permute.xlu2 %1365 }
0x1dcc   :  { %v1368_v40 = vmul.f32 %v3458_v3, %v1366_v50 }
0x1de3   :  { %v1360_v36 = vpop.permute.xlu1 %1359 }
0x1de4   :  { %v1362_v39 = vmul.f32 %v3453_v63, %v1360_v36 }
0x1de6   :  { %v1363_v33 = vadd.f32 %v1362_v39, %v1314_v41 }
0x1de7   :  { %v1373_v46 = vpop.permute.xlu0 %1372 }
0x1de8   :  { %v1369_v49 = vadd.f32 %v1368_v40, %v1363_v33  ;;  %v1375_v54 = vmul.f32 %v3463_v4, %v1373_v46 }
0x1dea   :  { %v1376_v58 = vadd.f32 %v1375_v54, %v1369_v49 }
0x1dec   :  { %v1379_v56 = vpop.permute.xlu1 %1378 }
0x1ded   :  { %v1381_v59 = vmul.f32 %v3469_v47, %v1379_v56 }
0x1def   :  { %v1382_v45 = vadd.f32 %v1381_v59, %v1376_v58  ;;  %v1339_v58 = vmul.f32 1.442695, %v1338_v34 }
0x1df1   :  { %v1383_v5 = vadd.f32 %v3477_v13, %v1382_v45  ;;  %v1344_v45 = vpop.permute.xlu0 %1343 }
0x1df3   :  { %v1384_v6 = vmax.f32 %v1383_v5, 0.0 }
0x1df5   :  { %v1385_v10 = vpack.c.bf16 %v1384_v6, %v1384_v6 }
0x1df7   :  { %2892 = vmatmul.msk.bf16.vlgmr.msrb.gmra.mxu2 %vm179_vm0, %v1385_v10 }
0x1e7a   :  { %v1411_v11 = vpop.f32.mrf.mxu2 }
0x1e7b   :  { %v1412_v12 = vadd.f32 %v1411_v11, %v1395_v27 }
0x1e7d   :  { %v1415_v25 = vadd.f32 %v3485_v23, %v1412_v12 }
0x1e7f   :  { %3127 = vtanh.f32 %v1415_v25  ;;  %v2893_v29 = vmul.f32 -1.442695, %v1415_v25 }
0x1e81   :  { %3129 = vpow2.f32 %v2893_v29 }
0x1e82   :  { %v1413_v26 = vpop.f32.mrf.mxu2 }
0x1e85   :  { %v3128_v28 = vpop.eup %3127 }
0x1e86   :  { %1438 = vrot.lane.b32.xlu2 %v3128_v28, %s3214_s6 }
0x1e87   :  { %v3130_v9 = vpop.eup %3129 }
0x1e88   :  { %v1419_v31 = vadd.f32 1.0, %v3130_v9 }
0x1e8a   :  { %3131 = vrcp.f32 %v1419_v31  ;;  %v1431_v36 = vand.u32 2147483648, %v1419_v31  ;;  %vm1425_vm2 = vweird.f32 %v1419_v31  ;;  %v1429_v27 = vand.u32 2147483647, %v1419_v31 }
0x1e8c   :  { %v1432_v39 = vor.u32 1.1754944e-38, %v1431_v36  ;;  %vm1430_vm4 = vcmp.eq.f32.partialorder %v1429_v27, 8.507059e+37 }
0x1e90   :  { %v3132_v41 = vpop.eup %3131 }
0x1e91   :  { %v1421_v8 = vmul.f32 %v3132_v41, %v1419_v31  ;;  %vm1426_vm1 = vweird.f32 %v3132_v41 }
0x1e92   :  { %vm1427_vm3 = vmor %vm1425_vm2, %vm1426_vm1 }
0x1e93   :  { %v1422_v30 = vsub.f32 1.0, %v1421_v8 }
0x1e95   :  { %v1423_v48 = vmul.f32 %v3132_v41, %v1422_v30 }
0x1e97   :  { %v1424_v35 = vadd.f32 %v3132_v41, %v1423_v48 }
0x1e99   :  { %v1428_v50 = vsel %vm1427_vm3, %v3132_v41, %v1424_v35 }
0x1e9a   :  { %v1433_v40 = vsel %vm1430_vm4, %v1432_v39, %v1428_v50 }
0x1e9b   :  { %v1435_v49 = vmul.f32 %v1433_v40, %v3654_v14 }
0x1ee0   :  { %v1439_v33 = vpop.permute.xlu2 %1438 }
0x1ee1   :  { %v1441_v46 = vmul.f32 %v1439_v33, %v1433_v40 }
0x1ee3   :  { %1443 = vrot.lane.b32.xlu1 %v1441_v46, %s3213_s27  ;;  %v3759_v46 = vld [vmem:[%s4234_s0 + $0x90] sm:$0xff]  }
0x1f55   :  { %v1444_v54 = vpop.permute.xlu1 %1443 }
0x1f56   :  { %v3714_v56 = vadd.f32 %v1444_v54, %v1435_v49 }
0x1f58   :  { %3133 = vtanh.f32 %v3714_v56 }
0x1f59   :  { %3135 = vpow2.f32 %v1339_v58 }
0x1f5e   :  { %v3134_v59 = vpop.eup %3133 }
0x1f5f   :  { %1449 = vrot.lane.b32.xlu2 %v3134_v59, %s3213_s27  ;;  %v3136_v5 = vpop.eup %3135 }
0x1f60   :  { %v1346_v6 = vmul.f32 %v3136_v5, %v1344_v45 }
0x1f67   :  { %1348 = vrot.lane.b32.xlu2 %v1346_v6, %s3226_s8 }
0x1fb9   :  { %v1450_v10 = vpop.permute.xlu2 %1449 }
0x1fba   :  { %v1452_v11 = vmul.f32 %v1450_v10, %v1433_v40 }
0x1fbc   :  { %v1453_v12 = vpack.c.bf16 %v1452_v11, %v1452_v11 }
0x1fbe   :  { %1491 = vrot.lane.b32.xlu1 %v1453_v12, %s3215_s7 }
0x1fc1   :  { %v1349_v14 = vpop.permute.xlu2 %1348 }
0x1fc2   :  { %v3721_v25 = vadd.f32 %v1349_v14, %v3692_v17 }
0x1fc4   :  { %1353 = vrot.lane.b32.xlu0 %v3721_v25, %s3216_s22 }
0x2030   :  { %v1492_v34 = vpop.permute.xlu1 %1491 }
0x2031   :  { %2895 = vmatmul.msk.bf16.vlgmr.msra.gmra.mxu0 %vm179_vm0, %v1492_v34 }
0x2032   :  { %1771 = vmatpush.bf16.msra.mxu0 %v3543_v15 }
0x2036   :  { %v1354_v26 = vpop.permute.xlu0 %1353  ;;  %1772 = vmatpush.bf16.msra.mxu0 %v3549_v16 }
0x2037   :  { %v3729_v28 = vadd.f32 %v1354_v26, %v3667_v32 }
0x2039   :  { %1461 = vperm.xlu2 %2994, %v3729_v28   ;;  %1456 = vperm.xlu1 %2993, %v3729_v28  }
0x203a   :  { %1773 = vmatpush.bf16.msra.mxu0 %v3556_v18 }
0x203e   :  { %1774 = vmatpush.bf16.msra.mxu0 %v3563_v19 }
0x2041   :  { %2996 = vset.pattern.permute.xlu2 %v3221_v44  ;;  %2995 = vset.pattern.permute.xlu1 %v3222_v37 }
0x2042   :  { %1775 = vmatpush.bf16.msra.mxu0 %v3570_v20 }
0x2046   :  { %1776 = vmatpush.bf16.msra.mxu0 %v3578_v21 }
0x204a   :  { %1777 = vmatpush.bf16.msra.mxu0 %v3585_v22 }
0x204e   :  { %1778 = vmatpush.bf16.msra.mxu0 %v3592_v24 }
0x2093   :  { %v1462_v32 = vpop.permute.xlu2 %1461 }
0x2094   :  { %v1464_v29 = vmul.f32 %v3512_v53, %v1462_v32 }
0x20ab   :  { %v1457_v17 = vpop.permute.xlu1 %1456 }
0x20ac   :  { %v1459_v9 = vmul.f32 %v3506_v51, %v1457_v17 }
0x20ae   :  { %v1465_v31 = vadd.f32 %v1464_v29, %v1459_v9  ;;  %v1505_v41 = vpop.f32.mrf.mxu0 }
0x20af   :  { %v1509_v8 = vmul.f32 %v1505_v41, %v3519_v57 }
0x20b0   :  { %v1466_v30 = vmul.f32 %v1465_v31, %v3519_v57 }
0x20b1   :  { %1525 = vmatpush.msra.mxu2 %v1509_v8 }
0x20b2   :  { %1482 = vmatpush.msra.mxu3 %v1466_v30  ;;  %2896 = vmatmul.msk.f32.vlgmr.msra.gmra.mxu2 %vm915_vm11, %v3220_v2 }
0x20b3   :  { %2894 = vmatmul.msk.f32.vlgmr.msra.gmra.mxu3 %vm915_vm11, %v3220_v2  ;;  %1626 = vmatpush.bf16.msrb.mxu2 %v3447_v62 }
0x20b4   :  { %1558 = vmatpush.bf16.msrb.mxu3 %v3525_v60 }
0x20b6   :  { %v1507_v48 = vpop.f32.mrf.mxu0 }
0x20b7   :  { %1736 = vmatpush.bf16.msra.mxu2 %v3499_v43 }
0x20ba   :  { %2898 = vmatmul.msk.bf16.vlgmr.msrb.gmra.mxu2 %vm179_vm0, %v1492_v34 }
0x20bb   :  { %2897 = vmatmul.msk.bf16.vlgmr.msrb.gmra.mxu3 %vm179_vm0, %v1492_v34  ;;  %1875 = vmatpush.bf16.msrb.mxu2 %v3441_v61  ;;  %v1535_v61 = vunpack.c.l.bf16 %v3759_v46 }
0x2135   :  { %v1527_v35 = vpop.f32.mrf.mxu2 }
0x2136   :  { %v1484_v36 = vpop.f32.mrf.mxu3 }
0x2137   :  { %v1487_v27 = vsub.f32 %v1465_v31, %v1484_v36 }
0x2139   :  { %v1488_v50 = vadd.f32 %v3604_v7, %v1487_v27 }
0x213b   :  { %v1489_v39 = vmax.f32 %v1488_v50, 0.0 }
0x213d   :  { %v1530_v33 = vadd.f32 %v1527_v35, %v1489_v39  ;;  %v1628_v40 = vpop.f32.mrf.mxu2 }
0x213e   :  { %v1560_v62 = vpop.f32.mrf.mxu3 }
0x213f   :  { %v1531_v49 = vmax.f32 %v1530_v33, 0.0  ;;  %1565 = vrot.lane.b32.xlu0 %v1560_v62, %s3213_s27 }
0x2141   :  { %v1533_v54 = vpack.c.bf16 %v1531_v49, %v1531_v49 }
0x2143   :  { %v1534_v58 = vunpack.c.l.bf16 %v1533_v54 }
0x2145   :  { %v1630_v59 = vpop.f32.mrf.mxu2  ;;  %v1536_v45 = vmul.f32 %v1535_v61, %v1534_v58 }
0x2146   :  { %v1562_v5 = vpop.f32.mrf.mxu3 }
0x2147   :  { %v1537_v6 = vpack.c.bf16 %v1536_v45, %v1536_v45 }
0x2149   :  { %1546 = vmatmul.bf16.vlgmr.msra.gmra.mxu1 %v1537_v6 }
0x214a   :  { %1969 = vmatpush.bf16.msra.mxu1 %v3499_v43 }
0x21b1   :  { %v1566_v10 = vpop.permute.xlu0 %1565 }
0x21c6   :  { %v1547_v11 = vpop.f32.mrf.mxu1 }
0x21c7   :  { %v1568_v12 = vadd.f32 %v1566_v10, %v1547_v11 }
0x21c9   :  { %v3765_v14 = vadd.f32 %v1568_v12, %v3616_v42 }
0x21cb   :  { %1598 = vperm.xlu2 %2996, %v3765_v14   ;;  %1592 = vperm.xlu1 %2995, %v3765_v14   ;;  %v1570_v34 = vmax.f32 %v3765_v14, -9.0 }
0x21cd   :  { %v3770_v26 = vmin.f32 %v1570_v34, 4.0 }
0x21ce   :  { %v1549_v32 = vpop.f32.mrf.mxu1 }
0x21cf   :  { %1605 = vperm.xlu0 %2991, %v3770_v26   ;;  %v1572_v10 = vmul.f32 1.442695, %v3770_v26 }
0x21d3   :  { %2997 = vset.pattern.permute.xlu1 %v3224_v55 }
0x21d4   :  { %1611 = vperm.xlu1 %2997, %v3770_v26  }
0x21d7   :  { %2998 = vset.pattern.permute.xlu0 %v3212_v1 }
0x21dc   :  { %2999 = vset.pattern.permute.xlu1 %v3211_v0 }
0x2225   :  { %v1599_v17 = vpop.permute.xlu2 %1598 }
0x2226   :  { %v1601_v31 = vmul.f32 %v3458_v3, %v1599_v17 }
0x223d   :  { %v1593_v43 = vpop.permute.xlu1 %1592 }
0x223e   :  { %v1595_v29 = vmul.f32 %v3453_v63, %v1593_v43 }
0x2240   :  { %v1596_v9 = vadd.f32 %v1595_v29, %v1547_v11 }
0x2241   :  { %v1606_v41 = vpop.permute.xlu0 %1605 }
0x2242   :  { %v1602_v8 = vadd.f32 %v1601_v31, %v1596_v9  ;;  %v1608_v30 = vmul.f32 %v3463_v4, %v1606_v41 }
0x2244   :  { %v1609_v35 = vadd.f32 %v1608_v30, %v1602_v8 }
0x2246   :  { %v1612_v48 = vpop.permute.xlu1 %1611 }
0x2247   :  { %v1614_v36 = vmul.f32 %v3469_v47, %v1612_v48 }
0x2249   :  { %v1615_v27 = vadd.f32 %v1614_v36, %v1609_v35 }
0x224b   :  { %v1616_v50 = vadd.f32 %v3477_v13, %v1615_v27 }
0x224d   :  { %v1617_v39 = vmax.f32 %v1616_v50, 0.0 }
0x224f   :  { %v1618_v33 = vpack.c.bf16 %v1617_v39, %v1617_v39 }
0x2251   :  { %2899 = vmatmul.msk.bf16.vlgmr.msrb.gmra.mxu0 %vm179_vm0, %v1618_v33 }
0x2252   :  { %2004 = vmatpush.bf16.msrb.mxu0 %v3543_v15  ;;  %v1574_v15 = vld [vmem:[%s4233_s1 + $0x88] sm:$0xff] }
0x2256   :  { %2005 = vmatpush.bf16.msrb.mxu0 %v3549_v16 }
0x225a   :  { %2006 = vmatpush.bf16.msrb.mxu0 %v3556_v18 }
0x225e   :  { %2007 = vmatpush.bf16.msrb.mxu0 %v3563_v19 }
0x2262   :  { %2008 = vmatpush.bf16.msrb.mxu0 %v3570_v20 }
0x2266   :  { %2009 = vmatpush.bf16.msrb.mxu0 %v3578_v21 }
0x226a   :  { %2010 = vmatpush.bf16.msrb.mxu0 %v3585_v22 }
0x226e   :  { %2011 = vmatpush.bf16.msrb.mxu0 %v3592_v24 }
0x22ce   :  { %v1644_v63 = vpop.f32.mrf.mxu0 }
0x22cf   :  { %v1645_v3 = vadd.f32 %v1644_v63, %v1628_v40 }
0x22d1   :  { %v1648_v4 = vadd.f32 %v3485_v23, %v1645_v3 }
0x22d3   :  { %3137 = vtanh.f32 %v1648_v4  ;;  %v2900_v16 = vmul.f32 -1.442695, %v1648_v4 }
0x22d5   :  { %3139 = vpow2.f32 %v2900_v16 }
0x22d6   :  { %v1646_v47 = vpop.f32.mrf.mxu0 }
0x22d9   :  { %v3138_v13 = vpop.eup %3137 }
0x22da   :  { %1671 = vrot.lane.b32.xlu2 %v3138_v13, %s3214_s6 }
0x22db   :  { %v3140_v18 = vpop.eup %3139 }
0x22dc   :  { %v1652_v19 = vadd.f32 1.0, %v3140_v18 }
0x22de   :  { %3141 = vrcp.f32 %v1652_v19  ;;  %v1664_v40 = vand.u32 2147483648, %v1652_v19  ;;  %vm1658_vm6 = vweird.f32 %v1652_v19  ;;  %v1662_v62 = vand.u32 2147483647, %v1652_v19 }
0x22e0   :  { %v1665_v54 = vor.u32 1.1754944e-38, %v1664_v40  ;;  %vm1663_vm8 = vcmp.eq.f32.partialorder %v1662_v62, 8.507059e+37 }
0x22e2   :  { %1576 = vrot.lane.b32.xlu2 %v1574_v15, %s3225_s5 }
0x22e4   :  { %v3142_v20 = vpop.eup %3141 }
0x22e5   :  { %v1654_v21 = vmul.f32 %v3142_v20, %v1652_v19  ;;  %vm1659_vm5 = vweird.f32 %v3142_v20 }
0x22e6   :  { %vm1660_vm7 = vmor %vm1658_vm6, %vm1659_vm5 }
0x22e7   :  { %v1655_v22 = vsub.f32 1.0, %v1654_v21  ;;  %v3844_v21 = vld [vmem:[%s4234_s0 + $0x18] sm:$0xff] }
0x22e9   :  { %v1656_v23 = vmul.f32 %v3142_v20, %v1655_v22 }
0x22eb   :  { %v1657_v24 = vadd.f32 %v3142_v20, %v1656_v23 }
0x22ed   :  { %v1661_v49 = vsel %vm1660_vm7, %v3142_v20, %v1657_v24 }
0x22ee   :  { %v1666_v58 = vsel %vm1663_vm8, %v1665_v54, %v1661_v49  ;;  %v1807_v54 = vld [vmem:[%s4233_s1 + $0x90] sm:$0xff] }
0x22ef   :  { %v1668_v45 = vmul.f32 %v1666_v58, %v3714_v56 }
0x2334   :  { %v1672_v61 = vpop.permute.xlu2 %1671 }
0x2335   :  { %v1674_v59 = vmul.f32 %v1672_v61, %v1666_v58 }
0x2337   :  { %1676 = vrot.lane.b32.xlu0 %v1674_v59, %s3213_s27  ;;  %v3867_v59 = vld [vmem:[%s4233_s1 + $0x9] ss:$0 sm:$0xff] }
0x233c   :  { %v1577_v12 = vpop.permute.xlu2 %1576 }
0x23a9   :  { %v1677_v5 = vpop.permute.xlu0 %1676 }
0x23aa   :  { %v3799_v6 = vadd.f32 %v1677_v5, %v1668_v45 }
0x23ac   :  { %3143 = vtanh.f32 %v3799_v6 }
0x23ad   :  { %3145 = vpow2.f32 %v1572_v10  ;;  %v3873_v10 = vld [vmem:[%s4233_s1 + $0xa] ss:$0 sm:$0xff] }
0x23b2   :  { %v3144_v11 = vpop.eup %3143 }
0x23b3   :  { %1682 = vrot.lane.b32.xlu1 %v3144_v11, %s3213_s27  ;;  %v3146_v34 = vpop.eup %3145 }
0x23b4   :  { %v1579_v32 = vmul.f32 %v3146_v34, %v1577_v12 }
0x23bb   :  { %1581 = vrot.lane.b32.xlu1 %v1579_v32, %s3226_s8  ;;  %v3879_v32 = vld [vmem:[%s4233_s1 + $0xb] ss:$0 sm:$0xff] }
0x2425   :  { %v1683_v43 = vpop.permute.xlu1 %1682 }
0x2426   :  { %v1685_v17 = vmul.f32 %v1683_v43, %v1666_v58 }
0x2428   :  { %v1686_v29 = vpack.c.bf16 %v1685_v17, %v1685_v17 }
0x242a   :  { %1724 = vrot.lane.b32.xlu0 %v1686_v29, %s3215_s7 }
0x242d   :  { %v1582_v56 = vpop.permute.xlu1 %1581 }
0x242e   :  { %v3807_v9 = vadd.f32 %v1582_v56, %v3765_v14  ;;  %v3823_v14 = vld [vmem:[%s4234_s0 + $0x10] sm:$0xff]  ;;  %v3885_v56 = vld [vmem:[%s4233_s1 + $0xc] ss:$0 sm:$0xff] }
0x2430   :  { %1586 = vrot.lane.b32.xlu2 %v3807_v9, %s3216_s22 }
0x248a   :  { %v1587_v26 = vpop.permute.xlu2 %1586 }
0x248b   :  { %v3812_v31 = vadd.f32 %v1587_v26, %v3729_v28 }
0x248d   :  { %1694 = vperm.xlu1 %2999, %v3812_v31   ;;  %1689 = vperm.xlu0 %2998, %v3812_v31  }
0x2495   :  { %3000 = vset.pattern.permute.xlu1 %v3222_v37  ;;  %3001 = vset.pattern.permute.xlu0 %v3223_v38 }
0x249c   :  { %v1725_v41 = vpop.permute.xlu0 %1724 }
0x249d   :  { %2902 = vmatmul.msk.bf16.vlgmr.msra.gmra.mxu2 %vm179_vm0, %v1725_v41  ;;  %2905 = vmatmul.msk.bf16.vlgmr.msrb.gmra.mxu1 %vm179_vm0, %v1725_v41 }
0x249e   :  { %2108 = vmatpush.bf16.msrb.mxu1 %v3823_v14 }
0x24ff   :  { %v1695_v28 = vpop.permute.xlu1 %1694  ;;  %v1690_v8 = vpop.permute.xlu0 %1689 }
0x2500   :  { %v1697_v30 = vmul.f32 %v3512_v53, %v1695_v28  ;;  %v1692_v48 = vmul.f32 %v3506_v51, %v1690_v8  ;;  %v3891_v28 = vld [vmem:[%s4233_s1 + $0x4] ss:$0 sm:$0xff] }
0x2502   :  { %v1698_v35 = vadd.f32 %v1697_v30, %v1692_v48 }
0x2504   :  { %v1699_v36 = vmul.f32 %v1698_v35, %v3519_v57 }
0x2506   :  { %1715 = vmatpush.msra.mxu3 %v1699_v36 }
0x2507   :  { %2901 = vmatmul.msk.f32.vlgmr.msra.gmra.mxu3 %vm915_vm11, %v3220_v2 }
0x251a   :  { %v3831_v27 = vpop.f32.mrf.mxu1 }
0x2520   :  { %v1738_v50 = vpop.f32.mrf.mxu2 }
0x2521   :  { %v1742_v39 = vmul.f32 %v1738_v50, %v3519_v57  ;;  %v1768_v57 = vunpack.c.h.bf16 %v3759_v46  ;;  %v3899_v50 = vld [vmem:[%s4233_s1 + $0x1] ss:$0 sm:$0xff] }
0x2522   :  { %v1863_v33 = vpop.f32.mrf.mxu1 }
0x2523   :  { %1758 = vmatpush.msrb.mxu3 %v1742_v39 }
0x2524   :  { %2903 = vmatmul.msk.f32.vlgmr.msrb.gmra.mxu3 %vm915_vm11, %v3220_v2 }
0x2525   :  { %1791 = vmatpush.bf16.msra.mxu3 %v3525_v60 }
0x2528   :  { %v1740_v51 = vpop.f32.mrf.mxu2 }
0x252c   :  { %2904 = vmatmul.msk.bf16.vlgmr.msra.gmra.mxu3 %vm179_vm0, %v1725_v41 }
0x258a   :  { %v1717_v53 = vpop.f32.mrf.mxu3 }
0x258b   :  { %v1720_v63 = vsub.f32 %v1698_v35, %v1717_v53 }
0x258d   :  { %v1721_v3 = vadd.f32 %v3604_v7, %v1720_v63 }
0x258f   :  { %v1722_v4 = vmax.f32 %v1721_v3, 0.0 }
0x25a7   :  { %v1760_v47 = vpop.f32.mrf.mxu3 }
0x25a8   :  { %v1763_v13 = vadd.f32 %v1760_v47, %v1722_v4 }
0x25aa   :  { %v1764_v15 = vmax.f32 %v1763_v13, 0.0 }
0x25ac   :  { %v1766_v16 = vpack.c.bf16 %v1764_v15, %v1764_v15 }
0x25ae   :  { %v1767_v18 = vunpack.c.l.bf16 %v1766_v16 }
0x25af   :  { %v1793_v19 = vpop.f32.mrf.mxu3 }
0x25b0   :  { %v1769_v20 = vmul.f32 %v1768_v57, %v1767_v18  ;;  %1798 = vrot.lane.b32.xlu2 %v1793_v19, %s3213_s27 }
0x25b2   :  { %v1770_v60 = vpack.c.bf16 %v1769_v20, %v1769_v20 }
0x25b4   :  { %1779 = vmatmul.bf16.vlgmr.msra.gmra.mxu0 %v1770_v60 }
0x25b5   :  { %2325 = vmatpush.bf16.msra.mxu0 %v3844_v21 }
0x25b7   :  { %v1795_v7 = vpop.f32.mrf.mxu3 }
0x260a   :  { %v1799_v22 = vpop.permute.xlu2 %1798 }
0x2631   :  { %v1780_v23 = vpop.f32.mrf.mxu0 }
0x2632   :  { %v1801_v24 = vadd.f32 %v1799_v22, %v1780_v23 }
0x2634   :  { %v3848_v46 = vadd.f32 %v1801_v24, %v3616_v42 }
0x2636   :  { %1831 = vperm.xlu2 %2996, %v3848_v46   ;;  %1825 = vperm.xlu1 %3000, %v3848_v46   ;;  %v1803_v40 = vmax.f32 %v3848_v46, -9.0 }
0x2638   :  { %v3853_v62 = vmin.f32 %v1803_v40, 4.0 }
0x2639   :  { %v1782_v49 = vpop.f32.mrf.mxu0 }
0x263a   :  { %1838 = vperm.xlu0 %3001, %v3853_v62   ;;  %v1805_v40 = vmul.f32 1.442695, %v3853_v62 }
0x263e   :  { %3002 = vset.pattern.permute.xlu1 %v3224_v55  ;;  %3004 = vset.pattern.permute.xlu2 %v3211_v0 }
0x263f   :  { %1844 = vperm.xlu1 %3002, %v3853_v62  }
0x2642   :  { %1809 = vrot.lane.b32.xlu0 %v1807_v54, %s3225_s5 }
0x2647   :  { %3003 = vset.pattern.permute.xlu1 %v3212_v1 }
0x2690   :  { %v1832_v58 = vpop.permute.xlu2 %1831 }
0x2691   :  { %v1834_v11 = vmul.f32 %v3873_v10, %v1832_v58 }
0x26a8   :  { %v1826_v61 = vpop.permute.xlu1 %1825 }
0x26a9   :  { %v1828_v45 = vmul.f32 %v3867_v59, %v1826_v61 }
0x26ab   :  { %v1829_v5 = vadd.f32 %v1828_v45, %v1780_v23 }
0x26ac   :  { %v1839_v12 = vpop.permute.xlu0 %1838 }
0x26ad   :  { %v1835_v34 = vadd.f32 %v1834_v11, %v1829_v5  ;;  %v1841_v43 = vmul.f32 %v3879_v32, %v1839_v12 }
0x26af   :  { %v1842_v29 = vadd.f32 %v1841_v43, %v1835_v34  ;;  %v3921_v34 = vld [vmem:[%s4234_s0 + $0x70] sm:$0xff] }
0x26b1   :  { %v1845_v17 = vpop.permute.xlu1 %1844 }
0x26b2   :  { %v1847_v26 = vmul.f32 %v3885_v56, %v1845_v17  ;;  %v3927_v17 = vld [vmem:[%s4234_s0 + $0x68] sm:$0xff] }
0x26b4   :  { %v1848_v41 = vadd.f32 %v1847_v26, %v1842_v29  ;;  %v1810_v54 = vpop.permute.xlu0 %1809  ;;  %v3938_v29 = vld [vmem:[%s4234_s0 + $0x60] sm:$0xff]  ;;  %v3944_v26 = vld [vmem:[%s4234_s0 + $0x58] sm:$0xff] }
0x26b6   :  { %v1849_v8 = vadd.f32 %v3891_v28, %v1848_v41  ;;  %v3958_v41 = vld [vmem:[%s4234_s0 + $0x48] sm:$0xff] }
0x26b8   :  { %v1850_v30 = vmax.f32 %v1849_v8, 0.0  ;;  %v3964_v8 = vld [vmem:[%s4234_s0 + $0x40] sm:$0xff] }
0x26ba   :  { %v1851_v48 = vpack.c.bf16 %v1850_v30, %v1850_v30  ;;  %v3970_v30 = vld [vmem:[%s4234_s0 + $0x38] sm:$0xff] }
0x26bc   :  { %2906 = vmatmul.msk.bf16.vlgmr.msrb.gmra.mxu2 %vm179_vm0, %v1851_v48 }
0x273f   :  { %v1877_v35 = vpop.f32.mrf.mxu2 }
0x2740   :  { %v1878_v36 = vadd.f32 %v1877_v35, %v3831_v27 }
0x2742   :  { %v1881_v39 = vadd.f32 %v3899_v50, %v1878_v36  ;;  %v3976_v36 = vld [vmem:[%s4233_s1 + $0xe] ss:$0 sm:$0xff] }
0x2744   :  { %3147 = vtanh.f32 %v1881_v39  ;;  %v2907_v53 = vmul.f32 -1.442695, %v1881_v39 }
0x2746   :  { %3149 = vpow2.f32 %v2907_v53 }
0x2747   :  { %v1879_v33 = vpop.f32.mrf.mxu2 }
0x2748   :  { %v3982_v33 = vld [vmem:[%s4233_s1 + $0xd] ss:$0 sm:$0xff] }
0x274a   :  { %v3148_v51 = vpop.eup %3147 }
0x274b   :  { %1904 = vrot.lane.b32.xlu2 %v3148_v51, %s3214_s6 }
0x274c   :  { %v3150_v63 = vpop.eup %3149 }
0x274d   :  { %v1885_v3 = vadd.f32 1.0, %v3150_v63 }
0x274f   :  { %3151 = vrcp.f32 %v1885_v3  ;;  %v1897_v16 = vand.u32 2147483648, %v1885_v3  ;;  %vm1891_vm10 = vweird.f32 %v1885_v3  ;;  %v1895_v57 = vand.u32 2147483647, %v1885_v3 }
0x2751   :  { %v1898_v19 = vor.u32 1.1754944e-38, %v1897_v16  ;;  %vm1896_vm13 = vcmp.eq.f32.partialorder %v1895_v57, 8.507059e+37 }
0x2755   :  { %v3152_v4 = vpop.eup %3151 }
0x2756   :  { %v1887_v47 = vmul.f32 %v3152_v4, %v1885_v3  ;;  %vm1892_vm9 = vweird.f32 %v3152_v4  ;;  %v3988_v3 = vld [vmem:[%s4233_s1 + $0x10] sm:$0xff] }
0x2757   :  { %vm1893_vm12 = vmor %vm1891_vm10, %vm1892_vm9 }
0x2758   :  { %v1888_v27 = vsub.f32 1.0, %v1887_v47 }
0x275a   :  { %v1889_v13 = vmul.f32 %v3152_v4, %v1888_v27  ;;  %v4000_v27 = vld [vmem:[%s4234_s0 + $0x30] sm:$0xff] }
0x275c   :  { %v1890_v15 = vadd.f32 %v3152_v4, %v1889_v13  ;;  %v4006_v13 = vld [vmem:[%s4234_s0 + $0x78] sm:$0xff] }
0x275e   :  { %v1894_v18 = vsel %vm1893_vm12, %v3152_v4, %v1890_v15  ;;  %vm2772_vm12 = vcmask 15360  }
0x275f   :  { %v1899_v60 = vsel %vm1896_vm13, %v1898_v19, %v1894_v18  ;;  %v4015_v19 = vld [vmem:[%s4233_s1 + $0xf] ss:$0 sm:$0xff]  ;;  %vm2774_vm13 = vcmask 31744  }
0x2760   :  { %v1901_v22 = vmul.f32 %v1899_v60, %v3799_v6 }
0x27a5   :  { %v1905_v20 = vpop.permute.xlu2 %1904 }
0x27a6   :  { %v1907_v7 = vmul.f32 %v1905_v20, %v1899_v60 }
0x27a8   :  { %1909 = vrot.lane.b32.xlu1 %v1907_v7, %s3213_s27 }
0x281a   :  { %v1910_v23 = vpop.permute.xlu1 %1909 }
0x281b   :  { %v3905_v24 = vadd.f32 %v1910_v23, %v1901_v22 }
0x281d   :  { %3153 = vtanh.f32 %v3905_v24 }
0x281e   :  { %3155 = vpow2.f32 %v1805_v40  ;;  %v4021_v40 = vld [vmem:[%s4234_s0 + $0x98] sm:$0xff]  }
0x2823   :  { %v3154_v49 = vpop.eup %3153 }
0x2824   :  { %1915 = vrot.lane.b32.xlu2 %v3154_v49, %s3213_s27  ;;  %v3156_v61 = vpop.eup %3155 }
0x2825   :  { %v1812_v58 = vmul.f32 %v3156_v61, %v1810_v54  ;;  %v2001_v61 = vunpack.c.l.bf16 %v4021_v40 }
0x282c   :  { %1814 = vrot.lane.b32.xlu2 %v1812_v58, %s3226_s8 }
0x287e   :  { %v1916_v45 = vpop.permute.xlu2 %1915 }
0x287f   :  { %v1918_v5 = vmul.f32 %v1916_v45, %v1899_v60 }
0x2881   :  { %v1919_v11 = vpack.c.bf16 %v1918_v5, %v1918_v5 }
0x2883   :  { %1957 = vrot.lane.b32.xlu1 %v1919_v11, %s3215_s7 }
0x2886   :  { %v1815_v6 = vpop.permute.xlu2 %1814 }
0x2887   :  { %v3913_v12 = vadd.f32 %v1815_v6, %v3848_v46 }
0x2889   :  { %1819 = vrot.lane.b32.xlu0 %v3913_v12, %s3216_s22 }
0x28f5   :  { %v1958_v62 = vpop.permute.xlu1 %1957 }
0x28f6   :  { %2909 = vmatmul.msk.bf16.vlgmr.msra.gmra.mxu1 %vm179_vm0, %v1958_v62 }
0x28f7   :  { %2237 = vmatpush.bf16.msra.mxu1 %v3921_v34 }
0x28fb   :  { %v1820_v43 = vpop.permute.xlu0 %1819  ;;  %2238 = vmatpush.bf16.msra.mxu1 %v3927_v17 }
0x28fc   :  { %v3931_v46 = vadd.f32 %v1820_v43, %v3812_v31  ;;  %v3952_v31 = vld [vmem:[%s4234_s0 + $0x50] sm:$0xff] }
0x28fe   :  { %1927 = vperm.xlu2 %3004, %v3931_v46   ;;  %1922 = vperm.xlu1 %3003, %v3931_v46  }
0x28ff   :  { %2239 = vmatpush.bf16.msra.mxu1 %v3938_v29 }
0x2903   :  { %2240 = vmatpush.bf16.msra.mxu1 %v3944_v26 }
0x2906   :  { %3006 = vset.pattern.permute.xlu2 %v3221_v44  ;;  %3005 = vset.pattern.permute.xlu1 %v3222_v37 }
0x2907   :  { %2241 = vmatpush.bf16.msra.mxu1 %v3952_v31 }
0x290b   :  { %2242 = vmatpush.bf16.msra.mxu1 %v3958_v41 }
0x290f   :  { %2243 = vmatpush.bf16.msra.mxu1 %v3964_v8 }
0x2913   :  { %2244 = vmatpush.bf16.msra.mxu1 %v3970_v30 }
0x2958   :  { %v1928_v48 = vpop.permute.xlu2 %1927 }
0x2959   :  { %v1930_v39 = vmul.f32 %v3976_v36, %v1928_v48 }
0x2970   :  { %v1923_v35 = vpop.permute.xlu1 %1922 }
0x2971   :  { %v1925_v51 = vmul.f32 %v3982_v33, %v1923_v35 }
0x2973   :  { %v1931_v53 = vadd.f32 %v1930_v39, %v1925_v51  ;;  %v1971_v63 = vpop.f32.mrf.mxu1 }
0x2974   :  { %v1975_v4 = vmul.f32 %v3988_v3, %v1971_v63 }
0x2975   :  { %v1932_v47 = vmul.f32 %v3988_v3, %v1931_v53 }
0x2976   :  { %1991 = vmatpush.msra.mxu2 %v1975_v4 }
0x2977   :  { %1948 = vmatpush.msrb.mxu3 %v1932_v47  ;;  %2910 = vmatmul.msk.f32.vlgmr.msra.gmra.mxu2 %vm915_vm11, %v3220_v2 }
0x2978   :  { %2908 = vmatmul.msk.f32.vlgmr.msrb.gmra.mxu3 %vm915_vm11, %v3220_v2  ;;  %2092 = vmatpush.bf16.msrb.mxu2 %v3844_v21 }
0x2979   :  { %2024 = vmatpush.bf16.msra.mxu3 %v4000_v27 }
0x297b   :  { %v1973_v15 = vpop.f32.mrf.mxu1 }
0x297c   :  { %2202 = vmatpush.bf16.msra.mxu2 %v4006_v13 }
0x297f   :  { %2912 = vmatmul.msk.bf16.vlgmr.msrb.gmra.mxu2 %vm179_vm0, %v1958_v62 }
0x2980   :  { %2911 = vmatmul.msk.bf16.vlgmr.msra.gmra.mxu3 %vm179_vm0, %v1958_v62  ;;  %2341 = vmatpush.bf16.msrb.mxu2 %v3823_v14 }
0x29fa   :  { %v1993_v16 = vpop.f32.mrf.mxu2 }
0x29fb   :  { %v1950_v57 = vpop.f32.mrf.mxu3 }
0x29fc   :  { %v1953_v18 = vsub.f32 %v1931_v53, %v1950_v57 }
0x29fe   :  { %v1954_v20 = vadd.f32 %v4015_v19, %v1953_v18 }
0x2a00   :  { %v1955_v60 = vmax.f32 %v1954_v20, 0.0 }
0x2a02   :  { %v1996_v7 = vadd.f32 %v1993_v16, %v1955_v60  ;;  %v2094_v22 = vpop.f32.mrf.mxu2 }
0x2a03   :  { %v2026_v23 = vpop.f32.mrf.mxu3 }
0x2a04   :  { %v1997_v49 = vmax.f32 %v1996_v7, 0.0  ;;  %2031 = vrot.lane.b32.xlu0 %v2026_v23, %s3213_s27 }
0x2a06   :  { %v1999_v54 = vpack.c.bf16 %v1997_v49, %v1997_v49 }
0x2a08   :  { %v2000_v58 = vunpack.c.l.bf16 %v1999_v54 }
0x2a0a   :  { %v2096_v45 = vpop.f32.mrf.mxu2  ;;  %v2002_v5 = vmul.f32 %v2001_v61, %v2000_v58 }
0x2a0b   :  { %v2028_v11 = vpop.f32.mrf.mxu3 }
0x2a0c   :  { %v2003_v6 = vpack.c.bf16 %v2002_v5, %v2002_v5 }
0x2a0e   :  { %2012 = vmatmul.bf16.vlgmr.msrb.gmra.mxu0 %v2003_v6 }
0x2a0f   :  { %2435 = vmatpush.bf16.msrb.mxu0 %v4006_v13 }
0x2a76   :  { %v2032_v62 = vpop.permute.xlu0 %2031 }
0x2a8b   :  { %v2013_v43 = vpop.f32.mrf.mxu0 }
0x2a8c   :  { %v2034_v48 = vadd.f32 %v2032_v62, %v2013_v43 }
0x2a8e   :  { %v4027_v35 = vadd.f32 %v2034_v48, %v3616_v42 }
0x2a90   :  { %2064 = vperm.xlu2 %3006, %v4027_v35   ;;  %2058 = vperm.xlu1 %3005, %v4027_v35   ;;  %v2036_v39 = vmax.f32 %v4027_v35, -9.0 }
0x2a92   :  { %v4032_v51 = vmin.f32 %v2036_v39, 4.0 }
0x2a93   :  { %v2015_v53 = vpop.f32.mrf.mxu0 }
0x2a94   :  { %2071 = vperm.xlu0 %3001, %v4032_v51  }
0x2a98   :  { %3007 = vset.pattern.permute.xlu1 %v3224_v55 }
0x2a99   :  { %2077 = vperm.xlu1 %3007, %v4032_v51  }
0x2a9c   :  { %3008 = vset.pattern.permute.xlu0 %v3212_v1 }
0x2aa1   :  { %3009 = vset.pattern.permute.xlu1 %v3211_v0 }
0x2aea   :  { %v2065_v4 = vpop.permute.xlu2 %2064 }
0x2aeb   :  { %v2067_v16 = vmul.f32 %v3873_v10, %v2065_v4 }
0x2b02   :  { %v2059_v63 = vpop.permute.xlu1 %2058 }
0x2b03   :  { %v2061_v47 = vmul.f32 %v3867_v59, %v2059_v63 }
0x2b05   :  { %v2062_v15 = vadd.f32 %v2061_v47, %v2013_v43  ;;  %v2040_v43 = vld [vmem:[%s4233_s1 + $0x98] sm:$0xff] }
0x2b06   :  { %v2072_v57 = vpop.permute.xlu0 %2071 }
0x2b07   :  { %v2068_v18 = vadd.f32 %v2067_v16, %v2062_v15  ;;  %v2074_v20 = vmul.f32 %v3879_v32, %v2072_v57 }
0x2b09   :  { %v2075_v7 = vadd.f32 %v2074_v20, %v2068_v18 }
0x2b0b   :  { %v2078_v60 = vpop.permute.xlu1 %2077 }
0x2b0c   :  { %v2080_v23 = vmul.f32 %v3885_v56, %v2078_v60 }
0x2b0e   :  { %v2081_v49 = vadd.f32 %v2080_v23, %v2075_v7 }
0x2b10   :  { %v2082_v54 = vadd.f32 %v3891_v28, %v2081_v49 }
0x2b12   :  { %v2083_v61 = vmax.f32 %v2082_v54, 0.0 }
0x2b14   :  { %v2084_v58 = vpack.c.bf16 %v2083_v61, %v2083_v61 }
0x2b16   :  { %2913 = vmatmul.msk.bf16.vlgmr.msrb.gmra.mxu1 %vm179_vm0, %v2084_v58  ;;  %v2038_v58 = vmul.f32 1.442695, %v4032_v51 }
0x2b17   :  { %2470 = vmatpush.bf16.msrb.mxu1 %v3921_v34 }
0x2b1b   :  { %2471 = vmatpush.bf16.msrb.mxu1 %v3927_v17 }
0x2b1f   :  { %2472 = vmatpush.bf16.msrb.mxu1 %v3938_v29 }
0x2b23   :  { %2473 = vmatpush.bf16.msrb.mxu1 %v3944_v26 }
0x2b27   :  { %2474 = vmatpush.bf16.msrb.mxu1 %v3952_v31 }
0x2b2b   :  { %2475 = vmatpush.bf16.msrb.mxu1 %v3958_v41 }
0x2b2f   :  { %2476 = vmatpush.bf16.msrb.mxu1 %v3964_v8 }
0x2b33   :  { %2477 = vmatpush.bf16.msrb.mxu1 %v3970_v30 }
0x2b93   :  { %v2110_v45 = vpop.f32.mrf.mxu1 }
0x2b94   :  { %v2111_v5 = vadd.f32 %v2110_v45, %v2094_v22 }
0x2b96   :  { %v2114_v11 = vadd.f32 %v3899_v50, %v2111_v5 }
0x2b98   :  { %3157 = vtanh.f32 %v2114_v11  ;;  %v2914_v48 = vmul.f32 -1.442695, %v2114_v11 }
0x2b9a   :  { %3159 = vpow2.f32 %v2914_v48 }
0x2b9b   :  { %v2112_v6 = vpop.f32.mrf.mxu1 }
0x2b9e   :  { %v3158_v62 = vpop.eup %3157 }
0x2b9f   :  { %2137 = vrot.lane.b32.xlu2 %v3158_v62, %s3214_s6 }
0x2ba0   :  { %v3160_v39 = vpop.eup %3159 }
0x2ba1   :  { %v2118_v53 = vadd.f32 1.0, %v3160_v39 }
0x2ba3   :  { %3161 = vrcp.f32 %v2118_v53  ;;  %v2130_v16 = vand.u32 2147483648, %v2118_v53  ;;  %vm2124_vm15 = vweird.f32 %v2118_v53  ;;  %v2128_v57 = vand.u32 2147483647, %v2118_v53 }
0x2ba5   :  { %v2131_v20 = vor.u32 1.1754944e-38, %v2130_v16  ;;  %vm2129_vm2 = vcmp.eq.f32.partialorder %v2128_v57, 8.507059e+37 }
0x2ba7   :  { %2042 = vrot.lane.b32.xlu2 %v2040_v43, %s3225_s5 }
0x2ba9   :  { %v3162_v63 = vpop.eup %3161 }
0x2baa   :  { %v2120_v22 = vmul.f32 %v3162_v63, %v2118_v53  ;;  %vm2125_vm14 = vweird.f32 %v3162_v63 }
0x2bab   :  { %vm2126_vm1 = vmor %vm2124_vm15, %vm2125_vm14  ;;  %vm2776_vm14 = vcmask 48128   ;;  %vm2779_vm15 = vcmask 80896  }
0x2bac   :  { %v2121_v4 = vsub.f32 1.0, %v2120_v22 }
0x2bae   :  { %v2122_v47 = vmul.f32 %v3162_v63, %v2121_v4 }
0x2bb0   :  { %v2123_v15 = vadd.f32 %v3162_v63, %v2122_v47 }
0x2bb2   :  { %v2127_v18 = vsel %vm2126_vm1, %v3162_v63, %v2123_v15  ;;  %vm2781_vm1 = vcmask 97280  }
0x2bb3   :  { %v2132_v7 = vsel %vm2129_vm2, %v2131_v20, %v2127_v18  ;;  %vm2783_vm2 = vcmask 113664  }
0x2bb4   :  { %v2134_v49 = vmul.f32 %v2132_v7, %v3905_v24 }
0x2bf9   :  { %v2138_v60 = vpop.permute.xlu2 %2137 }
0x2bfa   :  { %v2140_v23 = vmul.f32 %v2138_v60, %v2132_v7 }
0x2bfc   :  { %2142 = vrot.lane.b32.xlu0 %v2140_v23, %s3213_s27 }
0x2c01   :  { %v2043_v5 = vpop.permute.xlu2 %2042 }
0x2c6e   :  { %v2143_v54 = vpop.permute.xlu0 %2142 }
0x2c6f   :  { %v4061_v61 = vadd.f32 %v2143_v54, %v2134_v49 }
0x2c71   :  { %3163 = vtanh.f32 %v4061_v61 }
0x2c72   :  { %3165 = vpow2.f32 %v2038_v58 }
0x2c77   :  { %v3164_v45 = vpop.eup %3163 }
0x2c78   :  { %2148 = vrot.lane.b32.xlu1 %v3164_v45, %s3213_s27  ;;  %v3166_v11 = vpop.eup %3165 }
0x2c79   :  { %v2045_v6 = vmul.f32 %v3166_v11, %v2043_v5  ;;  %v2234_v5 = vunpack.c.h.bf16 %v4021_v40 }
0x2c80   :  { %2047 = vrot.lane.b32.xlu1 %v2045_v6, %s3226_s8 }
0x2cea   :  { %v2149_v62 = vpop.permute.xlu1 %2148 }
0x2ceb   :  { %v2151_v43 = vmul.f32 %v2149_v62, %v2132_v7 }
0x2ced   :  { %v2152_v48 = vpack.c.bf16 %v2151_v43, %v2151_v43 }
0x2cef   :  { %2190 = vrot.lane.b32.xlu0 %v2152_v48, %s3215_s7 }
0x2cf2   :  { %v2048_v24 = vpop.permute.xlu1 %2047 }
0x2cf3   :  { %v4069_v39 = vadd.f32 %v2048_v24, %v4027_v35 }
0x2cf5   :  { %2052 = vrot.lane.b32.xlu2 %v4069_v39, %s3216_s22 }
0x2d4f   :  { %v2053_v51 = vpop.permute.xlu2 %2052 }
0x2d50   :  { %v4074_v53 = vadd.f32 %v2053_v51, %v3931_v46 }
0x2d52   :  { %2160 = vperm.xlu1 %3009, %v4074_v53   ;;  %2155 = vperm.xlu0 %3008, %v4074_v53  }
0x2d5a   :  { %3010 = vset.pattern.permute.xlu1 %v3222_v37  ;;  %3011 = vset.pattern.permute.xlu0 %v3223_v38 }
0x2d61   :  { %v2191_v63 = vpop.permute.xlu0 %2190 }
0x2d62   :  { %2916 = vmatmul.msk.bf16.vlgmr.msra.gmra.mxu2 %vm179_vm0, %v2191_v63  ;;  %2919 = vmatmul.msk.bf16.vlgmr.msra.gmra.mxu0 %vm179_vm0, %v2191_v63 }
0x2d63   :  { %2574 = vmatpush.bf16.msra.mxu0 %v3823_v14 }
0x2dc4   :  { %v2161_v35 = vpop.permute.xlu1 %2160  ;;  %v2156_v22 = vpop.permute.xlu0 %2155 }
0x2dc5   :  { %v2163_v46 = vmul.f32 %v3976_v36, %v2161_v35  ;;  %v2158_v4 = vmul.f32 %v3982_v33, %v2156_v22 }
0x2dc7   :  { %v2164_v47 = vadd.f32 %v2163_v46, %v2158_v4  ;;  %v2273_v4 = vld [vmem:[%s4233_s1 + $0xa0] sm:$0xff] }
0x2dc9   :  { %v2165_v15 = vmul.f32 %v3988_v3, %v2164_v47 }
0x2dcb   :  { %2181 = vmatpush.msrb.mxu3 %v2165_v15 }
0x2dcc   :  { %2915 = vmatmul.msk.f32.vlgmr.msrb.gmra.mxu3 %vm915_vm11, %v3220_v2 }
0x2ddf   :  { %v2327_v38 = vpop.f32.mrf.mxu0 }
0x2de5   :  { %v2204_v16 = vpop.f32.mrf.mxu2 }
0x2de6   :  { %v2208_v57 = vmul.f32 %v3988_v3, %v2204_v16 }
0x2de7   :  { %v2329_v18 = vpop.f32.mrf.mxu0 }
0x2de8   :  { %2224 = vmatpush.msra.mxu3 %v2208_v57 }
0x2de9   :  { %2917 = vmatmul.msk.f32.vlgmr.msra.gmra.mxu3 %vm915_vm11, %v3220_v2 }
0x2dea   :  { %2257 = vmatpush.bf16.msrb.mxu3 %v4000_v27 }
0x2ded   :  { %v2206_v14 = vpop.f32.mrf.mxu2 }
0x2df1   :  { %2918 = vmatmul.msk.bf16.vlgmr.msrb.gmra.mxu3 %vm179_vm0, %v2191_v63 }
0x2e4f   :  { %v2183_v20 = vpop.f32.mrf.mxu3 }
0x2e50   :  { %v2186_v60 = vsub.f32 %v2164_v47, %v2183_v20 }
0x2e52   :  { %v2187_v7 = vadd.f32 %v4015_v19, %v2186_v60 }
0x2e54   :  { %v2188_v23 = vmax.f32 %v2187_v7, 0.0 }
0x2e6c   :  { %v2226_v49 = vpop.f32.mrf.mxu3 }
0x2e6d   :  { %v2229_v54 = vadd.f32 %v2226_v49, %v2188_v23 }
0x2e6f   :  { %v2230_v58 = vmax.f32 %v2229_v54, 0.0 }
0x2e71   :  { %v2232_v45 = vpack.c.bf16 %v2230_v58, %v2230_v58 }
0x2e73   :  { %v2233_v11 = vunpack.c.l.bf16 %v2232_v45 }
0x2e74   :  { %v2259_v6 = vpop.f32.mrf.mxu3 }
0x2e75   :  { %v2235_v62 = vmul.f32 %v2234_v5, %v2233_v11  ;;  %2264 = vrot.lane.b32.xlu2 %v2259_v6, %s3213_s27 }
0x2e77   :  { %v2236_v43 = vpack.c.bf16 %v2235_v62, %v2235_v62 }
0x2e79   :  { %2245 = vmatmul.bf16.vlgmr.msra.gmra.mxu1 %v2236_v43 }
0x2e7c   :  { %v2261_v48 = vpop.f32.mrf.mxu3 }
0x2ecf   :  { %v2265_v24 = vpop.permute.xlu2 %2264 }
0x2ef6   :  { %v2246_v51 = vpop.f32.mrf.mxu1 }
0x2ef7   :  { %v2267_v63 = vadd.f32 %v2265_v24, %v2246_v51 }
0x2ef9   :  { %v4097_v35 = vadd.f32 %v2267_v63, %v3616_v42 }
0x2efb   :  { %2297 = vperm.xlu2 %3006, %v4097_v35   ;;  %2291 = vperm.xlu1 %3010, %v4097_v35   ;;  %v2269_v40 = vmax.f32 %v4097_v35, -9.0 }
0x2efd   :  { %v2270_v22 = vmin.f32 %v2269_v40, 4.0 }
0x2efe   :  { %v2248_v46 = vpop.f32.mrf.mxu1 }
0x2eff   :  { %2304 = vperm.xlu0 %3011, %v2270_v22  }
0x2f03   :  { %3012 = vset.pattern.permute.xlu1 %v3224_v55  ;;  %3014 = vset.pattern.permute.xlu2 %v3211_v0 }
0x2f04   :  { %2310 = vperm.xlu1 %3012, %v2270_v22  }
0x2f07   :  { %2275 = vrot.lane.b32.xlu0 %v2273_v4, %s3225_s5 }
0x2f0c   :  { %3013 = vset.pattern.permute.xlu1 %v3212_v1 }
0x2f55   :  { %v2298_v15 = vpop.permute.xlu2 %2297 }
0x2f56   :  { %v2300_v18 = vmul.f32 %v3873_v10, %v2298_v15 }
0x2f6d   :  { %v2292_v47 = vpop.permute.xlu1 %2291 }
0x2f6e   :  { %v2294_v16 = vmul.f32 %v3867_v59, %v2292_v47 }
0x2f70   :  { %v2295_v57 = vadd.f32 %v2294_v16, %v2246_v51 }
0x2f71   :  { %v2305_v14 = vpop.permute.xlu0 %2304 }
0x2f72   :  { %v2301_v20 = vadd.f32 %v2300_v18, %v2295_v57  ;;  %v2307_v60 = vmul.f32 %v3879_v32, %v2305_v14 }
0x2f74   :  { %v2308_v23 = vadd.f32 %v2307_v60, %v2301_v20 }
0x2f76   :  { %v2311_v7 = vpop.permute.xlu1 %2310 }
0x2f77   :  { %v2313_v49 = vmul.f32 %v3885_v56, %v2311_v7 }
0x2f79   :  { %v2314_v54 = vadd.f32 %v2313_v49, %v2308_v23 }
0x2f7b   :  { %v2315_v58 = vadd.f32 %v3891_v28, %v2314_v54  ;;  %v2271_v54 = vmul.f32 1.442695, %v2270_v22 }
0x2f7d   :  { %v2316_v45 = vmax.f32 %v2315_v58, 0.0 }
0x2f7f   :  { %v2317_v5 = vpack.c.bf16 %v2316_v45, %v2316_v45  ;;  %v2276_v45 = vpop.permute.xlu0 %2275 }
0x2f81   :  { %2920 = vmatmul.msk.bf16.vlgmr.msrb.gmra.mxu2 %vm179_vm0, %v2317_v5 }
0x3004   :  { %v2343_v11 = vpop.f32.mrf.mxu2 }
0x3005   :  { %v2344_v6 = vadd.f32 %v2343_v11, %v2327_v38 }
0x3007   :  { %v2347_v62 = vadd.f32 %v3899_v50, %v2344_v6 }
0x3009   :  { %3167 = vtanh.f32 %v2347_v62  ;;  %v2921_v24 = vmul.f32 -1.442695, %v2347_v62 }
0x300b   :  { %3169 = vpow2.f32 %v2921_v24 }
0x300c   :  { %v2345_v43 = vpop.f32.mrf.mxu2 }
0x300f   :  { %v3168_v48 = vpop.eup %3167 }
0x3010   :  { %2370 = vrot.lane.b32.xlu2 %v3168_v48, %s3214_s6 }
0x3011   :  { %v3170_v51 = vpop.eup %3169 }
0x3012   :  { %v2351_v63 = vadd.f32 1.0, %v3170_v51 }
0x3014   :  { %3171 = vrcp.f32 %v2351_v63  ;;  %v2363_v16 = vand.u32 2147483648, %v2351_v63  ;;  %vm2357_vm4 = vweird.f32 %v2351_v63  ;;  %v2361_v38 = vand.u32 2147483647, %v2351_v63 }
0x3016   :  { %v2364_v18 = vor.u32 1.1754944e-38, %v2363_v16  ;;  %vm2362_vm6 = vcmp.eq.f32.partialorder %v2361_v38, 8.507059e+37 }
0x301a   :  { %v3172_v40 = vpop.eup %3171 }
0x301b   :  { %v2353_v46 = vmul.f32 %v3172_v40, %v2351_v63  ;;  %vm2358_vm3 = vweird.f32 %v3172_v40 }
0x301c   :  { %vm2359_vm5 = vmor %vm2357_vm4, %vm2358_vm3 }
0x301d   :  { %v2354_v4 = vsub.f32 1.0, %v2353_v46 }
0x301f   :  { %v2355_v47 = vmul.f32 %v3172_v40, %v2354_v4 }
0x3021   :  { %v2356_v15 = vadd.f32 %v3172_v40, %v2355_v47 }
0x3023   :  { %v2360_v57 = vsel %vm2359_vm5, %v3172_v40, %v2356_v15 }
0x3024   :  { %v2365_v20 = vsel %vm2362_vm6, %v2364_v18, %v2360_v57 }
0x3025   :  { %v2367_v7 = vmul.f32 %v2365_v20, %v4061_v61 }
0x306a   :  { %v2371_v14 = vpop.permute.xlu2 %2370 }
0x306b   :  { %v2373_v60 = vmul.f32 %v2371_v14, %v2365_v20 }
0x306d   :  { %2375 = vrot.lane.b32.xlu1 %v2373_v60, %s3213_s27 }
0x30df   :  { %v2376_v23 = vpop.permute.xlu1 %2375 }
0x30e0   :  { %v4119_v49 = vadd.f32 %v2376_v23, %v2367_v7 }
0x30e2   :  { %3173 = vtanh.f32 %v4119_v49 }
0x30e3   :  { %3175 = vpow2.f32 %v2271_v54 }
0x30e8   :  { %v3174_v58 = vpop.eup %3173 }
0x30e9   :  { %2381 = vrot.lane.b32.xlu2 %v3174_v58, %s3213_s27  ;;  %v3176_v5 = vpop.eup %3175 }
0x30ea   :  { %v2278_v11 = vmul.f32 %v3176_v5, %v2276_v45 }
0x30f1   :  { %2280 = vrot.lane.b32.xlu2 %v2278_v11, %s3226_s8 }
0x3143   :  { %v2382_v6 = vpop.permute.xlu2 %2381 }
0x3144   :  { %v2384_v62 = vmul.f32 %v2382_v6, %v2365_v20 }
0x3146   :  { %v2385_v43 = vpack.c.bf16 %v2384_v62, %v2384_v62 }
0x3148   :  { %2423 = vrot.lane.b32.xlu1 %v2385_v43, %s3215_s7 }
0x314b   :  { %v2281_v61 = vpop.permute.xlu2 %2280 }
0x314c   :  { %v4126_v48 = vadd.f32 %v2281_v61, %v4097_v35 }
0x314e   :  { %2285 = vrot.lane.b32.xlu0 %v4126_v48, %s3216_s22 }
0x31ba   :  { %v2424_v22 = vpop.permute.xlu1 %2423 }
0x31bb   :  { %2923 = vmatmul.msk.bf16.vlgmr.msrb.gmra.mxu0 %vm179_vm0, %v2424_v22 }
0x31bc   :  { %2703 = vmatpush.bf16.msrb.mxu0 %v3921_v34 }
0x31c0   :  { %v2286_v24 = vpop.permute.xlu0 %2285  ;;  %2704 = vmatpush.bf16.msrb.mxu0 %v3927_v17 }
0x31c1   :  { %v4134_v51 = vadd.f32 %v2286_v24, %v4074_v53 }
0x31c3   :  { %2393 = vperm.xlu2 %3014, %v4134_v51   ;;  %2388 = vperm.xlu1 %3013, %v4134_v51  }
0x31c4   :  { %2705 = vmatpush.bf16.msrb.mxu0 %v3938_v29 }
0x31c8   :  { %2706 = vmatpush.bf16.msrb.mxu0 %v3944_v26 }
0x31cb   :  { %3016 = vset.pattern.permute.xlu2 %v3221_v44  ;;  %3015 = vset.pattern.permute.xlu1 %v3222_v37 }
0x31cc   :  { %2707 = vmatpush.bf16.msrb.mxu0 %v3952_v31 }
0x31d0   :  { %2708 = vmatpush.bf16.msrb.mxu0 %v3958_v41 }
0x31d4   :  { %2709 = vmatpush.bf16.msrb.mxu0 %v3964_v8 }
0x31d8   :  { %2710 = vmatpush.bf16.msrb.mxu0 %v3970_v30 }
0x321d   :  { %v2394_v34 = vpop.permute.xlu2 %2393 }
0x321e   :  { %v2396_v53 = vmul.f32 %v3976_v36, %v2394_v34 }
0x3235   :  { %v2389_v17 = vpop.permute.xlu1 %2388 }
0x3236   :  { %v2391_v29 = vmul.f32 %v3982_v33, %v2389_v17 }
0x3238   :  { %v2397_v35 = vadd.f32 %v2396_v53, %v2391_v29  ;;  %v2437_v26 = vpop.f32.mrf.mxu0 }
0x3239   :  { %v2441_v44 = vmul.f32 %v3988_v3, %v2437_v26 }
0x323a   :  { %v2398_v37 = vmul.f32 %v3988_v3, %v2397_v35 }
0x323b   :  { %2457 = vmatpush.msra.mxu2 %v2441_v44 }
0x323c   :  { %2414 = vmatpush.msra.mxu3 %v2398_v37  ;;  %2924 = vmatmul.msk.f32.vlgmr.msra.gmra.mxu2 %vm915_vm11, %v3220_v2 }
0x323d   :  { %2922 = vmatmul.msk.f32.vlgmr.msra.gmra.mxu3 %vm915_vm11, %v3220_v2  ;;  %2558 = vmatpush.bf16.msrb.mxu2 %v3844_v21  ;;  %v4163_v21 = vld [vmem:[%s4234_s0 + $0xa0] sm:$0xff]  }
0x323e   :  { %2490 = vmatpush.bf16.msrb.mxu3 %v4000_v27  ;;  %v2467_v16 = vunpack.c.l.bf16 %v4163_v21 }
0x3240   :  { %v2439_v31 = vpop.f32.mrf.mxu0 }
0x3241   :  { %2668 = vmatpush.bf16.msra.mxu2 %v4006_v13 }
0x3244   :  { %2926 = vmatmul.msk.bf16.vlgmr.msrb.gmra.mxu2 %vm179_vm0, %v2424_v22 }
0x3245   :  { %2925 = vmatmul.msk.bf16.vlgmr.msrb.gmra.mxu3 %vm179_vm0, %v2424_v22 }
0x32bf   :  { %v2459_v41 = vpop.f32.mrf.mxu2 }
0x32c0   :  { %v2416_v8 = vpop.f32.mrf.mxu3 }
0x32c1   :  { %v2419_v30 = vsub.f32 %v2397_v35, %v2416_v8 }
0x32c3   :  { %v2420_v63 = vadd.f32 %v4015_v19, %v2419_v30 }
0x32c5   :  { %v2421_v40 = vmax.f32 %v2420_v63, 0.0 }
0x32c7   :  { %v2462_v46 = vadd.f32 %v2459_v41, %v2421_v40  ;;  %v2560_v4 = vpop.f32.mrf.mxu2 }
0x32c8   :  { %v2492_v47 = vpop.f32.mrf.mxu3 }
0x32c9   :  { %v2463_v13 = vmax.f32 %v2462_v46, 0.0  ;;  %2497 = vrot.lane.b32.xlu0 %v2492_v47, %s3213_s27 }
0x32cb   :  { %v2465_v15 = vpack.c.bf16 %v2463_v13, %v2463_v13 }
0x32cd   :  { %v2466_v38 = vunpack.c.l.bf16 %v2465_v15 }
0x32cf   :  { %v2468_v57 = vmul.f32 %v2467_v16, %v2466_v38  ;;  %v2562_v18 = vpop.f32.mrf.mxu2 }
0x32d0   :  { %v2494_v14 = vpop.f32.mrf.mxu3 }
0x32d1   :  { %v2469_v20 = vpack.c.bf16 %v2468_v57, %v2468_v57 }
0x32d3   :  { %2478 = vmatmul.bf16.vlgmr.msrb.gmra.mxu1 %v2469_v20 }
0x333b   :  { %v2498_v60 = vpop.permute.xlu0 %2497 }
0x3350   :  { %v2479_v7 = vpop.f32.mrf.mxu1 }
0x3351   :  { %v2500_v23 = vadd.f32 %v2498_v60, %v2479_v7 }
0x3353   :  { %v4168_v54 = vadd.f32 %v2500_v23, %v3616_v42 }
0x3355   :  { %2530 = vperm.xlu2 %3016, %v4168_v54   ;;  %2524 = vperm.xlu1 %3015, %v4168_v54   ;;  %v2502_v58 = vmax.f32 %v4168_v54, -9.0 }
0x3357   :  { %v2503_v45 = vmin.f32 %v2502_v58, 4.0 }
0x3358   :  { %v2481_v5 = vpop.f32.mrf.mxu1 }
0x3359   :  { %2537 = vperm.xlu0 %3011, %v2503_v45   ;;  %v2504_v20 = vmul.f32 1.442695, %v2503_v45 }
0x335d   :  { %3017 = vset.pattern.permute.xlu1 %v3224_v55 }
0x335e   :  { %2543 = vperm.xlu1 %3017, %v2503_v45  }
0x3361   :  { %3018 = vset.pattern.permute.xlu0 %v3212_v1 }
0x3366   :  { %3019 = vset.pattern.permute.xlu1 %v3211_v0 }
0x33af   :  { %v2531_v6 = vpop.permute.xlu2 %2530 }
0x33b0   :  { %v2533_v61 = vmul.f32 %v3873_v10, %v2531_v6 }
0x33c7   :  { %v2525_v11 = vpop.permute.xlu1 %2524 }
0x33c8   :  { %v2527_v62 = vmul.f32 %v3867_v59, %v2525_v11 }
0x33ca   :  { %v2528_v43 = vadd.f32 %v2527_v62, %v2479_v7 }
0x33cb   :  { %v2538_v22 = vpop.permute.xlu0 %2537 }
0x33cc   :  { %v2534_v24 = vadd.f32 %v2533_v61, %v2528_v43  ;;  %v2540_v34 = vmul.f32 %v3879_v32, %v2538_v22  ;;  %v2506_v32 = vld [vmem:[%s4233_s1 + $0xa8] sm:$0xff]  ;;  %v2739_v61 = vld [vmem:[%s4233_s1 + $0xb0] sm:$0xff]  ;;  %s3231_s1 = smov 118  }
0x33ce   :  { %v2541_v53 = vadd.f32 %v2540_v34, %v2534_v24 }
0x33d0   :  { %v2544_v17 = vpop.permute.xlu1 %2543 }
0x33d1   :  { %v2546_v55 = vmul.f32 %v3885_v56, %v2544_v17 }
0x33d3   :  { %v2547_v29 = vadd.f32 %v2546_v55, %v2541_v53 }
0x33d5   :  { %v2548_v1 = vadd.f32 %v3891_v28, %v2547_v29 }
0x33d7   :  { %v2549_v35 = vmax.f32 %v2548_v1, 0.0 }
0x33d9   :  { %v2550_v26 = vpack.c.bf16 %v2549_v35, %v2549_v35 }
0x33db   :  { %2927 = vmatmul.msk.bf16.vlgmr.msra.gmra.mxu0 %vm179_vm0, %v2550_v26 }
0x3458   :  { %v2576_v44 = vpop.f32.mrf.mxu0 }
0x3459   :  { %v2577_v59 = vadd.f32 %v2576_v44, %v2560_v4 }
0x345b   :  { %v2580_v37 = vadd.f32 %v3899_v50, %v2577_v59 }
0x345d   :  { %3177 = vtanh.f32 %v2580_v37  ;;  %v2928_v56 = vmul.f32 -1.442695, %v2580_v37 }
0x345f   :  { %3179 = vpow2.f32 %v2928_v56 }
0x3460   :  { %v2578_v10 = vpop.f32.mrf.mxu0 }
0x3463   :  { %v3178_v31 = vpop.eup %3177 }
0x3464   :  { %2603 = vrot.lane.b32.xlu2 %v3178_v31, %s3214_s6 }
0x3465   :  { %v3180_v28 = vpop.eup %3179 }
0x3466   :  { %v2584_v41 = vadd.f32 1.0, %v3180_v28 }
0x3468   :  { %3181 = vrcp.f32 %v2584_v41  ;;  %v2596_v46 = vand.u32 2147483648, %v2584_v41  ;;  %vm2590_vm8 = vweird.f32 %v2584_v41  ;;  %v2594_v4 = vand.u32 2147483647, %v2584_v41 }
0x346a   :  { %v2597_v13 = vor.u32 1.1754944e-38, %v2596_v46  ;;  %vm2595_vm10 = vcmp.eq.f32.partialorder %v2594_v4, 8.507059e+37 }
0x346c   :  { %2508 = vrot.lane.b32.xlu2 %v2506_v32, %s3225_s5 }
0x346e   :  { %v3182_v8 = vpop.eup %3181 }
0x346f   :  { %v2586_v30 = vmul.f32 %v3182_v8, %v2584_v41  ;;  %vm2591_vm7 = vweird.f32 %v3182_v8 }
0x3470   :  { %vm2592_vm9 = vmor %vm2590_vm8, %vm2591_vm7 }
0x3471   :  { %v2587_v63 = vsub.f32 1.0, %v2586_v30 }
0x3473   :  { %v2588_v50 = vmul.f32 %v3182_v8, %v2587_v63 }
0x3475   :  { %v2589_v40 = vadd.f32 %v3182_v8, %v2588_v50 }
0x3477   :  { %v2593_v47 = vsel %vm2592_vm9, %v3182_v8, %v2589_v40 }
0x3478   :  { %v2598_v16 = vsel %vm2595_vm10, %v2597_v13, %v2593_v47 }
0x3479   :  { %v2600_v57 = vmul.f32 %v2598_v16, %v4119_v49 }
0x34be   :  { %v2604_v15 = vpop.permute.xlu2 %2603 }
0x34bf   :  { %v2606_v38 = vmul.f32 %v2604_v15, %v2598_v16 }
0x34c1   :  { %2608 = vrot.lane.b32.xlu0 %v2606_v38, %s3213_s27 }
0x34c6   :  { %v2509_v7 = vpop.permute.xlu2 %2508 }
0x3533   :  { %v2609_v18 = vpop.permute.xlu0 %2608 }
0x3534   :  { %v2611_v14 = vadd.f32 %v2609_v18, %v2600_v57 }
0x3536   :  { %3183 = vtanh.f32 %v2611_v14 }
0x3537   :  { %3185 = vpow2.f32 %v2504_v20 }
0x353c   :  { %v3184_v60 = vpop.eup %3183 }
0x353d   :  { %2614 = vrot.lane.b32.xlu1 %v3184_v60, %s3213_s27  ;;  %v3186_v23 = vpop.eup %3185 }
0x353e   :  { %v2511_v58 = vmul.f32 %v3186_v23, %v2509_v7 }
0x3545   :  { %2513 = vrot.lane.b32.xlu1 %v2511_v58, %s3226_s8 }
0x35af   :  { %v2615_v5 = vpop.permute.xlu1 %2614 }
0x35b0   :  { %v2617_v11 = vmul.f32 %v2615_v5, %v2598_v16 }
0x35b2   :  { %v2618_v6 = vpack.c.bf16 %v2617_v11, %v2617_v11 }
0x35b4   :  { %2656 = vrot.lane.b32.xlu0 %v2618_v6, %s3215_s7  ;;  %s3228_s7 = smov 116  }
0x35b7   :  { %v2514_v62 = vpop.permute.xlu1 %2513 }
0x35b8   :  { %v4194_v49 = vadd.f32 %v2514_v62, %v4168_v54 }
0x35ba   :  { %2518 = vrot.lane.b32.xlu2 %v4194_v49, %s3216_s22  ;;  %s3229_s22 = smov 120  }
0x3614   :  { %v2519_v45 = vpop.permute.xlu2 %2518 }
0x3615   :  { %v2521_v43 = vadd.f32 %v2519_v45, %v4134_v51 }
0x3617   :  { %2626 = vperm.xlu1 %3019, %v2521_v43   ;;  %2621 = vperm.xlu0 %3018, %v2521_v43  }
0x361f   :  { %2741 = vrot.lane.b32.xlu1 %v2739_v61, %s3225_s5  ;;  %2750 = vrot.lane.b32.xlu0 %v3721_v25, %s3227_s29 }
0x3620   :  { %3020 = vset.pattern.permute.xlu0 %v3211_v0 }
0x3626   :  { %v2657_v54 = vpop.permute.xlu0 %2656 }
0x3627   :  { %2930 = vmatmul.msk.bf16.vlgmr.msra.gmra.mxu2 %vm179_vm0, %v2657_v54  ;;  %2753 = vrot.lane.b32.xlu1 %v3807_v9, %s3228_s7 }
0x3628   :  { %2759 = vrot.lane.b32.xlu0 %v4069_v39, %s3229_s22 }
0x362f   :  { %2762 = vrot.lane.b32.xlu1 %v4126_v48, %s3230_s30 }
0x3689   :  { %v2627_v51 = vpop.permute.xlu1 %2626  ;;  %v2622_v22 = vpop.permute.xlu0 %2621 }
0x368a   :  { %v2629_v24 = vmul.f32 %v3976_v36, %v2627_v51  ;;  %v2624_v25 = vmul.f32 %v3982_v33, %v2622_v22 }
0x368c   :  { %v2630_v34 = vadd.f32 %v2629_v24, %v2624_v25 }
0x368e   :  { %v2631_v0 = vmul.f32 %v3988_v3, %v2630_v34 }
0x3690   :  { %2647 = vmatpush.msra.mxu3 %v2631_v0 }
0x3691   :  { %2929 = vmatmul.msk.f32.vlgmr.msra.gmra.mxu3 %vm915_vm11, %v3220_v2 }
0x36aa   :  { %v2670_v9 = vpop.f32.mrf.mxu2 }
0x36ab   :  { %v2674_v17 = vmul.f32 %v3988_v3, %v2670_v9  ;;  %v2700_v3 = vunpack.c.h.bf16 %v4163_v21  ;;  %v2742_v21 = vpop.permute.xlu1 %2741 }
0x36ad   :  { %2690 = vmatpush.msrb.mxu3 %v2674_v17 }
0x36ae   :  { %2931 = vmatmul.msk.f32.vlgmr.msrb.gmra.mxu3 %vm915_vm11, %v3220_v2 }
0x36af   :  { %2723 = vmatpush.bf16.msra.mxu3 %v4000_v27 }
0x36b2   :  { %v2672_v39 = vpop.f32.mrf.mxu2 }
0x36b3   :  { %v2754_v46 = vpop.permute.xlu1 %2753 }
0x36b6   :  { %2932 = vmatmul.msk.bf16.vlgmr.msra.gmra.mxu3 %vm179_vm0, %v2657_v54 }
0x36bb   :  { %v2763_v38 = vpop.permute.xlu1 %2762 }
0x3714   :  { %v2649_v36 = vpop.f32.mrf.mxu3 }
0x3715   :  { %v2652_v33 = vsub.f32 %v2630_v34, %v2649_v36 }
0x3717   :  { %v2653_v48 = vadd.f32 %v4015_v19, %v2652_v33 }
0x3719   :  { %v2654_v53 = vmax.f32 %v2653_v48, 0.0 }
0x3731   :  { %v2692_v55 = vpop.f32.mrf.mxu3 }
0x3732   :  { %v2695_v29 = vadd.f32 %v2692_v55, %v2654_v53 }
0x3734   :  { %v2696_v1 = vmax.f32 %v2695_v29, 0.0 }
0x3736   :  { %v2698_v35 = vpack.c.bf16 %v2696_v1, %v2696_v1 }
0x3738   :  { %v2699_v26 = vunpack.c.l.bf16 %v2698_v35 }
0x3739   :  { %v2725_v44 = vpop.f32.mrf.mxu3 }
0x373a   :  { %v2701_v59 = vmul.f32 %v2700_v3, %v2699_v26  ;;  %2730 = vrot.lane.b32.xlu2 %v2725_v44, %s3213_s27  ;;  %s3232_s27 = smov 124  }
0x373c   :  { %v2702_v2 = vpack.c.bf16 %v2701_v59, %v2701_v59 }
0x373e   :  { %2711 = vmatmul.bf16.vlgmr.msrb.gmra.mxu0 %v2702_v2 }
0x3741   :  { %v2727_v27 = vpop.f32.mrf.mxu3 }
0x3794   :  { %v2731_v37 = vpop.permute.xlu2 %2730 }
0x37bb   :  { %v2712_v10 = vpop.f32.mrf.mxu0 }
0x37bc   :  { %v2733_v31 = vadd.f32 %v2731_v37, %v2712_v10 }
0x37be   :  { %v2734_v19 = vadd.f32 %v2733_v31, %v3616_v42  ;;  %v2751_v42 = vpop.permute.xlu0 %2750 }
0x37bf   :  { %v2773_v4 = vsel %vm2772_vm12, %v3663_v52, %v2751_v42 }
0x37c0   :  { %v2735_v32 = vmax.f32 %v2734_v19, -9.0  ;;  %v2775_v47 = vsel %vm2774_vm13, %v2773_v4, %v2754_v46 }
0x37c2   :  { %v2736_v56 = vmin.f32 %v2735_v32, 4.0 }
0x37c3   :  { %v2714_v28 = vpop.f32.mrf.mxu0 }
0x37c4   :  { %v2737_v41 = vmul.f32 1.442695, %v2736_v56 }
0x37c6   :  { %3187 = vpow2.f32 %v2737_v41  ;;  %v2760_v13 = vpop.permute.xlu0 %2759 }
0x37cc   :  { %v3188_v8 = vpop.eup %3187 }
0x37cd   :  { %v2744_v30 = vmul.f32 %v3188_v8, %v2742_v21 }
0x37cf   :  { %2746 = vrot.lane.b32.xlu2 %v2744_v30, %s3226_s8 }
0x37d7   :  { %2756 = vrot.lane.b32.xlu2 %v3913_v12, %s3231_s1 }
0x37df   :  { %2765 = vrot.lane.b32.xlu2 %v4194_v49, %s3232_s27 }
0x3829   :  { %v2747_v63 = vpop.permute.xlu2 %2746 }
0x382a   :  { %v2749_v50 = vadd.f32 %v2747_v63, %v2734_v19 }
0x382c   :  { %2769 = vrot.lane.b32.xlu0 %v2749_v50, %s3226_s8 }
0x3831   :  { %v2757_v40 = vpop.permute.xlu2 %2756 }
0x3832   :  { %v2777_v15 = vsel %vm2776_vm14, %v2775_v47, %v2757_v40 }
0x3833   :  { %v2778_v12 = vsel %vm915_vm11, %v2777_v15, %v2760_v13 }
0x3834   :  { %v2780_v57 = vsel %vm2779_vm15, %v2778_v12, %v2763_v38 }
0x3839   :  { %v2766_v16 = vpop.permute.xlu2 %2765 }
0x383a   :  { %v2782_v18 = vsel %vm2781_vm1, %v2780_v57, %v2766_v16 }
0x389e   :  { %v2770_v14 = vpop.permute.xlu0 %2769 }
0x389f   :  { %v2784_v20 = vsel %vm2783_vm2, %v2782_v18, %v2770_v14 }
0x38a0   :  { %2785 = vst.msk [vmem:[%s4235_s2] sm:$0xff] %vm179_vm0, %v2784_v20 }

</bundles_post_ra>
